<compile_context>
chip_gen: v6e
topology: v6e:2x2x1
jax: 0.10.0
libtpu: 0.0.40
codegen_flags: <defaults>
</compile_context>

<pallas_src>
import functools

import jax
import jax.numpy as jnp
from jax import lax
from jax.experimental import pallas as pl
from jax.experimental.pallas import tpu as pltpu


# ---------------------------------------------------------------------------
# Kernels
# ---------------------------------------------------------------------------

def _conv4x4_s2_leaky_kernel(x_ref, w_ref, b_ref, o_ref, *, n_oh, n_ow, n_oc):
    """Fused 4x4 / stride-2 / pad-1 conv + bias + LeakyReLU(0.2), ONE image.

    x_ref: (1, Hp, Wp/2, 2C) bf16  padded input with width merged in pairs so
                                   the stride-2 column window is contiguous.
    w_ref: (4, 2, 2C, OC)   bf16   (kernel row kh, column-pair shift d, 2C, OC)
    b_ref: (1, OC)          f32
    o_ref: (1, OH, OW, OC)  bf16   hidden activations stored directly as bf16
    """
    @pl.loop(0, n_oh)
    def _row(r):
        acc = jnp.zeros((n_ow, n_oc), jnp.float32)
        for kh in range(4):                 # static, unrolled kernel-row taps
            src_row = 2 * r + kh
            for d in range(2):              # column-pair shift: kw = 2d, 2d+1
                lhs = x_ref[0, src_row, pl.ds(d, n_ow), :]        # (OW, 2C)
                acc += jnp.dot(lhs, w_ref[kh, d, :, :],
                               preferred_element_type=jnp.float32)
        acc += b_ref[...]                                         # f32 bias
        acc = jnp.where(acc >= 0.0, acc, 0.2 * acc)               # LeakyReLU
        o_ref[0, r, :, :] = acc.astype(o_ref.dtype)


def _conv4x4_s1_sigmoid_head_kernel(x_ref, w_ref, b_ref, o_ref, *, n_oh, n_ow):
    """Fused 4x4 / stride-1 / pad-1 conv (OC=1) + bias + sigmoid, ONE image.

    OC=1 is a per-pixel dot product: done on the VPU (multiply) + XLU (lane
    reduction over C) instead of a 1/256-wide MXU matvec.
    x_ref: (1, Hp, Wp, C) bf16;  w_ref: (4, 4, 1, C) f32;  b_ref: (1, 1) f32
    o_ref: (1, OH, OW, 1) f32
    """
    @pl.loop(0, n_oh)
    def _row(r):
        acc = jnp.zeros((n_ow, 1), jnp.float32)
        for kh in range(4):
            for kw in range(4):
                xs = x_ref[0, r + kh, pl.ds(kw, n_ow), :].astype(jnp.float32)
                acc += jnp.sum(xs * w_ref[kh, kw, :, :], axis=-1, keepdims=True)
        acc += b_ref[...]
        o_ref[0, r, :, :] = jax.nn.sigmoid(acc).astype(o_ref.dtype)


# ---------------------------------------------------------------------------
# Wrappers
# ---------------------------------------------------------------------------

def _lane_round(n):
    return max(128, -(-n // 128) * 128)


def _vmem_limit(*byte_counts):
    # Generous headroom over the per-step footprint, capped at v7x's 64 MiB
    # physical VMEM.  (At DCGAN-scale shapes the real footprint is << 32 MiB.)
    est = int(sum(byte_counts))
    return int(min(max(4 * est, 32 * 1024 * 1024), 64 * 1024 * 1024))


def conv2d_s2_leaky(x_nhwc, lp):
    """Conv2d(k4, s2, p1) + LeakyReLU(0.2).  NHWC in (any float) -> NHWC bf16."""
    N, H, W, C = x_nhwc.shape
    assert C == lp["IC"]
    Hp, Wp = H + 2, W + 2
    assert Hp % 2 == 0 and Wp % 2 == 0, "stride-2 layers need even H and W"
    OH, OW = Hp // 2 - 1, Wp // 2 - 1          # == H // 2, W // 2
    OC, C2 = lp["OC"], 2 * C

    xp = jnp.pad(x_nhwc.astype(jnp.bfloat16),
                 ((0, 0), (1, 1), (1, 1), (0, 0)))
    # Merge width pairs: (N, Hp, Wp, C) -> (N, Hp, Wp/2, 2C).  Pure reshape;
    # makes every stride-2 column window a contiguous lane-dim slice.
    xr = xp.reshape(N, Hp, Wp // 2, C2)

    x_hbm = Hp * (Wp // 2) * C2 * 2
    o_hbm = OH * OW * OC * 2
    w_hbm = 4 * 2 * C2 * OC * 2
    x_vmem = Hp * (Wp // 2) * _lane_round(C2) * 2
    o_vmem = OH * OW * _lane_round(OC) * 2
    w_vmem = 4 * 2 * C2 * _lane_round(OC) * 2

    cost = pl.CostEstimate(
        flops=2 * N * OH * OW * 16 * C * OC,
        transcendentals=0,
        bytes_accessed=N * (x_hbm + o_hbm) + w_hbm + OC * 4,
    )

    return pl.pallas_call(
        functools.partial(_conv4x4_s2_leaky_kernel, n_oh=OH, n_ow=OW, n_oc=OC),
        out_shape=jax.ShapeDtypeStruct((N, OH, OW, OC), jnp.bfloat16),
        grid_spec=pltpu.PrefetchScalarGridSpec(
            num_scalar_prefetch=0,
            grid=(N,),                               # one image per grid step
            in_specs=[
                pl.BlockSpec((1, Hp, Wp // 2, C2), lambda n: (n, 0, 0, 0)),
                # constant index map -> weights fetched once, VMEM-resident
                pl.BlockSpec((4, 2, C2, OC), lambda n: (0, 0, 0, 0)),
                pl.BlockSpec((1, OC), lambda n: (0, 0)),
            ],
            out_specs=pl.BlockSpec((1, OH, OW, OC), lambda n: (n, 0, 0, 0)),
        ),
        compiler_params=pltpu.CompilerParams(
            dimension_semantics=("parallel",),       # batch shards across TCs
            vmem_limit_bytes=_vmem_limit(2 * x_vmem, 2 * o_vmem, w_vmem)),
        cost_estimate=cost,
    )(xr, lp["w"], lp["b"])


def conv2d_s1_sigmoid_head(x_nhwc, lp):
    """Conv2d(k4, s1, p1, OC=1) + Sigmoid.  NHWC bf16 -> NHWC f32."""
    N, H, W, C = x_nhwc.shape
    assert C == lp["IC"] and lp["OC"] == 1
    Hp, Wp = H + 2, W + 2
    OH, OW = Hp - 3, Wp - 3

    xp = jnp.pad(x_nhwc.astype(jnp.bfloat16),
                 ((0, 0), (1, 1), (1, 1), (0, 0)))

    x_hbm = Hp * Wp * C * 2
    o_hbm = OH * OW * 4
    w_hbm = 16 * C * 4
    x_vmem = Hp * Wp * _lane_round(C) * 2
    o_vmem = OH * OW * 128 * 4
    w_vmem = 16 * _lane_round(C) * 4

    cost = pl.CostEstimate(
        flops=2 * N * OH * OW * 16 * C,
        transcendentals=N * OH * OW,
        bytes_accessed=N * (x_hbm + o_hbm) + w_hbm + 4,
    )

    return pl.pallas_call(
        functools.partial(_conv4x4_s1_sigmoid_head_kernel, n_oh=OH, n_ow=OW),
        out_shape=jax.ShapeDtypeStruct((N, OH, OW, 1), jnp.float32),
        grid_spec=pltpu.PrefetchScalarGridSpec(
            num_scalar_prefetch=0,
            grid=(N,),
            in_specs=[
                pl.BlockSpec((1, Hp, Wp, C), lambda n: (n, 0, 0, 0)),
                pl.BlockSpec((4, 4, 1, C), lambda n: (0, 0, 0, 0)),
                pl.BlockSpec((1, 1), lambda n: (0, 0)),
            ],
            out_specs=pl.BlockSpec((1, OH, OW, 1), lambda n: (n, 0, 0, 0)),
        ),
        compiler_params=pltpu.CompilerParams(
            dimension_semantics=("parallel",),
            vmem_limit_bytes=_vmem_limit(2 * x_vmem, 2 * o_vmem, w_vmem)),
        cost_estimate=cost,
    )(xp, lp["w"], lp["b"])


# ---------------------------------------------------------------------------
# Parameters (PyTorch-Conv2d-style init) and one-time layout prep
# ---------------------------------------------------------------------------

def init_params(key, input_channels=3):
    specs = [
        (64, input_channels, 4, 4),
        (128, 64, 4, 4),
        (256, 128, 4, 4),
        (1, 256, 4, 4),
    ]
    params = []
    for i, s in enumerate(specs):
        kw_, kb = jax.random.split(jax.random.fold_in(key, i))
        fan_in = s[1] * s[2] * s[3]
        bound = float(1.0 / (fan_in ** 0.5))
        w = jax.random.uniform(kw_, s, jnp.float32, -bound, bound)
        b = jax.random.uniform(kb, (s[0],), jnp.float32, -bound, bound)
        params.append((w, b))
    return params


def prepare_params(params):
    """Done-once weight layout prep (hoisted out of the forward pass)."""
    prepped = []
    for idx, (w, b) in enumerate(params):
        OC, IC, KH, KW = w.shape
        assert KH == 4 and KW == 4
        if idx < 3:
            # (OC, IC, KH, KW) -> (KH, KW, IC, OC) -> (KH, d=2, l=2, IC, OC)
            # -> (KH, 2, 2*IC, OC) bf16 where kw = 2*d + l and c2 = l*IC + c,
            # matching the kernel's width-pair-merged input layout.
            wt = jnp.transpose(w, (2, 3, 1, 0))
            wk = wt.reshape(KH, 2, 2, IC, OC).reshape(KH, 2, 2 * IC, OC)
            prepped.append({
                "stride": 2, "IC": IC, "OC": OC,
                "w": wk.astype(jnp.bfloat16),
                "b": b.reshape(1, OC).astype(jnp.float32),
            })
        else:
            assert OC == 1
            prepped.append({
                "stride": 1, "IC": IC, "OC": OC,
                "w": jnp.transpose(w, (2, 3, 0, 1)).astype(jnp.float32),
                "b": b.reshape(1, 1).astype(jnp.float32),
            })
    return prepped


def discriminator_forward(prepared_params, x_nchw):
    x = jnp.transpose(x_nchw, (0, 2, 3, 1)).astype(jnp.bfloat16)  # NCHW->NHWC
    l1, l2, l3, l4 = prepared_params
    x = conv2d_s2_leaky(x, l1)
    x = conv2d_s2_leaky(x, l2)
    x = conv2d_s2_leaky(x, l3)
    y = conv2d_s1_sigmoid_head(x, l4)          # (N, OH, OW, 1) f32
    return jnp.transpose(y, (0, 3, 1, 2))      # -> NCHW (PyTorch layout)


def _reference_forward(params, x_nchw):
    """Pure-JAX f32 reference (PyTorch Conv2d semantics) for validation."""
    x = x_nchw
    for i, (w, b) in enumerate(params):
        stride = 1 if i == 3 else 2
        x = lax.conv_general_dilated(
            x, w, (stride, stride), [(1, 1), (1, 1)],
            dimension_numbers=("NCHW", "OIHW", "NCHW"))
        x = x + b.reshape(1, -1, 1, 1)
        x = jnp.where(x >= 0, x, 0.2 * x) if i < 3 else jax.nn.sigmoid(x)
    return x


if __name__ == "__main__":
    key = jax.random.PRNGKey(0)
    kx, kp = jax.random.split(key)
    # Small smoke-test shapes (batch=2, 3x16x16 -> output (2,1,1,1)).
    # NOTE: at this size the run is launch-overhead bound; the kernels are
    # structured for realistic DCGAN batches/resolutions (grid over batch,
    # whole padded image per step, weights VMEM-resident).
    x = jax.random.normal(kx, (2, 3, 16, 16), jnp.float32)
    params = init_params(kp, input_channels=3)
    prepared = prepare_params(params)

    fwd = jax.jit(lambda inp: discriminator_forward(prepared, inp))
    out = jax.block_until_ready(fwd(x))

    assert out.shape == (2, 1, 1, 1), out.shape
    assert bool(jnp.all((out >= 0.0) & (out <= 1.0)))

    # Validate against a pure-JAX f32 conv reference (bf16-MXU tolerance).
    ref = _reference_forward(params, x)
    assert bool(jnp.allclose(out, ref, atol=2e-2)), (out, ref)

    print("KERNEL_OK")
</pallas_src>

<mosaic_0001>
module attributes {stable_mosaic.version = 11 : i64} {
  func.func @_conv4x4_s2_leaky_kernel(%arg0: i32, %arg1: memref<1x18x9x6xbf16, #tpu.memory_space<vmem>>, %arg2: memref<4x2x6x64xbf16, #tpu.memory_space<vmem>>, %arg3: memref<1x64xf32, #tpu.memory_space<vmem>>, %arg4: memref<1x8x8x64xbf16, #tpu.memory_space<vmem>>) attributes {dimension_semantics = [#tpu.dimension_semantics<parallel>], iteration_bounds = array<i64: 2>, scalar_prefetch = 0 : i64, scratch_operands = 0 : i64, tpu.core_type = #tpu.core_type<tc>, window_params = [{transform_indices = @transform_0, window_bounds = array<i64: 1, 18, 9, 6>}, {pipeline_mode = #tpu.pipeline_mode<synchronous>, transform_indices = @transform_1, window_bounds = array<i64: 4, 2, 6, 64>}, {pipeline_mode = #tpu.pipeline_mode<synchronous>, transform_indices = @transform_2, window_bounds = array<i64: 1, 64>}, {transform_indices = @transform_3, window_bounds = array<i64: 1, 8, 8, 64>}]} {
    %c0_i32 = arith.constant 0 : i32
    %c8_i32 = arith.constant 8 : i32
    %0 = arith.addi %c0_i32, %c8_i32 : i32
    %c1_i32 = arith.constant 1 : i32
    scf.for %arg5 = %c0_i32 to %0 step %c1_i32  : i32 {
      %c1_i32_1 = arith.constant 1 : i32
      %1 = arith.muli %arg5, %c1_i32_1 : i32
      %c0_i32_2 = arith.constant 0 : i32
      %2 = arith.addi %c0_i32_2, %1 : i32
      %cst = arith.constant 0.000000e+00 : f32
      %3 = vector.broadcast %cst : f32 to vector<8x64xf32>
      %c2_i32 = arith.constant 2 : i32
      %4 = arith.muli %c2_i32, %2 : i32
      %c0_i32_3 = arith.constant 0 : i32
      %5 = arith.addi %4, %c0_i32_3 : i32
      %c0 = arith.constant 0 : index
      %6 = arith.index_cast %5 : i32 to index
      %c0_4 = arith.constant 0 : index
      %c0_5 = arith.constant 0 : index
      %7 = vector.load %arg1[%c0, %6, %c0_4, %c0_5] : memref<1x18x9x6xbf16, #tpu.memory_space<vmem>>, vector<1x1x8x6xbf16>
      %8 = vector.shape_cast %7 : vector<1x1x8x6xbf16> to vector<8x6xbf16>
      %c0_6 = arith.constant 0 : index
      %c0_7 = arith.constant 0 : index
      %c0_8 = arith.constant 0 : index
      %c0_9 = arith.constant 0 : index
      %9 = vector.load %arg2[%c0_6, %c0_7, %c0_8, %c0_9] : memref<4x2x6x64xbf16, #tpu.memory_space<vmem>>, vector<1x1x6x64xbf16>
      %10 = vector.shape_cast %9 : vector<1x1x6x64xbf16> to vector<6x64xbf16>
      %cst_10 = arith.constant dense<0.000000e+00> : vector<8x64xf32>
      %11 = tpu.matmul %8, %10, %cst_10 {dimension_numbers = #tpu.dot_dimension_numbers<[1], [0], [0], [1], [0, 0, 1, 1], [], []>} : vector<8x6xbf16>, vector<6x64xbf16>, vector<8x64xf32> -> vector<8x64xf32>
      %12 = arith.addf %3, %11 : vector<8x64xf32>
      %c0_11 = arith.constant 0 : index
      %13 = arith.index_cast %5 : i32 to index
      %c1 = arith.constant 1 : index
      %c0_12 = arith.constant 0 : index
      %14 = vector.load %arg1[%c0_11, %13, %c1, %c0_12] : memref<1x18x9x6xbf16, #tpu.memory_space<vmem>>, vector<1x1x8x6xbf16>
      %15 = vector.shape_cast %14 : vector<1x1x8x6xbf16> to vector<8x6xbf16>
      %c0_13 = arith.constant 0 : index
      %c1_14 = arith.constant 1 : index
      %c0_15 = arith.constant 0 : index
      %c0_16 = arith.constant 0 : index
      %16 = vector.load %arg2[%c0_13, %c1_14, %c0_15, %c0_16] : memref<4x2x6x64xbf16, #tpu.memory_space<vmem>>, vector<1x1x6x64xbf16>
      %17 = vector.shape_cast %16 : vector<1x1x6x64xbf16> to vector<6x64xbf16>
      %cst_17 = arith.constant dense<0.000000e+00> : vector<8x64xf32>
      %18 = tpu.matmul %15, %17, %cst_17 {dimension_numbers = #tpu.dot_dimension_numbers<[1], [0], [0], [1], [0, 0, 1, 1], [], []>} : vector<8x6xbf16>, vector<6x64xbf16>, vector<8x64xf32> -> vector<8x64xf32>
      %19 = arith.addf %12, %18 : vector<8x64xf32>
      %c2_i32_18 = arith.constant 2 : i32
      %20 = arith.muli %c2_i32_18, %2 : i32
      %c1_i32_19 = arith.constant 1 : i32
      %21 = arith.addi %20, %c1_i32_19 : i32
      %c0_20 = arith.constant 0 : index
      %22 = arith.index_cast %21 : i32 to index
      %c0_21 = arith.constant 0 : index
      %c0_22 = arith.constant 0 : index
      %23 = vector.load %arg1[%c0_20, %22, %c0_21, %c0_22] : memref<1x18x9x6xbf16, #tpu.memory_space<vmem>>, vector<1x1x8x6xbf16>
      %24 = vector.shape_cast %23 : vector<1x1x8x6xbf16> to vector<8x6xbf16>
      %c1_23 = arith.constant 1 : index
      %c0_24 = arith.constant 0 : index
      %c0_25 = arith.constant 0 : index
      %c0_26 = arith.constant 0 : index
      %25 = vector.load %arg2[%c1_23, %c0_24, %c0_25, %c0_26] : memref<4x2x6x64xbf16, #tpu.memory_space<vmem>>, vector<1x1x6x64xbf16>
      %26 = vector.shape_cast %25 : vector<1x1x6x64xbf16> to vector<6x64xbf16>
      %cst_27 = arith.constant dense<0.000000e+00> : vector<8x64xf32>
      %27 = tpu.matmul %24, %26, %cst_27 {dimension_numbers = #tpu.dot_dimension_numbers<[1], [0], [0], [1], [0, 0, 1, 1], [], []>} : vector<8x6xbf16>, vector<6x64xbf16>, vector<8x64xf32> -> vector<8x64xf32>
      %28 = arith.addf %19, %27 : vector<8x64xf32>
      %c0_28 = arith.constant 0 : index
      %29 = arith.index_cast %21 : i32 to index
      %c1_29 = arith.constant 1 : index
      %c0_30 = arith.constant 0 : index
      %30 = vector.load %arg1[%c0_28, %29, %c1_29, %c0_30] : memref<1x18x9x6xbf16, #tpu.memory_space<vmem>>, vector<1x1x8x6xbf16>
      %31 = vector.shape_cast %30 : vector<1x1x8x6xbf16> to vector<8x6xbf16>
      %c1_31 = arith.constant 1 : index
      %c1_32 = arith.constant 1 : index
      %c0_33 = arith.constant 0 : index
      %c0_34 = arith.constant 0 : index
      %32 = vector.load %arg2[%c1_31, %c1_32, %c0_33, %c0_34] : memref<4x2x6x64xbf16, #tpu.memory_space<vmem>>, vector<1x1x6x64xbf16>
      %33 = vector.shape_cast %32 : vector<1x1x6x64xbf16> to vector<6x64xbf16>
      %cst_35 = arith.constant dense<0.000000e+00> : vector<8x64xf32>
      %34 = tpu.matmul %31, %33, %cst_35 {dimension_numbers = #tpu.dot_dimension_numbers<[1], [0], [0], [1], [0, 0, 1, 1], [], []>} : vector<8x6xbf16>, vector<6x64xbf16>, vector<8x64xf32> -> vector<8x64xf32>
      %35 = arith.addf %28, %34 : vector<8x64xf32>
      %c2_i32_36 = arith.constant 2 : i32
      %36 = arith.muli %c2_i32_36, %2 : i32
      %c2_i32_37 = arith.constant 2 : i32
      %37 = arith.addi %36, %c2_i32_37 : i32
      %c0_38 = arith.constant 0 : index
      %38 = arith.index_cast %37 : i32 to index
      %c0_39 = arith.constant 0 : index
      %c0_40 = arith.constant 0 : index
      %39 = vector.load %arg1[%c0_38, %38, %c0_39, %c0_40] : memref<1x18x9x6xbf16, #tpu.memory_space<vmem>>, vector<1x1x8x6xbf16>
      %40 = vector.shape_cast %39 : vector<1x1x8x6xbf16> to vector<8x6xbf16>
      %c2 = arith.constant 2 : index
      %c0_41 = arith.constant 0 : index
      %c0_42 = arith.constant 0 : index
      %c0_43 = arith.constant 0 : index
      %41 = vector.load %arg2[%c2, %c0_41, %c0_42, %c0_43] : memref<4x2x6x64xbf16, #tpu.memory_space<vmem>>, vector<1x1x6x64xbf16>
      %42 = vector.shape_cast %41 : vector<1x1x6x64xbf16> to vector<6x64xbf16>
      %cst_44 = arith.constant dense<0.000000e+00> : vector<8x64xf32>
      %43 = tpu.matmul %40, %42, %cst_44 {dimension_numbers = #tpu.dot_dimension_numbers<[1], [0], [0], [1], [0, 0, 1, 1], [], []>} : vector<8x6xbf16>, vector<6x64xbf16>, vector<8x64xf32> -> vector<8x64xf32>
      %44 = arith.addf %35, %43 : vector<8x64xf32>
      %c0_45 = arith.constant 0 : index
      %45 = arith.index_cast %37 : i32 to index
      %c1_46 = arith.constant 1 : index
      %c0_47 = arith.constant 0 : index
      %46 = vector.load %arg1[%c0_45, %45, %c1_46, %c0_47] : memref<1x18x9x6xbf16, #tpu.memory_space<vmem>>, vector<1x1x8x6xbf16>
      %47 = vector.shape_cast %46 : vector<1x1x8x6xbf16> to vector<8x6xbf16>
      %c2_48 = arith.constant 2 : index
      %c1_49 = arith.constant 1 : index
      %c0_50 = arith.constant 0 : index
      %c0_51 = arith.constant 0 : index
      %48 = vector.load %arg2[%c2_48, %c1_49, %c0_50, %c0_51] : memref<4x2x6x64xbf16, #tpu.memory_space<vmem>>, vector<1x1x6x64xbf16>
      %49 = vector.shape_cast %48 : vector<1x1x6x64xbf16> to vector<6x64xbf16>
      %cst_52 = arith.constant dense<0.000000e+00> : vector<8x64xf32>
      %50 = tpu.matmul %47, %49, %cst_52 {dimension_numbers = #tpu.dot_dimension_numbers<[1], [0], [0], [1], [0, 0, 1, 1], [], []>} : vector<8x6xbf16>, vector<6x64xbf16>, vector<8x64xf32> -> vector<8x64xf32>
      %51 = arith.addf %44, %50 : vector<8x64xf32>
      %c2_i32_53 = arith.constant 2 : i32
      %52 = arith.muli %c2_i32_53, %2 : i32
      %c3_i32 = arith.constant 3 : i32
      %53 = arith.addi %52, %c3_i32 : i32
      %c0_54 = arith.constant 0 : index
      %54 = arith.index_cast %53 : i32 to index
      %c0_55 = arith.constant 0 : index
      %c0_56 = arith.constant 0 : index
      %55 = vector.load %arg1[%c0_54, %54, %c0_55, %c0_56] : memref<1x18x9x6xbf16, #tpu.memory_space<vmem>>, vector<1x1x8x6xbf16>
      %56 = vector.shape_cast %55 : vector<1x1x8x6xbf16> to vector<8x6xbf16>
      %c3 = arith.constant 3 : index
      %c0_57 = arith.constant 0 : index
      %c0_58 = arith.constant 0 : index
      %c0_59 = arith.constant 0 : index
      %57 = vector.load %arg2[%c3, %c0_57, %c0_58, %c0_59] : memref<4x2x6x64xbf16, #tpu.memory_space<vmem>>, vector<1x1x6x64xbf16>
      %58 = vector.shape_cast %57 : vector<1x1x6x64xbf16> to vector<6x64xbf16>
      %cst_60 = arith.constant dense<0.000000e+00> : vector<8x64xf32>
      %59 = tpu.matmul %56, %58, %cst_60 {dimension_numbers = #tpu.dot_dimension_numbers<[1], [0], [0], [1], [0, 0, 1, 1], [], []>} : vector<8x6xbf16>, vector<6x64xbf16>, vector<8x64xf32> -> vector<8x64xf32>
      %60 = arith.addf %51, %59 : vector<8x64xf32>
      %c0_61 = arith.constant 0 : index
      %61 = arith.index_cast %53 : i32 to index
      %c1_62 = arith.constant 1 : index
      %c0_63 = arith.constant 0 : index
      %62 = vector.load %arg1[%c0_61, %61, %c1_62, %c0_63] : memref<1x18x9x6xbf16, #tpu.memory_space<vmem>>, vector<1x1x8x6xbf16>
      %63 = vector.shape_cast %62 : vector<1x1x8x6xbf16> to vector<8x6xbf16>
      %c3_64 = arith.constant 3 : index
      %c1_65 = arith.constant 1 : index
      %c0_66 = arith.constant 0 : index
      %c0_67 = arith.constant 0 : index
      %64 = vector.load %arg2[%c3_64, %c1_65, %c0_66, %c0_67] : memref<4x2x6x64xbf16, #tpu.memory_space<vmem>>, vector<1x1x6x64xbf16>
      %65 = vector.shape_cast %64 : vector<1x1x6x64xbf16> to vector<6x64xbf16>
      %cst_68 = arith.constant dense<0.000000e+00> : vector<8x64xf32>
      %66 = tpu.matmul %63, %65, %cst_68 {dimension_numbers = #tpu.dot_dimension_numbers<[1], [0], [0], [1], [0, 0, 1, 1], [], []>} : vector<8x6xbf16>, vector<6x64xbf16>, vector<8x64xf32> -> vector<8x64xf32>
      %67 = arith.addf %60, %66 : vector<8x64xf32>
      %c0_69 = arith.constant 0 : index
      %c0_70 = arith.constant 0 : index
      %68 = vector.load %arg3[%c0_69, %c0_70] : memref<1x64xf32, #tpu.memory_space<vmem>>, vector<1x64xf32>
      %69 = vector.broadcast %68 : vector<1x64xf32> to vector<8x64xf32>
      %70 = arith.addf %67, %69 : vector<8x64xf32>
      %cst_71 = arith.constant 0.000000e+00 : f32
      %71 = vector.broadcast %cst_71 : f32 to vector<8x64xf32>
      %72 = arith.cmpf oge, %70, %71 : vector<8x64xf32>
      %cst_72 = arith.constant 2.000000e-01 : f32
      %73 = vector.broadcast %cst_72 : f32 to vector<8x64xf32>
      %74 = arith.mulf %73, %70 : vector<8x64xf32>
      %75 = arith.select %72, %70, %74 : vector<8x64xi1>, vector<8x64xf32>
      %76 = arith.truncf %75 : vector<8x64xf32> to vector<8x64xbf16>
      %c0_73 = arith.constant 0 : index
      %77 = arith.index_cast %2 : i32 to index
      %c0_74 = arith.constant 0 : index
      %c0_75 = arith.constant 0 : index
      %78 = vector.load %arg4[%c0_73, %77, %c0_74, %c0_75] : memref<1x8x8x64xbf16, #tpu.memory_space<vmem>>, vector<1x1x8x64xbf16>
      %79 = vector.shape_cast %78 : vector<1x1x8x64xbf16> to vector<8x64xbf16>
      %80 = vector.shape_cast %76 : vector<8x64xbf16> to vector<1x1x8x64xbf16>
      tpu.vector_store %arg4[%c0_73, %77, %c0_74, %c0_75], %80 {strides = array<i32>} : memref<1x8x8x64xbf16, #tpu.memory_space<vmem>>, vector<1x1x8x64xbf16>,
    }
    %c8_i32_0 = arith.constant 8 : i32
    return
  }
  func.func @transform_0(%arg0: i32) -> (i32, i32, i32, i32) {
    %c0_i32 = arith.constant 0 : i32
    %c0_i32_0 = arith.constant 0 : i32
    %c0_i32_1 = arith.constant 0 : i32
    %c0_i32_2 = arith.constant 0 : i32
    return %arg0, %c0_i32, %c0_i32_0, %c0_i32_1 : i32, i32, i32, i32
  }
  func.func @transform_1(%arg0: i32) -> (i32, i32, i32, i32) {
    %c0_i32 = arith.constant 0 : i32
    %c0_i32_0 = arith.constant 0 : i32
    %c0_i32_1 = arith.constant 0 : i32
    %c0_i32_2 = arith.constant 0 : i32
    %c0_i32_3 = arith.constant 0 : i32
    return %c0_i32, %c0_i32_0, %c0_i32_1, %c0_i32_2 : i32, i32, i32, i32
  }
  func.func @transform_2(%arg0: i32) -> (i32, i32) {
    %c0_i32 = arith.constant 0 : i32
    %c0_i32_0 = arith.constant 0 : i32
    %c0_i32_1 = arith.constant 0 : i32
    return %c0_i32, %c0_i32_0 : i32, i32
  }
  func.func @transform_3(%arg0: i32) -> (i32, i32, i32, i32) {
    %c0_i32 = arith.constant 0 : i32
    %c0_i32_0 = arith.constant 0 : i32
    %c0_i32_1 = arith.constant 0 : i32
    %c0_i32_2 = arith.constant 0 : i32
    return %arg0, %c0_i32, %c0_i32_0, %c0_i32_1 : i32, i32, i32, i32
  }
}

module attributes {stable_mosaic.version = 11 : i64} {
  func.func @_conv4x4_s2_leaky_kernel(%arg0: i32, %arg1: memref<1x10x5x128xbf16, #tpu.memory_space<vmem>>, %arg2: memref<4x2x128x128xbf16, #tpu.memory_space<vmem>>, %arg3: memref<1x128xf32, #tpu.memory_space<vmem>>, %arg4: memref<1x4x4x128xbf16, #tpu.memory_space<vmem>>) attributes {dimension_semantics = [#tpu.dimension_semantics<parallel>], iteration_bounds = array<i64: 2>, scalar_prefetch = 0 : i64, scratch_operands = 0 : i64, tpu.core_type = #tpu.core_type<tc>, window_params = [{transform_indices = @transform_0, window_bounds = array<i64: 1, 10, 5, 128>}, {pipeline_mode = #tpu.pipeline_mode<synchronous>, transform_indices = @transform_1, window_bounds = array<i64: 4, 2, 128, 128>}, {pipeline_mode = #tpu.pipeline_mode<synchronous>, transform_indices = @transform_2, window_bounds = array<i64: 1, 128>}, {transform_indices = @transform_3, window_bounds = array<i64: 1, 4, 4, 128>}]} {
    %c0_i32 = arith.constant 0 : i32
    %c4_i32 = arith.constant 4 : i32
    %0 = arith.addi %c0_i32, %c4_i32 : i32
    %c1_i32 = arith.constant 1 : i32
    scf.for %arg5 = %c0_i32 to %0 step %c1_i32  : i32 {
      %c1_i32_1 = arith.constant 1 : i32
      %1 = arith.muli %arg5, %c1_i32_1 : i32
      %c0_i32_2 = arith.constant 0 : i32
      %2 = arith.addi %c0_i32_2, %1 : i32
      %cst = arith.constant 0.000000e+00 : f32
      %3 = vector.broadcast %cst : f32 to vector<4x128xf32>
      %c2_i32 = arith.constant 2 : i32
      %4 = arith.muli %c2_i32, %2 : i32
      %c0_i32_3 = arith.constant 0 : i32
      %5 = arith.addi %4, %c0_i32_3 : i32
      %c0 = arith.constant 0 : index
      %6 = arith.index_cast %5 : i32 to index
      %c0_4 = arith.constant 0 : index
      %c0_5 = arith.constant 0 : index
      %7 = vector.load %arg1[%c0, %6, %c0_4, %c0_5] : memref<1x10x5x128xbf16, #tpu.memory_space<vmem>>, vector<1x1x4x128xbf16>
      %8 = vector.shape_cast %7 : vector<1x1x4x128xbf16> to vector<4x128xbf16>
      %c0_6 = arith.constant 0 : index
      %c0_7 = arith.constant 0 : index
      %c0_8 = arith.constant 0 : index
      %c0_9 = arith.constant 0 : index
      %9 = vector.load %arg2[%c0_6, %c0_7, %c0_8, %c0_9] : memref<4x2x128x128xbf16, #tpu.memory_space<vmem>>, vector<1x1x128x128xbf16>
      %10 = vector.shape_cast %9 : vector<1x1x128x128xbf16> to vector<128x128xbf16>
      %cst_10 = arith.constant dense<0.000000e+00> : vector<4x128xf32>
      %11 = tpu.matmul %8, %10, %cst_10 {dimension_numbers = #tpu.dot_dimension_numbers<[1], [0], [0], [1], [0, 0, 1, 1], [], []>} : vector<4x128xbf16>, vector<128x128xbf16>, vector<4x128xf32> -> vector<4x128xf32>
      %12 = arith.addf %3, %11 : vector<4x128xf32>
      %c0_11 = arith.constant 0 : index
      %13 = arith.index_cast %5 : i32 to index
      %c1 = arith.constant 1 : index
      %c0_12 = arith.constant 0 : index
      %14 = vector.load %arg1[%c0_11, %13, %c1, %c0_12] : memref<1x10x5x128xbf16, #tpu.memory_space<vmem>>, vector<1x1x4x128xbf16>
      %15 = vector.shape_cast %14 : vector<1x1x4x128xbf16> to vector<4x128xbf16>
      %c0_13 = arith.constant 0 : index
      %c1_14 = arith.constant 1 : index
      %c0_15 = arith.constant 0 : index
      %c0_16 = arith.constant 0 : index
      %16 = vector.load %arg2[%c0_13, %c1_14, %c0_15, %c0_16] : memref<4x2x128x128xbf16, #tpu.memory_space<vmem>>, vector<1x1x128x128xbf16>
      %17 = vector.shape_cast %16 : vector<1x1x128x128xbf16> to vector<128x128xbf16>
      %cst_17 = arith.constant dense<0.000000e+00> : vector<4x128xf32>
      %18 = tpu.matmul %15, %17, %cst_17 {dimension_numbers = #tpu.dot_dimension_numbers<[1], [0], [0], [1], [0, 0, 1, 1], [], []>} : vector<4x128xbf16>, vector<128x128xbf16>, vector<4x128xf32> -> vector<4x128xf32>
      %19 = arith.addf %12, %18 : vector<4x128xf32>
      %c2_i32_18 = arith.constant 2 : i32
      %20 = arith.muli %c2_i32_18, %2 : i32
      %c1_i32_19 = arith.constant 1 : i32
      %21 = arith.addi %20, %c1_i32_19 : i32
      %c0_20 = arith.constant 0 : index
      %22 = arith.index_cast %21 : i32 to index
      %c0_21 = arith.constant 0 : index
      %c0_22 = arith.constant 0 : index
      %23 = vector.load %arg1[%c0_20, %22, %c0_21, %c0_22] : memref<1x10x5x128xbf16, #tpu.memory_space<vmem>>, vector<1x1x4x128xbf16>
      %24 = vector.shape_cast %23 : vector<1x1x4x128xbf16> to vector<4x128xbf16>
      %c1_23 = arith.constant 1 : index
      %c0_24 = arith.constant 0 : index
      %c0_25 = arith.constant 0 : index
      %c0_26 = arith.constant 0 : index
      %25 = vector.load %arg2[%c1_23, %c0_24, %c0_25, %c0_26] : memref<4x2x128x128xbf16, #tpu.memory_space<vmem>>, vector<1x1x128x128xbf16>
      %26 = vector.shape_cast %25 : vector<1x1x128x128xbf16> to vector<128x128xbf16>
      %cst_27 = arith.constant dense<0.000000e+00> : vector<4x128xf32>
      %27 = tpu.matmul %24, %26, %cst_27 {dimension_numbers = #tpu.dot_dimension_numbers<[1], [0], [0], [1], [0, 0, 1, 1], [], []>} : vector<4x128xbf16>, vector<128x128xbf16>, vector<4x128xf32> -> vector<4x128xf32>
      %28 = arith.addf %19, %27 : vector<4x128xf32>
      %c0_28 = arith.constant 0 : index
      %29 = arith.index_cast %21 : i32 to index
      %c1_29 = arith.constant 1 : index
      %c0_30 = arith.constant 0 : index
      %30 = vector.load %arg1[%c0_28, %29, %c1_29, %c0_30] : memref<1x10x5x128xbf16, #tpu.memory_space<vmem>>, vector<1x1x4x128xbf16>
      %31 = vector.shape_cast %30 : vector<1x1x4x128xbf16> to vector<4x128xbf16>
      %c1_31 = arith.constant 1 : index
      %c1_32 = arith.constant 1 : index
      %c0_33 = arith.constant 0 : index
      %c0_34 = arith.constant 0 : index
      %32 = vector.load %arg2[%c1_31, %c1_32, %c0_33, %c0_34] : memref<4x2x128x128xbf16, #tpu.memory_space<vmem>>, vector<1x1x128x128xbf16>
      %33 = vector.shape_cast %32 : vector<1x1x128x128xbf16> to vector<128x128xbf16>
      %cst_35 = arith.constant dense<0.000000e+00> : vector<4x128xf32>
      %34 = tpu.matmul %31, %33, %cst_35 {dimension_numbers = #tpu.dot_dimension_numbers<[1], [0], [0], [1], [0, 0, 1, 1], [], []>} : vector<4x128xbf16>, vector<128x128xbf16>, vector<4x128xf32> -> vector<4x128xf32>
      %35 = arith.addf %28, %34 : vector<4x128xf32>
      %c2_i32_36 = arith.constant 2 : i32
      %36 = arith.muli %c2_i32_36, %2 : i32
      %c2_i32_37 = arith.constant 2 : i32
      %37 = arith.addi %36, %c2_i32_37 : i32
      %c0_38 = arith.constant 0 : index
      %38 = arith.index_cast %37 : i32 to index
      %c0_39 = arith.constant 0 : index
      %c0_40 = arith.constant 0 : index
      %39 = vector.load %arg1[%c0_38, %38, %c0_39, %c0_40] : memref<1x10x5x128xbf16, #tpu.memory_space<vmem>>, vector<1x1x4x128xbf16>
      %40 = vector.shape_cast %39 : vector<1x1x4x128xbf16> to vector<4x128xbf16>
      %c2 = arith.constant 2 : index
      %c0_41 = arith.constant 0 : index
      %c0_42 = arith.constant 0 : index
      %c0_43 = arith.constant 0 : index
      %41 = vector.load %arg2[%c2, %c0_41, %c0_42, %c0_43] : memref<4x2x128x128xbf16, #tpu.memory_space<vmem>>, vector<1x1x128x128xbf16>
      %42 = vector.shape_cast %41 : vector<1x1x128x128xbf16> to vector<128x128xbf16>
      %cst_44 = arith.constant dense<0.000000e+00> : vector<4x128xf32>
      %43 = tpu.matmul %40, %42, %cst_44 {dimension_numbers = #tpu.dot_dimension_numbers<[1], [0], [0], [1], [0, 0, 1, 1], [], []>} : vector<4x128xbf16>, vector<128x128xbf16>, vector<4x128xf32> -> vector<4x128xf32>
      %44 = arith.addf %35, %43 : vector<4x128xf32>
      %c0_45 = arith.constant 0 : index
      %45 = arith.index_cast %37 : i32 to index
      %c1_46 = arith.constant 1 : index
      %c0_47 = arith.constant 0 : index
      %46 = vector.load %arg1[%c0_45, %45, %c1_46, %c0_47] : memref<1x10x5x128xbf16, #tpu.memory_space<vmem>>, vector<1x1x4x128xbf16>
      %47 = vector.shape_cast %46 : vector<1x1x4x128xbf16> to vector<4x128xbf16>
      %c2_48 = arith.constant 2 : index
      %c1_49 = arith.constant 1 : index
      %c0_50 = arith.constant 0 : index
      %c0_51 = arith.constant 0 : index
      %48 = vector.load %arg2[%c2_48, %c1_49, %c0_50, %c0_51] : memref<4x2x128x128xbf16, #tpu.memory_space<vmem>>, vector<1x1x128x128xbf16>
      %49 = vector.shape_cast %48 : vector<1x1x128x128xbf16> to vector<128x128xbf16>
      %cst_52 = arith.constant dense<0.000000e+00> : vector<4x128xf32>
      %50 = tpu.matmul %47, %49, %cst_52 {dimension_numbers = #tpu.dot_dimension_numbers<[1], [0], [0], [1], [0, 0, 1, 1], [], []>} : vector<4x128xbf16>, vector<128x128xbf16>, vector<4x128xf32> -> vector<4x128xf32>
      %51 = arith.addf %44, %50 : vector<4x128xf32>
      %c2_i32_53 = arith.constant 2 : i32
      %52 = arith.muli %c2_i32_53, %2 : i32
      %c3_i32 = arith.constant 3 : i32
      %53 = arith.addi %52, %c3_i32 : i32
      %c0_54 = arith.constant 0 : index
      %54 = arith.index_cast %53 : i32 to index
      %c0_55 = arith.constant 0 : index
      %c0_56 = arith.constant 0 : index
      %55 = vector.load %arg1[%c0_54, %54, %c0_55, %c0_56] : memref<1x10x5x128xbf16, #tpu.memory_space<vmem>>, vector<1x1x4x128xbf16>
      %56 = vector.shape_cast %55 : vector<1x1x4x128xbf16> to vector<4x128xbf16>
      %c3 = arith.constant 3 : index
      %c0_57 = arith.constant 0 : index
      %c0_58 = arith.constant 0 : index
      %c0_59 = arith.constant 0 : index
      %57 = vector.load %arg2[%c3, %c0_57, %c0_58, %c0_59] : memref<4x2x128x128xbf16, #tpu.memory_space<vmem>>, vector<1x1x128x128xbf16>
      %58 = vector.shape_cast %57 : vector<1x1x128x128xbf16> to vector<128x128xbf16>
      %cst_60 = arith.constant dense<0.000000e+00> : vector<4x128xf32>
      %59 = tpu.matmul %56, %58, %cst_60 {dimension_numbers = #tpu.dot_dimension_numbers<[1], [0], [0], [1], [0, 0, 1, 1], [], []>} : vector<4x128xbf16>, vector<128x128xbf16>, vector<4x128xf32> -> vector<4x128xf32>
      %60 = arith.addf %51, %59 : vector<4x128xf32>
      %c0_61 = arith.constant 0 : index
      %61 = arith.index_cast %53 : i32 to index
      %c1_62 = arith.constant 1 : index
      %c0_63 = arith.constant 0 : index
      %62 = vector.load %arg1[%c0_61, %61, %c1_62, %c0_63] : memref<1x10x5x128xbf16, #tpu.memory_space<vmem>>, vector<1x1x4x128xbf16>
      %63 = vector.shape_cast %62 : vector<1x1x4x128xbf16> to vector<4x128xbf16>
      %c3_64 = arith.constant 3 : index
      %c1_65 = arith.constant 1 : index
      %c0_66 = arith.constant 0 : index
      %c0_67 = arith.constant 0 : index
      %64 = vector.load %arg2[%c3_64, %c1_65, %c0_66, %c0_67] : memref<4x2x128x128xbf16, #tpu.memory_space<vmem>>, vector<1x1x128x128xbf16>
      %65 = vector.shape_cast %64 : vector<1x1x128x128xbf16> to vector<128x128xbf16>
      %cst_68 = arith.constant dense<0.000000e+00> : vector<4x128xf32>
      %66 = tpu.matmul %63, %65, %cst_68 {dimension_numbers = #tpu.dot_dimension_numbers<[1], [0], [0], [1], [0, 0, 1, 1], [], []>} : vector<4x128xbf16>, vector<128x128xbf16>, vector<4x128xf32> -> vector<4x128xf32>
      %67 = arith.addf %60, %66 : vector<4x128xf32>
      %c0_69 = arith.constant 0 : index
      %c0_70 = arith.constant 0 : index
      %68 = vector.load %arg3[%c0_69, %c0_70] : memref<1x128xf32, #tpu.memory_space<vmem>>, vector<1x128xf32>
      %69 = vector.broadcast %68 : vector<1x128xf32> to vector<4x128xf32>
      %70 = arith.addf %67, %69 : vector<4x128xf32>
      %cst_71 = arith.constant 0.000000e+00 : f32
      %71 = vector.broadcast %cst_71 : f32 to vector<4x128xf32>
      %72 = arith.cmpf oge, %70, %71 : vector<4x128xf32>
      %cst_72 = arith.constant 2.000000e-01 : f32
      %73 = vector.broadcast %cst_72 : f32 to vector<4x128xf32>
      %74 = arith.mulf %73, %70 : vector<4x128xf32>
      %75 = arith.select %72, %70, %74 : vector<4x128xi1>, vector<4x128xf32>
      %76 = arith.truncf %75 : vector<4x128xf32> to vector<4x128xbf16>
      %c0_73 = arith.constant 0 : index
      %77 = arith.index_cast %2 : i32 to index
      %c0_74 = arith.constant 0 : index
      %c0_75 = arith.constant 0 : index
      %78 = vector.load %arg4[%c0_73, %77, %c0_74, %c0_75] : memref<1x4x4x128xbf16, #tpu.memory_space<vmem>>, vector<1x1x4x128xbf16>
      %79 = vector.shape_cast %78 : vector<1x1x4x128xbf16> to vector<4x128xbf16>
      %80 = vector.shape_cast %76 : vector<4x128xbf16> to vector<1x1x4x128xbf16>
      tpu.vector_store %arg4[%c0_73, %77, %c0_74, %c0_75], %80 {strides = array<i32>} : memref<1x4x4x128xbf16, #tpu.memory_space<vmem>>, vector<1x1x4x128xbf16>,
    }
    %c4_i32_0 = arith.constant 4 : i32
    return
  }
  func.func @transform_0(%arg0: i32) -> (i32, i32, i32, i32) {
    %c0_i32 = arith.constant 0 : i32
    %c0_i32_0 = arith.constant 0 : i32
    %c0_i32_1 = arith.constant 0 : i32
    %c0_i32_2 = arith.constant 0 : i32
    return %arg0, %c0_i32, %c0_i32_0, %c0_i32_1 : i32, i32, i32, i32
  }
  func.func @transform_1(%arg0: i32) -> (i32, i32, i32, i32) {
    %c0_i32 = arith.constant 0 : i32
    %c0_i32_0 = arith.constant 0 : i32
    %c0_i32_1 = arith.constant 0 : i32
    %c0_i32_2 = arith.constant 0 : i32
    %c0_i32_3 = arith.constant 0 : i32
    return %c0_i32, %c0_i32_0, %c0_i32_1, %c0_i32_2 : i32, i32, i32, i32
  }
  func.func @transform_2(%arg0: i32) -> (i32, i32) {
    %c0_i32 = arith.constant 0 : i32
    %c0_i32_0 = arith.constant 0 : i32
    %c0_i32_1 = arith.constant 0 : i32
    return %c0_i32, %c0_i32_0 : i32, i32
  }
  func.func @transform_3(%arg0: i32) -> (i32, i32, i32, i32) {
    %c0_i32 = arith.constant 0 : i32
    %c0_i32_0 = arith.constant 0 : i32
    %c0_i32_1 = arith.constant 0 : i32
    %c0_i32_2 = arith.constant 0 : i32
    return %arg0, %c0_i32, %c0_i32_0, %c0_i32_1 : i32, i32, i32, i32
  }
}

module attributes {stable_mosaic.version = 11 : i64} {
  func.func @_conv4x4_s2_leaky_kernel(%arg0: i32, %arg1: memref<1x6x3x256xbf16, #tpu.memory_space<vmem>>, %arg2: memref<4x2x256x256xbf16, #tpu.memory_space<vmem>>, %arg3: memref<1x256xf32, #tpu.memory_space<vmem>>, %arg4: memref<1x2x2x256xbf16, #tpu.memory_space<vmem>>) attributes {dimension_semantics = [#tpu.dimension_semantics<parallel>], iteration_bounds = array<i64: 2>, scalar_prefetch = 0 : i64, scratch_operands = 0 : i64, tpu.core_type = #tpu.core_type<tc>, window_params = [{transform_indices = @transform_0, window_bounds = array<i64: 1, 6, 3, 256>}, {pipeline_mode = #tpu.pipeline_mode<synchronous>, transform_indices = @transform_1, window_bounds = array<i64: 4, 2, 256, 256>}, {pipeline_mode = #tpu.pipeline_mode<synchronous>, transform_indices = @transform_2, window_bounds = array<i64: 1, 256>}, {transform_indices = @transform_3, window_bounds = array<i64: 1, 2, 2, 256>}]} {
    %c0_i32 = arith.constant 0 : i32
    %c2_i32 = arith.constant 2 : i32
    %0 = arith.addi %c0_i32, %c2_i32 : i32
    %c1_i32 = arith.constant 1 : i32
    scf.for %arg5 = %c0_i32 to %0 step %c1_i32  : i32 {
      %c1_i32_1 = arith.constant 1 : i32
      %1 = arith.muli %arg5, %c1_i32_1 : i32
      %c0_i32_2 = arith.constant 0 : i32
      %2 = arith.addi %c0_i32_2, %1 : i32
      %cst = arith.constant 0.000000e+00 : f32
      %3 = vector.broadcast %cst : f32 to vector<2x256xf32>
      %c2_i32_3 = arith.constant 2 : i32
      %4 = arith.muli %c2_i32_3, %2 : i32
      %c0_i32_4 = arith.constant 0 : i32
      %5 = arith.addi %4, %c0_i32_4 : i32
      %c0 = arith.constant 0 : index
      %6 = arith.index_cast %5 : i32 to index
      %c0_5 = arith.constant 0 : index
      %c0_6 = arith.constant 0 : index
      %7 = vector.load %arg1[%c0, %6, %c0_5, %c0_6] : memref<1x6x3x256xbf16, #tpu.memory_space<vmem>>, vector<1x1x2x256xbf16>
      %8 = vector.shape_cast %7 : vector<1x1x2x256xbf16> to vector<2x256xbf16>
      %c0_7 = arith.constant 0 : index
      %c0_8 = arith.constant 0 : index
      %c0_9 = arith.constant 0 : index
      %c0_10 = arith.constant 0 : index
      %9 = vector.load %arg2[%c0_7, %c0_8, %c0_9, %c0_10] : memref<4x2x256x256xbf16, #tpu.memory_space<vmem>>, vector<1x1x256x256xbf16>
      %10 = vector.shape_cast %9 : vector<1x1x256x256xbf16> to vector<256x256xbf16>
      %cst_11 = arith.constant dense<0.000000e+00> : vector<2x256xf32>
      %11 = tpu.matmul %8, %10, %cst_11 {dimension_numbers = #tpu.dot_dimension_numbers<[1], [0], [0], [1], [0, 0, 1, 1], [], []>} : vector<2x256xbf16>, vector<256x256xbf16>, vector<2x256xf32> -> vector<2x256xf32>
      %12 = arith.addf %3, %11 : vector<2x256xf32>
      %c0_12 = arith.constant 0 : index
      %13 = arith.index_cast %5 : i32 to index
      %c1 = arith.constant 1 : index
      %c0_13 = arith.constant 0 : index
      %14 = vector.load %arg1[%c0_12, %13, %c1, %c0_13] : memref<1x6x3x256xbf16, #tpu.memory_space<vmem>>, vector<1x1x2x256xbf16>
      %15 = vector.shape_cast %14 : vector<1x1x2x256xbf16> to vector<2x256xbf16>
      %c0_14 = arith.constant 0 : index
      %c1_15 = arith.constant 1 : index
      %c0_16 = arith.constant 0 : index
      %c0_17 = arith.constant 0 : index
      %16 = vector.load %arg2[%c0_14, %c1_15, %c0_16, %c0_17] : memref<4x2x256x256xbf16, #tpu.memory_space<vmem>>, vector<1x1x256x256xbf16>
      %17 = vector.shape_cast %16 : vector<1x1x256x256xbf16> to vector<256x256xbf16>
      %cst_18 = arith.constant dense<0.000000e+00> : vector<2x256xf32>
      %18 = tpu.matmul %15, %17, %cst_18 {dimension_numbers = #tpu.dot_dimension_numbers<[1], [0], [0], [1], [0, 0, 1, 1], [], []>} : vector<2x256xbf16>, vector<256x256xbf16>, vector<2x256xf32> -> vector<2x256xf32>
      %19 = arith.addf %12, %18 : vector<2x256xf32>
      %c2_i32_19 = arith.constant 2 : i32
      %20 = arith.muli %c2_i32_19, %2 : i32
      %c1_i32_20 = arith.constant 1 : i32
      %21 = arith.addi %20, %c1_i32_20 : i32
      %c0_21 = arith.constant 0 : index
      %22 = arith.index_cast %21 : i32 to index
      %c0_22 = arith.constant 0 : index
      %c0_23 = arith.constant 0 : index
      %23 = vector.load %arg1[%c0_21, %22, %c0_22, %c0_23] : memref<1x6x3x256xbf16, #tpu.memory_space<vmem>>, vector<1x1x2x256xbf16>
      %24 = vector.shape_cast %23 : vector<1x1x2x256xbf16> to vector<2x256xbf16>
      %c1_24 = arith.constant 1 : index
      %c0_25 = arith.constant 0 : index
      %c0_26 = arith.constant 0 : index
      %c0_27 = arith.constant 0 : index
      %25 = vector.load %arg2[%c1_24, %c0_25, %c0_26, %c0_27] : memref<4x2x256x256xbf16, #tpu.memory_space<vmem>>, vector<1x1x256x256xbf16>
      %26 = vector.shape_cast %25 : vector<1x1x256x256xbf16> to vector<256x256xbf16>
      %cst_28 = arith.constant dense<0.000000e+00> : vector<2x256xf32>
      %27 = tpu.matmul %24, %26, %cst_28 {dimension_numbers = #tpu.dot_dimension_numbers<[1], [0], [0], [1], [0, 0, 1, 1], [], []>} : vector<2x256xbf16>, vector<256x256xbf16>, vector<2x256xf32> -> vector<2x256xf32>
      %28 = arith.addf %19, %27 : vector<2x256xf32>
      %c0_29 = arith.constant 0 : index
      %29 = arith.index_cast %21 : i32 to index
      %c1_30 = arith.constant 1 : index
      %c0_31 = arith.constant 0 : index
      %30 = vector.load %arg1[%c0_29, %29, %c1_30, %c0_31] : memref<1x6x3x256xbf16, #tpu.memory_space<vmem>>, vector<1x1x2x256xbf16>
      %31 = vector.shape_cast %30 : vector<1x1x2x256xbf16> to vector<2x256xbf16>
      %c1_32 = arith.constant 1 : index
      %c1_33 = arith.constant 1 : index
      %c0_34 = arith.constant 0 : index
      %c0_35 = arith.constant 0 : index
      %32 = vector.load %arg2[%c1_32, %c1_33, %c0_34, %c0_35] : memref<4x2x256x256xbf16, #tpu.memory_space<vmem>>, vector<1x1x256x256xbf16>
      %33 = vector.shape_cast %32 : vector<1x1x256x256xbf16> to vector<256x256xbf16>
      %cst_36 = arith.constant dense<0.000000e+00> : vector<2x256xf32>
      %34 = tpu.matmul %31, %33, %cst_36 {dimension_numbers = #tpu.dot_dimension_numbers<[1], [0], [0], [1], [0, 0, 1, 1], [], []>} : vector<2x256xbf16>, vector<256x256xbf16>, vector<2x256xf32> -> vector<2x256xf32>
      %35 = arith.addf %28, %34 : vector<2x256xf32>
      %c2_i32_37 = arith.constant 2 : i32
      %36 = arith.muli %c2_i32_37, %2 : i32
      %c2_i32_38 = arith.constant 2 : i32
      %37 = arith.addi %36, %c2_i32_38 : i32
      %c0_39 = arith.constant 0 : index
      %38 = arith.index_cast %37 : i32 to index
      %c0_40 = arith.constant 0 : index
      %c0_41 = arith.constant 0 : index
      %39 = vector.load %arg1[%c0_39, %38, %c0_40, %c0_41] : memref<1x6x3x256xbf16, #tpu.memory_space<vmem>>, vector<1x1x2x256xbf16>
      %40 = vector.shape_cast %39 : vector<1x1x2x256xbf16> to vector<2x256xbf16>
      %c2 = arith.constant 2 : index
      %c0_42 = arith.constant 0 : index
      %c0_43 = arith.constant 0 : index
      %c0_44 = arith.constant 0 : index
      %41 = vector.load %arg2[%c2, %c0_42, %c0_43, %c0_44] : memref<4x2x256x256xbf16, #tpu.memory_space<vmem>>, vector<1x1x256x256xbf16>
      %42 = vector.shape_cast %41 : vector<1x1x256x256xbf16> to vector<256x256xbf16>
      %cst_45 = arith.constant dense<0.000000e+00> : vector<2x256xf32>
      %43 = tpu.matmul %40, %42, %cst_45 {dimension_numbers = #tpu.dot_dimension_numbers<[1], [0], [0], [1], [0, 0, 1, 1], [], []>} : vector<2x256xbf16>, vector<256x256xbf16>, vector<2x256xf32> -> vector<2x256xf32>
      %44 = arith.addf %35, %43 : vector<2x256xf32>
      %c0_46 = arith.constant 0 : index
      %45 = arith.index_cast %37 : i32 to index
      %c1_47 = arith.constant 1 : index
      %c0_48 = arith.constant 0 : index
      %46 = vector.load %arg1[%c0_46, %45, %c1_47, %c0_48] : memref<1x6x3x256xbf16, #tpu.memory_space<vmem>>, vector<1x1x2x256xbf16>
      %47 = vector.shape_cast %46 : vector<1x1x2x256xbf16> to vector<2x256xbf16>
      %c2_49 = arith.constant 2 : index
      %c1_50 = arith.constant 1 : index
      %c0_51 = arith.constant 0 : index
      %c0_52 = arith.constant 0 : index
      %48 = vector.load %arg2[%c2_49, %c1_50, %c0_51, %c0_52] : memref<4x2x256x256xbf16, #tpu.memory_space<vmem>>, vector<1x1x256x256xbf16>
      %49 = vector.shape_cast %48 : vector<1x1x256x256xbf16> to vector<256x256xbf16>
      %cst_53 = arith.constant dense<0.000000e+00> : vector<2x256xf32>
      %50 = tpu.matmul %47, %49, %cst_53 {dimension_numbers = #tpu.dot_dimension_numbers<[1], [0], [0], [1], [0, 0, 1, 1], [], []>} : vector<2x256xbf16>, vector<256x256xbf16>, vector<2x256xf32> -> vector<2x256xf32>
      %51 = arith.addf %44, %50 : vector<2x256xf32>
      %c2_i32_54 = arith.constant 2 : i32
      %52 = arith.muli %c2_i32_54, %2 : i32
      %c3_i32 = arith.constant 3 : i32
      %53 = arith.addi %52, %c3_i32 : i32
      %c0_55 = arith.constant 0 : index
      %54 = arith.index_cast %53 : i32 to index
      %c0_56 = arith.constant 0 : index
      %c0_57 = arith.constant 0 : index
      %55 = vector.load %arg1[%c0_55, %54, %c0_56, %c0_57] : memref<1x6x3x256xbf16, #tpu.memory_space<vmem>>, vector<1x1x2x256xbf16>
      %56 = vector.shape_cast %55 : vector<1x1x2x256xbf16> to vector<2x256xbf16>
      %c3 = arith.constant 3 : index
      %c0_58 = arith.constant 0 : index
      %c0_59 = arith.constant 0 : index
      %c0_60 = arith.constant 0 : index
      %57 = vector.load %arg2[%c3, %c0_58, %c0_59, %c0_60] : memref<4x2x256x256xbf16, #tpu.memory_space<vmem>>, vector<1x1x256x256xbf16>
      %58 = vector.shape_cast %57 : vector<1x1x256x256xbf16> to vector<256x256xbf16>
      %cst_61 = arith.constant dense<0.000000e+00> : vector<2x256xf32>
      %59 = tpu.matmul %56, %58, %cst_61 {dimension_numbers = #tpu.dot_dimension_numbers<[1], [0], [0], [1], [0, 0, 1, 1], [], []>} : vector<2x256xbf16>, vector<256x256xbf16>, vector<2x256xf32> -> vector<2x256xf32>
      %60 = arith.addf %51, %59 : vector<2x256xf32>
      %c0_62 = arith.constant 0 : index
      %61 = arith.index_cast %53 : i32 to index
      %c1_63 = arith.constant 1 : index
      %c0_64 = arith.constant 0 : index
      %62 = vector.load %arg1[%c0_62, %61, %c1_63, %c0_64] : memref<1x6x3x256xbf16, #tpu.memory_space<vmem>>, vector<1x1x2x256xbf16>
      %63 = vector.shape_cast %62 : vector<1x1x2x256xbf16> to vector<2x256xbf16>
      %c3_65 = arith.constant 3 : index
      %c1_66 = arith.constant 1 : index
      %c0_67 = arith.constant 0 : index
      %c0_68 = arith.constant 0 : index
      %64 = vector.load %arg2[%c3_65, %c1_66, %c0_67, %c0_68] : memref<4x2x256x256xbf16, #tpu.memory_space<vmem>>, vector<1x1x256x256xbf16>
      %65 = vector.shape_cast %64 : vector<1x1x256x256xbf16> to vector<256x256xbf16>
      %cst_69 = arith.constant dense<0.000000e+00> : vector<2x256xf32>
      %66 = tpu.matmul %63, %65, %cst_69 {dimension_numbers = #tpu.dot_dimension_numbers<[1], [0], [0], [1], [0, 0, 1, 1], [], []>} : vector<2x256xbf16>, vector<256x256xbf16>, vector<2x256xf32> -> vector<2x256xf32>
      %67 = arith.addf %60, %66 : vector<2x256xf32>
      %c0_70 = arith.constant 0 : index
      %c0_71 = arith.constant 0 : index
      %68 = vector.load %arg3[%c0_70, %c0_71] : memref<1x256xf32, #tpu.memory_space<vmem>>, vector<1x256xf32>
      %69 = vector.broadcast %68 : vector<1x256xf32> to vector<2x256xf32>
      %70 = arith.addf %67, %69 : vector<2x256xf32>
      %cst_72 = arith.constant 0.000000e+00 : f32
      %71 = vector.broadcast %cst_72 : f32 to vector<2x256xf32>
      %72 = arith.cmpf oge, %70, %71 : vector<2x256xf32>
      %cst_73 = arith.constant 2.000000e-01 : f32
      %73 = vector.broadcast %cst_73 : f32 to vector<2x256xf32>
      %74 = arith.mulf %73, %70 : vector<2x256xf32>
      %75 = arith.select %72, %70, %74 : vector<2x256xi1>, vector<2x256xf32>
      %76 = arith.truncf %75 : vector<2x256xf32> to vector<2x256xbf16>
      %c0_74 = arith.constant 0 : index
      %77 = arith.index_cast %2 : i32 to index
      %c0_75 = arith.constant 0 : index
      %c0_76 = arith.constant 0 : index
      %78 = vector.load %arg4[%c0_74, %77, %c0_75, %c0_76] : memref<1x2x2x256xbf16, #tpu.memory_space<vmem>>, vector<1x1x2x256xbf16>
      %79 = vector.shape_cast %78 : vector<1x1x2x256xbf16> to vector<2x256xbf16>
      %80 = vector.shape_cast %76 : vector<2x256xbf16> to vector<1x1x2x256xbf16>
      tpu.vector_store %arg4[%c0_74, %77, %c0_75, %c0_76], %80 {strides = array<i32>} : memref<1x2x2x256xbf16, #tpu.memory_space<vmem>>, vector<1x1x2x256xbf16>,
    }
    %c2_i32_0 = arith.constant 2 : i32
    return
  }
  func.func @transform_0(%arg0: i32) -> (i32, i32, i32, i32) {
    %c0_i32 = arith.constant 0 : i32
    %c0_i32_0 = arith.constant 0 : i32
    %c0_i32_1 = arith.constant 0 : i32
    %c0_i32_2 = arith.constant 0 : i32
    return %arg0, %c0_i32, %c0_i32_0, %c0_i32_1 : i32, i32, i32, i32
  }
  func.func @transform_1(%arg0: i32) -> (i32, i32, i32, i32) {
    %c0_i32 = arith.constant 0 : i32
    %c0_i32_0 = arith.constant 0 : i32
    %c0_i32_1 = arith.constant 0 : i32
    %c0_i32_2 = arith.constant 0 : i32
    %c0_i32_3 = arith.constant 0 : i32
    return %c0_i32, %c0_i32_0, %c0_i32_1, %c0_i32_2 : i32, i32, i32, i32
  }
  func.func @transform_2(%arg0: i32) -> (i32, i32) {
    %c0_i32 = arith.constant 0 : i32
    %c0_i32_0 = arith.constant 0 : i32
    %c0_i32_1 = arith.constant 0 : i32
    return %c0_i32, %c0_i32_0 : i32, i32
  }
  func.func @transform_3(%arg0: i32) -> (i32, i32, i32, i32) {
    %c0_i32 = arith.constant 0 : i32
    %c0_i32_0 = arith.constant 0 : i32
    %c0_i32_1 = arith.constant 0 : i32
    %c0_i32_2 = arith.constant 0 : i32
    return %arg0, %c0_i32, %c0_i32_0, %c0_i32_1 : i32, i32, i32, i32
  }
}

module attributes {stable_mosaic.version = 11 : i64} {
  func.func @_conv4x4_s1_sigmoid_head_kernel(%arg0: i32, %arg1: memref<1x4x4x256xbf16, #tpu.memory_space<vmem>>, %arg2: memref<4x4x1x256xf32, #tpu.memory_space<vmem>>, %arg3: memref<1x1xf32, #tpu.memory_space<vmem>>, %arg4: memref<1x1x1x1xf32, #tpu.memory_space<vmem>>) attributes {dimension_semantics = [#tpu.dimension_semantics<parallel>], iteration_bounds = array<i64: 2>, scalar_prefetch = 0 : i64, scratch_operands = 0 : i64, tpu.core_type = #tpu.core_type<tc>, window_params = [{transform_indices = @transform_0, window_bounds = array<i64: 1, 4, 4, 256>}, {pipeline_mode = #tpu.pipeline_mode<synchronous>, transform_indices = @transform_1, window_bounds = array<i64: 4, 4, 1, 256>}, {pipeline_mode = #tpu.pipeline_mode<synchronous>, transform_indices = @transform_2, window_bounds = array<i64: 1, 1>}, {transform_indices = @transform_3, window_bounds = array<i64: 1, 1, 1, 1>}]} {
    %c0_i32 = arith.constant 0 : i32
    %c1_i32 = arith.constant 1 : i32
    %0 = arith.muli %c0_i32, %c1_i32 : i32
    %c0_i32_0 = arith.constant 0 : i32
    %1 = arith.addi %c0_i32_0, %0 : i32
    %cst = arith.constant 0.000000e+00 : f32
    %2 = vector.broadcast %cst : f32 to vector<1x1xf32>
    %c0_i32_1 = arith.constant 0 : i32
    %3 = arith.addi %1, %c0_i32_1 : i32
    %c0 = arith.constant 0 : index
    %4 = arith.index_cast %3 : i32 to index
    %c0_2 = arith.constant 0 : index
    %c0_3 = arith.constant 0 : index
    %5 = vector.load %arg1[%c0, %4, %c0_2, %c0_3] : memref<1x4x4x256xbf16, #tpu.memory_space<vmem>>, vector<1x1x1x256xbf16>
    %6 = vector.shape_cast %5 : vector<1x1x1x256xbf16> to vector<1x256xbf16>
    %7 = arith.extf %6 : vector<1x256xbf16> to vector<1x256xf32>
    %c0_4 = arith.constant 0 : index
    %c0_5 = arith.constant 0 : index
    %c0_6 = arith.constant 0 : index
    %c0_7 = arith.constant 0 : index
    %8 = vector.load %arg2[%c0_4, %c0_5, %c0_6, %c0_7] : memref<4x4x1x256xf32, #tpu.memory_space<vmem>>, vector<1x1x1x256xf32>
    %9 = vector.shape_cast %8 : vector<1x1x1x256xf32> to vector<1x256xf32>
    %10 = arith.mulf %7, %9 : vector<1x256xf32>
    %cst_8 = arith.constant dense<0.000000e+00> : vector<1xf32>
    %11 = vector.multi_reduction <add>, %10, %cst_8 [1] : vector<1x256xf32> to vector<1xf32>
    %12 = vector.shape_cast %11 : vector<1xf32> to vector<1x1xf32>
    %13 = arith.addf %2, %12 : vector<1x1xf32>
    %c0_i32_9 = arith.constant 0 : i32
    %14 = arith.addi %1, %c0_i32_9 : i32
    %c0_10 = arith.constant 0 : index
    %15 = arith.index_cast %14 : i32 to index
    %c1 = arith.constant 1 : index
    %c0_11 = arith.constant 0 : index
    %16 = vector.load %arg1[%c0_10, %15, %c1, %c0_11] : memref<1x4x4x256xbf16, #tpu.memory_space<vmem>>, vector<1x1x1x256xbf16>
    %17 = vector.shape_cast %16 : vector<1x1x1x256xbf16> to vector<1x256xbf16>
    %18 = arith.extf %17 : vector<1x256xbf16> to vector<1x256xf32>
    %c0_12 = arith.constant 0 : index
    %c1_13 = arith.constant 1 : index
    %c0_14 = arith.constant 0 : index
    %c0_15 = arith.constant 0 : index
    %19 = vector.load %arg2[%c0_12, %c1_13, %c0_14, %c0_15] : memref<4x4x1x256xf32, #tpu.memory_space<vmem>>, vector<1x1x1x256xf32>
    %20 = vector.shape_cast %19 : vector<1x1x1x256xf32> to vector<1x256xf32>
    %21 = arith.mulf %18, %20 : vector<1x256xf32>
    %cst_16 = arith.constant dense<0.000000e+00> : vector<1xf32>
    %22 = vector.multi_reduction <add>, %21, %cst_16 [1] : vector<1x256xf32> to vector<1xf32>
    %23 = vector.shape_cast %22 : vector<1xf32> to vector<1x1xf32>
    %24 = arith.addf %13, %23 : vector<1x1xf32>
    %c0_i32_17 = arith.constant 0 : i32
    %25 = arith.addi %1, %c0_i32_17 : i32
    %c0_18 = arith.constant 0 : index
    %26 = arith.index_cast %25 : i32 to index
    %c2 = arith.constant 2 : index
    %c0_19 = arith.constant 0 : index
    %27 = vector.load %arg1[%c0_18, %26, %c2, %c0_19] : memref<1x4x4x256xbf16, #tpu.memory_space<vmem>>, vector<1x1x1x256xbf16>
    %28 = vector.shape_cast %27 : vector<1x1x1x256xbf16> to vector<1x256xbf16>
    %29 = arith.extf %28 : vector<1x256xbf16> to vector<1x256xf32>
    %c0_20 = arith.constant 0 : index
    %c2_21 = arith.constant 2 : index
    %c0_22 = arith.constant 0 : index
    %c0_23 = arith.constant 0 : index
    %30 = vector.load %arg2[%c0_20, %c2_21, %c0_22, %c0_23] : memref<4x4x1x256xf32, #tpu.memory_space<vmem>>, vector<1x1x1x256xf32>
    %31 = vector.shape_cast %30 : vector<1x1x1x256xf32> to vector<1x256xf32>
    %32 = arith.mulf %29, %31 : vector<1x256xf32>
    %cst_24 = arith.constant dense<0.000000e+00> : vector<1xf32>
    %33 = vector.multi_reduction <add>, %32, %cst_24 [1] : vector<1x256xf32> to vector<1xf32>
    %34 = vector.shape_cast %33 : vector<1xf32> to vector<1x1xf32>
    %35 = arith.addf %24, %34 : vector<1x1xf32>
    %c0_i32_25 = arith.constant 0 : i32
    %36 = arith.addi %1, %c0_i32_25 : i32
    %c0_26 = arith.constant 0 : index
    %37 = arith.index_cast %36 : i32 to index
    %c3 = arith.constant 3 : index
    %c0_27 = arith.constant 0 : index
    %38 = vector.load %arg1[%c0_26, %37, %c3, %c0_27] : memref<1x4x4x256xbf16, #tpu.memory_space<vmem>>, vector<1x1x1x256xbf16>
    %39 = vector.shape_cast %38 : vector<1x1x1x256xbf16> to vector<1x256xbf16>
    %40 = arith.extf %39 : vector<1x256xbf16> to vector<1x256xf32>
    %c0_28 = arith.constant 0 : index
    %c3_29 = arith.constant 3 : index
    %c0_30 = arith.constant 0 : index
    %c0_31 = arith.constant 0 : index
    %41 = vector.load %arg2[%c0_28, %c3_29, %c0_30, %c0_31] : memref<4x4x1x256xf32, #tpu.memory_space<vmem>>, vector<1x1x1x256xf32>
    %42 = vector.shape_cast %41 : vector<1x1x1x256xf32> to vector<1x256xf32>
    %43 = arith.mulf %40, %42 : vector<1x256xf32>
    %cst_32 = arith.constant dense<0.000000e+00> : vector<1xf32>
    %44 = vector.multi_reduction <add>, %43, %cst_32 [1] : vector<1x256xf32> to vector<1xf32>
    %45 = vector.shape_cast %44 : vector<1xf32> to vector<1x1xf32>
    %46 = arith.addf %35, %45 : vector<1x1xf32>
    %c1_i32_33 = arith.constant 1 : i32
    %47 = arith.addi %1, %c1_i32_33 : i32
    %c0_34 = arith.constant 0 : index
    %48 = arith.index_cast %47 : i32 to index
    %c0_35 = arith.constant 0 : index
    %c0_36 = arith.constant 0 : index
    %49 = vector.load %arg1[%c0_34, %48, %c0_35, %c0_36] : memref<1x4x4x256xbf16, #tpu.memory_space<vmem>>, vector<1x1x1x256xbf16>
    %50 = vector.shape_cast %49 : vector<1x1x1x256xbf16> to vector<1x256xbf16>
    %51 = arith.extf %50 : vector<1x256xbf16> to vector<1x256xf32>
    %c1_37 = arith.constant 1 : index
    %c0_38 = arith.constant 0 : index
    %c0_39 = arith.constant 0 : index
    %c0_40 = arith.constant 0 : index
    %52 = vector.load %arg2[%c1_37, %c0_38, %c0_39, %c0_40] : memref<4x4x1x256xf32, #tpu.memory_space<vmem>>, vector<1x1x1x256xf32>
    %53 = vector.shape_cast %52 : vector<1x1x1x256xf32> to vector<1x256xf32>
    %54 = arith.mulf %51, %53 : vector<1x256xf32>
    %cst_41 = arith.constant dense<0.000000e+00> : vector<1xf32>
    %55 = vector.multi_reduction <add>, %54, %cst_41 [1] : vector<1x256xf32> to vector<1xf32>
    %56 = vector.shape_cast %55 : vector<1xf32> to vector<1x1xf32>
    %57 = arith.addf %46, %56 : vector<1x1xf32>
    %c1_i32_42 = arith.constant 1 : i32
    %58 = arith.addi %1, %c1_i32_42 : i32
    %c0_43 = arith.constant 0 : index
    %59 = arith.index_cast %58 : i32 to index
    %c1_44 = arith.constant 1 : index
    %c0_45 = arith.constant 0 : index
    %60 = vector.load %arg1[%c0_43, %59, %c1_44, %c0_45] : memref<1x4x4x256xbf16, #tpu.memory_space<vmem>>, vector<1x1x1x256xbf16>
    %61 = vector.shape_cast %60 : vector<1x1x1x256xbf16> to vector<1x256xbf16>
    %62 = arith.extf %61 : vector<1x256xbf16> to vector<1x256xf32>
    %c1_46 = arith.constant 1 : index
    %c1_47 = arith.constant 1 : index
    %c0_48 = arith.constant 0 : index
    %c0_49 = arith.constant 0 : index
    %63 = vector.load %arg2[%c1_46, %c1_47, %c0_48, %c0_49] : memref<4x4x1x256xf32, #tpu.memory_space<vmem>>, vector<1x1x1x256xf32>
    %64 = vector.shape_cast %63 : vector<1x1x1x256xf32> to vector<1x256xf32>
    %65 = arith.mulf %62, %64 : vector<1x256xf32>
    %cst_50 = arith.constant dense<0.000000e+00> : vector<1xf32>
    %66 = vector.multi_reduction <add>, %65, %cst_50 [1] : vector<1x256xf32> to vector<1xf32>
    %67 = vector.shape_cast %66 : vector<1xf32> to vector<1x1xf32>
    %68 = arith.addf %57, %67 : vector<1x1xf32>
    %c1_i32_51 = arith.constant 1 : i32
    %69 = arith.addi %1, %c1_i32_51 : i32
    %c0_52 = arith.constant 0 : index
    %70 = arith.index_cast %69 : i32 to index
    %c2_53 = arith.constant 2 : index
    %c0_54 = arith.constant 0 : index
    %71 = vector.load %arg1[%c0_52, %70, %c2_53, %c0_54] : memref<1x4x4x256xbf16, #tpu.memory_space<vmem>>, vector<1x1x1x256xbf16>
    %72 = vector.shape_cast %71 : vector<1x1x1x256xbf16> to vector<1x256xbf16>
    %73 = arith.extf %72 : vector<1x256xbf16> to vector<1x256xf32>
    %c1_55 = arith.constant 1 : index
    %c2_56 = arith.constant 2 : index
    %c0_57 = arith.constant 0 : index
    %c0_58 = arith.constant 0 : index
    %74 = vector.load %arg2[%c1_55, %c2_56, %c0_57, %c0_58] : memref<4x4x1x256xf32, #tpu.memory_space<vmem>>, vector<1x1x1x256xf32>
    %75 = vector.shape_cast %74 : vector<1x1x1x256xf32> to vector<1x256xf32>
    %76 = arith.mulf %73, %75 : vector<1x256xf32>
    %cst_59 = arith.constant dense<0.000000e+00> : vector<1xf32>
    %77 = vector.multi_reduction <add>, %76, %cst_59 [1] : vector<1x256xf32> to vector<1xf32>
    %78 = vector.shape_cast %77 : vector<1xf32> to vector<1x1xf32>
    %79 = arith.addf %68, %78 : vector<1x1xf32>
    %c1_i32_60 = arith.constant 1 : i32
    %80 = arith.addi %1, %c1_i32_60 : i32
    %c0_61 = arith.constant 0 : index
    %81 = arith.index_cast %80 : i32 to index
    %c3_62 = arith.constant 3 : index
    %c0_63 = arith.constant 0 : index
    %82 = vector.load %arg1[%c0_61, %81, %c3_62, %c0_63] : memref<1x4x4x256xbf16, #tpu.memory_space<vmem>>, vector<1x1x1x256xbf16>
    %83 = vector.shape_cast %82 : vector<1x1x1x256xbf16> to vector<1x256xbf16>
    %84 = arith.extf %83 : vector<1x256xbf16> to vector<1x256xf32>
    %c1_64 = arith.constant 1 : index
    %c3_65 = arith.constant 3 : index
    %c0_66 = arith.constant 0 : index
    %c0_67 = arith.constant 0 : index
    %85 = vector.load %arg2[%c1_64, %c3_65, %c0_66, %c0_67] : memref<4x4x1x256xf32, #tpu.memory_space<vmem>>, vector<1x1x1x256xf32>
    %86 = vector.shape_cast %85 : vector<1x1x1x256xf32> to vector<1x256xf32>
    %87 = arith.mulf %84, %86 : vector<1x256xf32>
    %cst_68 = arith.constant dense<0.000000e+00> : vector<1xf32>
    %88 = vector.multi_reduction <add>, %87, %cst_68 [1] : vector<1x256xf32> to vector<1xf32>
    %89 = vector.shape_cast %88 : vector<1xf32> to vector<1x1xf32>
    %90 = arith.addf %79, %89 : vector<1x1xf32>
    %c2_i32 = arith.constant 2 : i32
    %91 = arith.addi %1, %c2_i32 : i32
    %c0_69 = arith.constant 0 : index
    %92 = arith.index_cast %91 : i32 to index
    %c0_70 = arith.constant 0 : index
    %c0_71 = arith.constant 0 : index
    %93 = vector.load %arg1[%c0_69, %92, %c0_70, %c0_71] : memref<1x4x4x256xbf16, #tpu.memory_space<vmem>>, vector<1x1x1x256xbf16>
    %94 = vector.shape_cast %93 : vector<1x1x1x256xbf16> to vector<1x256xbf16>
    %95 = arith.extf %94 : vector<1x256xbf16> to vector<1x256xf32>
    %c2_72 = arith.constant 2 : index
    %c0_73 = arith.constant 0 : index
    %c0_74 = arith.constant 0 : index
    %c0_75 = arith.constant 0 : index
    %96 = vector.load %arg2[%c2_72, %c0_73, %c0_74, %c0_75] : memref<4x4x1x256xf32, #tpu.memory_space<vmem>>, vector<1x1x1x256xf32>
    %97 = vector.shape_cast %96 : vector<1x1x1x256xf32> to vector<1x256xf32>
    %98 = arith.mulf %95, %97 : vector<1x256xf32>
    %cst_76 = arith.constant dense<0.000000e+00> : vector<1xf32>
    %99 = vector.multi_reduction <add>, %98, %cst_76 [1] : vector<1x256xf32> to vector<1xf32>
    %100 = vector.shape_cast %99 : vector<1xf32> to vector<1x1xf32>
    %101 = arith.addf %90, %100 : vector<1x1xf32>
    %c2_i32_77 = arith.constant 2 : i32
    %102 = arith.addi %1, %c2_i32_77 : i32
    %c0_78 = arith.constant 0 : index
    %103 = arith.index_cast %102 : i32 to index
    %c1_79 = arith.constant 1 : index
    %c0_80 = arith.constant 0 : index
    %104 = vector.load %arg1[%c0_78, %103, %c1_79, %c0_80] : memref<1x4x4x256xbf16, #tpu.memory_space<vmem>>, vector<1x1x1x256xbf16>
    %105 = vector.shape_cast %104 : vector<1x1x1x256xbf16> to vector<1x256xbf16>
    %106 = arith.extf %105 : vector<1x256xbf16> to vector<1x256xf32>
    %c2_81 = arith.constant 2 : index
    %c1_82 = arith.constant 1 : index
    %c0_83 = arith.constant 0 : index
    %c0_84 = arith.constant 0 : index
    %107 = vector.load %arg2[%c2_81, %c1_82, %c0_83, %c0_84] : memref<4x4x1x256xf32, #tpu.memory_space<vmem>>, vector<1x1x1x256xf32>
    %108 = vector.shape_cast %107 : vector<1x1x1x256xf32> to vector<1x256xf32>
    %109 = arith.mulf %106, %108 : vector<1x256xf32>
    %cst_85 = arith.constant dense<0.000000e+00> : vector<1xf32>
    %110 = vector.multi_reduction <add>, %109, %cst_85 [1] : vector<1x256xf32> to vector<1xf32>
    %111 = vector.shape_cast %110 : vector<1xf32> to vector<1x1xf32>
    %112 = arith.addf %101, %111 : vector<1x1xf32>
    %c2_i32_86 = arith.constant 2 : i32
    %113 = arith.addi %1, %c2_i32_86 : i32
    %c0_87 = arith.constant 0 : index
    %114 = arith.index_cast %113 : i32 to index
    %c2_88 = arith.constant 2 : index
    %c0_89 = arith.constant 0 : index
    %115 = vector.load %arg1[%c0_87, %114, %c2_88, %c0_89] : memref<1x4x4x256xbf16, #tpu.memory_space<vmem>>, vector<1x1x1x256xbf16>
    %116 = vector.shape_cast %115 : vector<1x1x1x256xbf16> to vector<1x256xbf16>
    %117 = arith.extf %116 : vector<1x256xbf16> to vector<1x256xf32>
    %c2_90 = arith.constant 2 : index
    %c2_91 = arith.constant 2 : index
    %c0_92 = arith.constant 0 : index
    %c0_93 = arith.constant 0 : index
    %118 = vector.load %arg2[%c2_90, %c2_91, %c0_92, %c0_93] : memref<4x4x1x256xf32, #tpu.memory_space<vmem>>, vector<1x1x1x256xf32>
    %119 = vector.shape_cast %118 : vector<1x1x1x256xf32> to vector<1x256xf32>
    %120 = arith.mulf %117, %119 : vector<1x256xf32>
    %cst_94 = arith.constant dense<0.000000e+00> : vector<1xf32>
    %121 = vector.multi_reduction <add>, %120, %cst_94 [1] : vector<1x256xf32> to vector<1xf32>
    %122 = vector.shape_cast %121 : vector<1xf32> to vector<1x1xf32>
    %123 = arith.addf %112, %122 : vector<1x1xf32>
    %c2_i32_95 = arith.constant 2 : i32
    %124 = arith.addi %1, %c2_i32_95 : i32
    %c0_96 = arith.constant 0 : index
    %125 = arith.index_cast %124 : i32 to index
    %c3_97 = arith.constant 3 : index
    %c0_98 = arith.constant 0 : index
    %126 = vector.load %arg1[%c0_96, %125, %c3_97, %c0_98] : memref<1x4x4x256xbf16, #tpu.memory_space<vmem>>, vector<1x1x1x256xbf16>
    %127 = vector.shape_cast %126 : vector<1x1x1x256xbf16> to vector<1x256xbf16>
    %128 = arith.extf %127 : vector<1x256xbf16> to vector<1x256xf32>
    %c2_99 = arith.constant 2 : index
    %c3_100 = arith.constant 3 : index
    %c0_101 = arith.constant 0 : index
    %c0_102 = arith.constant 0 : index
    %129 = vector.load %arg2[%c2_99, %c3_100, %c0_101, %c0_102] : memref<4x4x1x256xf32, #tpu.memory_space<vmem>>, vector<1x1x1x256xf32>
    %130 = vector.shape_cast %129 : vector<1x1x1x256xf32> to vector<1x256xf32>
    %131 = arith.mulf %128, %130 : vector<1x256xf32>
    %cst_103 = arith.constant dense<0.000000e+00> : vector<1xf32>
    %132 = vector.multi_reduction <add>, %131, %cst_103 [1] : vector<1x256xf32> to vector<1xf32>
    %133 = vector.shape_cast %132 : vector<1xf32> to vector<1x1xf32>
    %134 = arith.addf %123, %133 : vector<1x1xf32>
    %c3_i32 = arith.constant 3 : i32
    %135 = arith.addi %1, %c3_i32 : i32
    %c0_104 = arith.constant 0 : index
    %136 = arith.index_cast %135 : i32 to index
    %c0_105 = arith.constant 0 : index
    %c0_106 = arith.constant 0 : index
    %137 = vector.load %arg1[%c0_104, %136, %c0_105, %c0_106] : memref<1x4x4x256xbf16, #tpu.memory_space<vmem>>, vector<1x1x1x256xbf16>
    %138 = vector.shape_cast %137 : vector<1x1x1x256xbf16> to vector<1x256xbf16>
    %139 = arith.extf %138 : vector<1x256xbf16> to vector<1x256xf32>
    %c3_107 = arith.constant 3 : index
    %c0_108 = arith.constant 0 : index
    %c0_109 = arith.constant 0 : index
    %c0_110 = arith.constant 0 : index
    %140 = vector.load %arg2[%c3_107, %c0_108, %c0_109, %c0_110] : memref<4x4x1x256xf32, #tpu.memory_space<vmem>>, vector<1x1x1x256xf32>
    %141 = vector.shape_cast %140 : vector<1x1x1x256xf32> to vector<1x256xf32>
    %142 = arith.mulf %139, %141 : vector<1x256xf32>
    %cst_111 = arith.constant dense<0.000000e+00> : vector<1xf32>
    %143 = vector.multi_reduction <add>, %142, %cst_111 [1] : vector<1x256xf32> to vector<1xf32>
    %144 = vector.shape_cast %143 : vector<1xf32> to vector<1x1xf32>
    %145 = arith.addf %134, %144 : vector<1x1xf32>
    %c3_i32_112 = arith.constant 3 : i32
    %146 = arith.addi %1, %c3_i32_112 : i32
    %c0_113 = arith.constant 0 : index
    %147 = arith.index_cast %146 : i32 to index
    %c1_114 = arith.constant 1 : index
    %c0_115 = arith.constant 0 : index
    %148 = vector.load %arg1[%c0_113, %147, %c1_114, %c0_115] : memref<1x4x4x256xbf16, #tpu.memory_space<vmem>>, vector<1x1x1x256xbf16>
    %149 = vector.shape_cast %148 : vector<1x1x1x256xbf16> to vector<1x256xbf16>
    %150 = arith.extf %149 : vector<1x256xbf16> to vector<1x256xf32>
    %c3_116 = arith.constant 3 : index
    %c1_117 = arith.constant 1 : index
    %c0_118 = arith.constant 0 : index
    %c0_119 = arith.constant 0 : index
    %151 = vector.load %arg2[%c3_116, %c1_117, %c0_118, %c0_119] : memref<4x4x1x256xf32, #tpu.memory_space<vmem>>, vector<1x1x1x256xf32>
    %152 = vector.shape_cast %151 : vector<1x1x1x256xf32> to vector<1x256xf32>
    %153 = arith.mulf %150, %152 : vector<1x256xf32>
    %cst_120 = arith.constant dense<0.000000e+00> : vector<1xf32>
    %154 = vector.multi_reduction <add>, %153, %cst_120 [1] : vector<1x256xf32> to vector<1xf32>
    %155 = vector.shape_cast %154 : vector<1xf32> to vector<1x1xf32>
    %156 = arith.addf %145, %155 : vector<1x1xf32>
    %c3_i32_121 = arith.constant 3 : i32
    %157 = arith.addi %1, %c3_i32_121 : i32
    %c0_122 = arith.constant 0 : index
    %158 = arith.index_cast %157 : i32 to index
    %c2_123 = arith.constant 2 : index
    %c0_124 = arith.constant 0 : index
    %159 = vector.load %arg1[%c0_122, %158, %c2_123, %c0_124] : memref<1x4x4x256xbf16, #tpu.memory_space<vmem>>, vector<1x1x1x256xbf16>
    %160 = vector.shape_cast %159 : vector<1x1x1x256xbf16> to vector<1x256xbf16>
    %161 = arith.extf %160 : vector<1x256xbf16> to vector<1x256xf32>
    %c3_125 = arith.constant 3 : index
    %c2_126 = arith.constant 2 : index
    %c0_127 = arith.constant 0 : index
    %c0_128 = arith.constant 0 : index
    %162 = vector.load %arg2[%c3_125, %c2_126, %c0_127, %c0_128] : memref<4x4x1x256xf32, #tpu.memory_space<vmem>>, vector<1x1x1x256xf32>
    %163 = vector.shape_cast %162 : vector<1x1x1x256xf32> to vector<1x256xf32>
    %164 = arith.mulf %161, %163 : vector<1x256xf32>
    %cst_129 = arith.constant dense<0.000000e+00> : vector<1xf32>
    %165 = vector.multi_reduction <add>, %164, %cst_129 [1] : vector<1x256xf32> to vector<1xf32>
    %166 = vector.shape_cast %165 : vector<1xf32> to vector<1x1xf32>
    %167 = arith.addf %156, %166 : vector<1x1xf32>
    %c3_i32_130 = arith.constant 3 : i32
    %168 = arith.addi %1, %c3_i32_130 : i32
    %c0_131 = arith.constant 0 : index
    %169 = arith.index_cast %168 : i32 to index
    %c3_132 = arith.constant 3 : index
    %c0_133 = arith.constant 0 : index
    %170 = vector.load %arg1[%c0_131, %169, %c3_132, %c0_133] : memref<1x4x4x256xbf16, #tpu.memory_space<vmem>>, vector<1x1x1x256xbf16>
    %171 = vector.shape_cast %170 : vector<1x1x1x256xbf16> to vector<1x256xbf16>
    %172 = arith.extf %171 : vector<1x256xbf16> to vector<1x256xf32>
    %c3_134 = arith.constant 3 : index
    %c3_135 = arith.constant 3 : index
    %c0_136 = arith.constant 0 : index
    %c0_137 = arith.constant 0 : index
    %173 = vector.load %arg2[%c3_134, %c3_135, %c0_136, %c0_137] : memref<4x4x1x256xf32, #tpu.memory_space<vmem>>, vector<1x1x1x256xf32>
    %174 = vector.shape_cast %173 : vector<1x1x1x256xf32> to vector<1x256xf32>
    %175 = arith.mulf %172, %174 : vector<1x256xf32>
    %cst_138 = arith.constant dense<0.000000e+00> : vector<1xf32>
    %176 = vector.multi_reduction <add>, %175, %cst_138 [1] : vector<1x256xf32> to vector<1xf32>
    %177 = vector.shape_cast %176 : vector<1xf32> to vector<1x1xf32>
    %178 = arith.addf %167, %177 : vector<1x1xf32>
    %c0_139 = arith.constant 0 : index
    %c0_140 = arith.constant 0 : index
    %179 = vector.load %arg3[%c0_139, %c0_140] : memref<1x1xf32, #tpu.memory_space<vmem>>, vector<1x1xf32>
    %180 = arith.addf %178, %179 : vector<1x1xf32>
    %181 = arith.negf %180 : vector<1x1xf32>
    %182 = math.exp %181 : vector<1x1xf32>
    %cst_141 = arith.constant 1.000000e+00 : f32
    %183 = vector.broadcast %cst_141 : f32 to vector<1x1xf32>
    %184 = arith.addf %183, %182 : vector<1x1xf32>
    %185 = arith.divf %183, %184 : vector<1x1xf32>
    %c0_142 = arith.constant 0 : index
    %186 = arith.index_cast %1 : i32 to index
    %c0_143 = arith.constant 0 : index
    %c0_144 = arith.constant 0 : index
    %187 = vector.load %arg4[%c0_142, %186, %c0_143, %c0_144] : memref<1x1x1x1xf32, #tpu.memory_space<vmem>>, vector<1x1x1x1xf32>
    %188 = vector.shape_cast %187 : vector<1x1x1x1xf32> to vector<1x1xf32>
    %189 = vector.shape_cast %185 : vector<1x1xf32> to vector<1x1x1x1xf32>
    tpu.vector_store %arg4[%c0_142, %186, %c0_143, %c0_144], %189 {strides = array<i32>} : memref<1x1x1x1xf32, #tpu.memory_space<vmem>>, vector<1x1x1x1xf32>,
    %c1_i32_145 = arith.constant 1 : i32
    return
  }
  func.func @transform_0(%arg0: i32) -> (i32, i32, i32, i32) {
    %c0_i32 = arith.constant 0 : i32
    %c0_i32_0 = arith.constant 0 : i32
    %c0_i32_1 = arith.constant 0 : i32
    %c0_i32_2 = arith.constant 0 : i32
    return %arg0, %c0_i32, %c0_i32_0, %c0_i32_1 : i32, i32, i32, i32
  }
  func.func @transform_1(%arg0: i32) -> (i32, i32, i32, i32) {
    %c0_i32 = arith.constant 0 : i32
    %c0_i32_0 = arith.constant 0 : i32
    %c0_i32_1 = arith.constant 0 : i32
    %c0_i32_2 = arith.constant 0 : i32
    %c0_i32_3 = arith.constant 0 : i32
    return %c0_i32, %c0_i32_0, %c0_i32_1, %c0_i32_2 : i32, i32, i32, i32
  }
  func.func @transform_2(%arg0: i32) -> (i32, i32) {
    %c0_i32 = arith.constant 0 : i32
    %c0_i32_0 = arith.constant 0 : i32
    %c0_i32_1 = arith.constant 0 : i32
    return %c0_i32, %c0_i32_0 : i32, i32
  }
  func.func @transform_3(%arg0: i32) -> (i32, i32, i32, i32) {
    %c0_i32 = arith.constant 0 : i32
    %c0_i32_0 = arith.constant 0 : i32
    %c0_i32_1 = arith.constant 0 : i32
    %c0_i32_2 = arith.constant 0 : i32
    return %arg0, %c0_i32, %c0_i32_0, %c0_i32_1 : i32, i32, i32, i32
  }
}

</mosaic_0001>

<bundles_post_ra>
// kernel: _lambda_.4
= control target key start
LH: loop header
LB: loop body
LE: loop exit
PB: predicated region body
PF: predicated region fallthrough
CT: control target
= control target key end

     0   :  { %s916_s12 = smov 0   ;;  %s1026_s0 = inlined_call_operand.vmem [shape: bf16[2,18,9,6], index: 0, kind: input, shape index: {}]   ;;  %s1027_s1 = inlined_call_operand.vmem [shape: bf16[4,2,6,64], index: 1, kind: input, shape index: {}]   ;;  %s1028_s2 = inlined_call_operand.vmem [shape: f32[1,64], index: 2, kind: input, shape index: {}]   ;;  %s1029_s3 = inlined_call_operand.vmem [shape: bf16[2,8,8,64], index: 3, kind: output, shape index: {}]  }
   0x1 LB: > { %s736_s13 = sadd.s32 4294967295, %s888_s12   ;;  %p740_p0 = scmp.ge.s32.totalorder %s888_s12, 1  ;;  %s888_s12 = sphi %s916_s12, %s13_s12  }
   0x2   : > { %p137_p1 = scmp.lt.s32.totalorder %s888_s12, 3 }
   0x4   : > { %p138_p2 = pnand %p740_p0, %p137_p1 }
   0x5   : > { %p161_p3 = scmp.lt.s32.totalorder (!%p138_p2), %s736_s13, 1  ;;  %s934_s22 = smov (!%p138_p2), 0  }
   0x6   : > { %141 = sbr.rel (%p138_p2) target bundleno = 256 (0x100), region = 32 }
   0xb   : > { %s1031_s13 = smov (!%p161_p3, %s736_s13), 1 }
   0xc   : > { %s855_s14 = smul.u32 144, %s1031_s13  ;;  %s785_s15 = sshll.u32 %s1031_s13, 5 }
   0xd   : > { %s927_s18 = scalar_lea.vmem %s1029_s3, %s785_s15 }
   0xe   : > { %s932_s21 = scalar_lea.vmem %s1026_s0, %s855_s14 }
   0xf LB: >> { %v183_v0 = vld [vmem:[%s1027_s1] sm:$0x7]  ;;  %vm203_vm0 = vcmask 1042432   ;;  %v894_v1 = vmov 0.0   ;;  %v747_v3 = vld [vmem:[%s1027_s1 + $0x4] sm:$0x7]  ;;  %s892_s22 = sphi %s934_s22, %s177_s22  }
  0x10   : >> { %813 = vmatprep.subr.bf16.mxu1 %v894_v1  ;;  %v251_v2 = vsel %vm203_vm0, %v183_v0, 0  ;;  %807 = vmatprep.subr.bf16.mxu0 %v894_v1  ;;  %vm895_vm1 = vmmov 0   ;;  %v205_v4 = vsel %vm203_vm0, %v747_v3, 0  ;;  %s787_s27 = sshll.u32 %s892_s22, 4  ;;  %vm199_vm2 = vcmask 48128   ;;  %s782_s17 = sshll.u32 %s892_s22, 2 }
  0x11   : >> { %814 = vmatpush3.bf16.msra.mxu1 %v251_v2  ;;  %815 = vmatprep.mubr.msk.bf16.mxu1 %vm895_vm1, %v894_v1  ;;  %v758_v5 = vld [vmem:[%s1027_s1 + $0xc] sm:$0x7]  ;;  %s956_s30 = scalar_lea.vmem %s932_s21, %s787_s27  ;;  %v754_v16 = vld [vmem:[%s1027_s1 + $0x8] sm:$0x7]  ;;  %v768_v17 = vld [vmem:[%s1027_s1 + $0x14] sm:$0x7]  ;;  %s657_s19 = scalar_lea.vmem %s927_s18, %s782_s17 }
  0x12   : >> { %808 = vmatpush3.bf16.msra.mxu0 %v205_v4  ;;  %809 = vmatprep.mubr.msk.bf16.mxu0 %vm895_vm1, %v894_v1  ;;  %v367_v6 = vsel %vm203_vm0, %v758_v5, 0  ;;  %v182_v7 = vld [vmem:[%s956_s30] sm:$0xf]  ;;  %v184_v8 = vld [vmem:[%s956_s30 + $0x4] sm:$0x1]  ;;  %v304_v22 = vsel %vm203_vm0, %v754_v16, 0 }
  0x13   : >> { %819 = vmatprep.subr.bf16.mxu0 %v894_v1  ;;  %825 = vmatprep.subr.bf16.mxu1 %v894_v1  ;;  %v748_v9 = vcombine.low %v182_v7, %v184_v8  ;;  %v875_v10 = vld [vmem:[%s956_s30 + $0x8] sm:$0x1f]   ;;  %v876_v15 = vld [vmem:[%s956_s30 + $0x10] sm:$0x1f]   ;;  %v484_v24 = vsel %vm203_vm0, %v768_v17, 0  ;;  %vm658_vm4 = vcmask 519168  }
  0x14   : >> { %816 = vmatmul.mubr.msk.bf16.vlgmr.msra.gmra.mxu1 %vm199_vm2, %v182_v7  ;;  %v357_v13 = vshrl.u32 %v875_v10, 16  ;;  %v359_v14 = vshll.u32 %v875_v10, 16  ;;  %v476_v20 = vshll.u32 %v876_v15, 16  ;;  %v474_v25 = vshrl.u32 %v876_v15, 16  ;;  %v877_v27 = vld [vmem:[%s956_s30 + $0x18] sm:$0x1f]  }
  0x15   : >> { %826 = vmatpush3.bf16.msra.mxu1 %v367_v6  ;;  %827 = vmatprep.mubr.msk.bf16.mxu1 %vm895_vm1, %v894_v1  ;;  %v193_v11 = vshrl.u32 %v748_v9, 16  ;;  %v195_v12 = vshll.u32 %v748_v9, 16  ;;  %v764_v28 = vld [vmem:[%s1027_s1 + $0x10] sm:$0x7]  ;;  %v778_v30 = vld [vmem:[%s1027_s1 + $0x1c] sm:$0x7] }
  0x16   : >> { %837 = vmatprep.subr.bf16.mxu1 %v894_v1  ;;  %v361_v19 = vrot.slane %v359_v14, 1  ;;  %v478_v26 = vrot.slane %v476_v20, 1  ;;  %v593_v31 = vshll.u32 %v877_v27, 16  ;;  %v753_v32 = vld [vmem:[%s956_s30 + $0x8] sm:$0xf]  ;;  %v421_v33 = vsel %vm203_vm0, %v764_v28, 0 }
  0x17   : >> { %v197_v18 = vrot.slane %v195_v12, 1  ;;  %v601_v34 = vsel %vm203_vm0, %v778_v30, 0  ;;  %v591_v35 = vshrl.u32 %v877_v27, 16  ;;  %v774_v37 = vld [vmem:[%s1027_s1 + $0x18] sm:$0x7]  ;;  %s177_s22 = sadd.s32 1, %s892_s22  }
  0x18   : >> { %v362_v23 = vor.u32 %v361_v19, %v357_v13  ;;  %v479_v29 = vor.u32 %v478_v26, %v474_v25  ;;  %v595_v36 = vrot.slane %v593_v31, 1  ;;  %v763_v39 = vld [vmem:[%s956_s30 + $0x10] sm:$0xf]  ;;  %v538_v40 = vsel %vm203_vm0, %v774_v37, 0  ;;  %v773_v41 = vld [vmem:[%s956_s30 + $0x18] sm:$0xf] }
  0x19   : >> { %v198_v21 = vor.u32 %v197_v18, %v193_v11  ;;  %v781_v13 = vld [vmem:[%s1028_s2] ss:$0 sm:$0xff]  ;;  %p174_p4 = scmp.ge.s32.totalorder %s177_s22, 8  }
  0x1a   : >> { %v596_v38 = vor.u32 %v595_v36, %v591_v35 }
  0x1b   : >> { %810 = vmatmul.mubr.msk.bf16.vlgmr.msra.gmra.mxu0 %vm199_vm2, %v198_v21 }
  0x1c   : >> { %828 = vmatmul.mubr.msk.bf16.vlgmr.msra.gmra.mxu1 %vm199_vm2, %v362_v23  ;;  %820 = vmatpush3.bf16.msra.mxu0 %v304_v22 }
  0x1d   : >> { %821 = vmatprep.mubr.msk.bf16.mxu0 %vm895_vm1, %v894_v1  ;;  %831 = vmatprep.subr.bf16.mxu0 %v894_v1 }
  0x1e   : >> { %838 = vmatpush3.bf16.msra.mxu1 %v484_v24  ;;  %839 = vmatprep.mubr.msk.bf16.mxu1 %vm895_vm1, %v894_v1 }
  0x1f   : >> { %849 = vmatprep.subr.bf16.mxu1 %v894_v1 }
  0x23   : >> { %822 = vmatmul.mubr.msk.bf16.vlgmr.msra.gmra.mxu0 %vm199_vm2, %v753_v32 }
  0x24   : >> { %840 = vmatmul.mubr.msk.bf16.vlgmr.msra.gmra.mxu1 %vm199_vm2, %v479_v29  ;;  %832 = vmatpush3.bf16.msra.mxu0 %v421_v33 }
  0x25   : >> { %833 = vmatprep.mubr.msk.bf16.mxu0 %vm895_vm1, %v894_v1  ;;  %843 = vmatprep.subr.bf16.mxu0 %v894_v1 }
  0x26   : >> { %850 = vmatpush3.bf16.msra.mxu1 %v601_v34  ;;  %851 = vmatprep.mubr.msk.bf16.mxu1 %vm895_vm1, %v894_v1 }
  0x2b   : >> { %834 = vmatmul.mubr.msk.bf16.vlgmr.msra.gmra.mxu0 %vm199_vm2, %v763_v39 }
  0x2c   : >> { %852 = vmatmul.mubr.msk.bf16.vlgmr.msra.gmra.mxu1 %vm199_vm2, %v596_v38  ;;  %844 = vmatpush3.bf16.msra.mxu0 %v538_v40 }
  0x2d   : >> { %845 = vmatprep.mubr.msk.bf16.mxu0 %vm895_vm1, %v894_v1 }
  0x33   : >> { %846 = vmatmul.mubr.msk.bf16.vlgmr.msra.gmra.mxu0 %vm199_vm2, %v773_v41 }
  0xd4   : >> { %v287_v42 = vpop.f32.mrf.mxu1 }
  0xd6   : >> { %v817_v43 = vpop.f32.mrf.mxu1 }
  0xd8   : >> { %v290_v44 = vpop.f32.mrf.mxu1 }
  0xda   : >> { %v818_v45 = vpop.f32.mrf.mxu1 }
  0xdb   : >> { %v241_v46 = vpop.f32.mrf.mxu0 }
  0xdc   : >> { %v403_v47 = vpop.f32.mrf.mxu1  ;;  %v288_v58 = vadd.f32 %v287_v42, %v241_v46 }
  0xdd   : >> { %v811_v48 = vpop.f32.mrf.mxu0 }
  0xde   : >> { %v829_v49 = vpop.f32.mrf.mxu1 }
  0xdf   : >> { %v244_v50 = vpop.f32.mrf.mxu0 }
  0xe0   : >> { %v406_v51 = vpop.f32.mrf.mxu1 }
  0xe1   : >> { %v812_v52 = vpop.f32.mrf.mxu0 }
  0xe2   : >> { %v830_v53 = vpop.f32.mrf.mxu1 }
  0xe3   : >> { %v340_v54 = vpop.f32.mrf.mxu0 }
  0xe4   : >> { %v520_v55 = vpop.f32.mrf.mxu1  ;;  %v346_v61 = vadd.f32 %v340_v54, %v288_v58 }
  0xe5   : >> { %v823_v56 = vpop.f32.mrf.mxu0 }
  0xe6   : >> { %v841_v57 = vpop.f32.mrf.mxu1  ;;  %v409_v2 = vadd.f32 %v403_v47, %v346_v61 }
  0xe7   : >> { %v343_v59 = vpop.f32.mrf.mxu0 }
  0xe8   : >> { %v523_v60 = vpop.f32.mrf.mxu1 }
  0xe9   : >> { %v824_v62 = vpop.f32.mrf.mxu0 }
  0xea   : >> { %v842_v63 = vpop.f32.mrf.mxu1 }
  0xeb   : >> { %v457_v0 = vpop.f32.mrf.mxu0 }
  0xec   : >> { %v637_v1 = vpop.f32.mrf.mxu1  ;;  %v463_v5 = vadd.f32 %v457_v0, %v409_v2 }
  0xed   : >> { %v835_v3 = vpop.f32.mrf.mxu0 }
  0xee   : >> { %v853_v4 = vpop.f32.mrf.mxu1  ;;  %v526_v10 = vadd.f32 %v520_v55, %v463_v5 }
  0xef   : >> { %v460_v6 = vpop.f32.mrf.mxu0 }
  0xf0   : >> { %v640_v7 = vpop.f32.mrf.mxu1 }
  0xf1   : >> { %v836_v8 = vpop.f32.mrf.mxu0 }
  0xf2   : >> { %v854_v9 = vpop.f32.mrf.mxu1 }
  0xf3   : >> { %v574_v11 = vpop.f32.mrf.mxu0 }
  0xf4   : >> { %v580_v12 = vadd.f32 %v574_v11, %v526_v10 }
  0xf5   : >> { %v847_v14 = vpop.f32.mrf.mxu0 }
  0xf6   : >> { %v643_v15 = vadd.f32 %v637_v1, %v580_v12 }
  0xf7   : >> { %v577_v16 = vpop.f32.mrf.mxu0 }
  0xf8   : >> { %v651_v17 = vadd.f32 %v781_v13, %v643_v15 }
  0xf9   : >> { %v848_v18 = vpop.f32.mrf.mxu0 }
  0xfa   : >> { %vm652_vm3 = vcmp.ge.f32.partialorder %v651_v17, 0.0  ;;  %v653_v19 = vmul.f32 0.2, %v651_v17 }
  0xfb   : > { %176 = sbr.rel (!%p174_p4) target bundleno = 15 (0xf), region = 81 }
  0xfc   : >> { %v654_v20 = vsel %vm652_vm3, %v651_v17, %v653_v19 }
  0xfd   : >> { %v655_v21 = vpack.c.bf16 %v654_v20, %v654_v20 }
  0xff   : >> { %659 = vst.msk [vmem:[%s657_s19] sm:$0xf] %vm658_vm4, %v655_v21 }
 0x100 PF: > { %s13_s12 = sadd.s32 1, %s888_s12  }
 0x101   : > { %p10_p5 = scmp.ge.s32.totalorder %s13_s12, 4  }
 0x103   :  { %12 = sbr.rel (!%p10_p5) target bundleno = 1 (0x1), region = 92 }

// kernel: _lambda_.5
= control target key start
LH: loop header
LB: loop body
LE: loop exit
PB: predicated region body
PF: predicated region fallthrough
CT: control target
= control target key end

     0   :  { %8 = vsyncpa [#allocation3], 0  ;;  %s1943_s0 = inlined_call_operand.vmem [shape: bf16[2,10,5,128], index: 0, kind: input, shape index: {}]   ;;  %s1944_s1 = inlined_call_operand.hbm [shape: bf16[4,2,128,128], index: 1, kind: input, shape index: {}]   ;;  %s1945_s2 = inlined_call_operand.hbm [shape: f32[1,128], index: 2, kind: input, shape index: {}]   ;;  %s1946_s3 = inlined_call_operand.vmem [shape: bf16[2,4,4,128], index: 3, kind: output, shape index: {}]  }
   0x1   :  { %9 = vsyncpa [#allocation5], 0  ;;  %s1775_s12 = smov 0  }
   0x2 LB: > { %s1781_s13 = sadd.s32 4294967295, %s1743_s12   ;;  %p1230_p0 = scmp.ge.s32.totalorder %s1743_s12, 1  ;;  %s1743_s12 = sphi %s1775_s12, %s15_s12  }
   0x3   : > { %p114_p1 = scmp.lt.s32.totalorder %s1743_s12, 3  ;;  %s1749_s14 = smov [#allocation2]  }
   0x4   : > { %s126_s15 = sshll.u32 %s1749_s14, 4  ;;  %p1579_p3 = scmp.eq.s32.totalorder %s1781_s13, 0  ;;  %s127_s15 = int_to_ptr.vmem [resolvable:$true] %s126_s15 }
   0x5   : > { %p1785_p2 = pnand %p1230_p0, %p114_p1  ;;  %s1750_s17 = smov [#allocation4]  }
   0x6   : > { %s140_s18 = sshll.u32 %s1750_s17, 4  ;;  %s1684_s20 = scalar_lea.vmem %s127_s15, 8192  ;;  %s141_s18 = int_to_ptr.vmem [resolvable:$true] %s140_s18 }
   0x7   : > { %p1572_p4 = pneg %p1785_p2  ;;  %p1685_p7 = scmp.ne.s32.totalorder %s127_s15, %s1684_s20 }
   0x8   : > { %p1692_p10 = scmp.lt.s32.totalorder %s127_s15, %s127_s15  ;;  %p1693_p11 = scmp.lt.s32.totalorder %s1684_s20, %s1684_s20 }
   0x9   : > { %p1794_p5 = pnand %p1579_p3, %p1572_p4 }
   0xa   : > { %p1694_p12 = por %p1693_p11, %p1692_p10 }
   0xb   : > { %p1675_p6 = pneg %p1794_p5 }
   0xd   : > { %p1687_p8 = pnand %p1685_p7, %p1675_p6 }
   0xf   : > { %p1688_p9 = pneg %p1687_p8 }
  0x11   : > { %p1695_p13 = pnand %p1694_p12, %p1688_p9 }
  0x13   : > { %1698 = shalt.err (!%p1695_p13)
}
  0x14   : > { %s1751_s21 = smov 64   ;;  %s1752_s22 = smov 4  }
  0x15   : > { %1575 = dma.hbm_to_vmem [thread:$0]  (!%p1794_p5), %s1944_s1, 8192, %s127_s15, [#allocation3], %s1751_s21, %s1751_s21, %s1752_s22  }
  0x16   : > { %s1710_s25 = scalar_lea.vmem %s141_s18, 16  ;;  %s1717_s26 = scalar_lea.vmem %s141_s18, 32 }
  0x17   : > { %p1711_p0 = scmp.ne.s32.totalorder %s141_s18, %s1710_s25  ;;  %p1718_p7 = scmp.lt.s32.totalorder %s141_s18, %s141_s18 }
  0x18   : > { %p1719_p8 = scmp.lt.s32.totalorder %s1717_s26, %s1710_s25 }
  0x19   : > { %p1713_p1 = pnand %p1711_p0, %p1675_p6 }
  0x1a   : > { %p1720_p9 = por %p1719_p8, %p1718_p7 }
  0x1b   : > { %p1714_p4 = pneg %p1713_p1 }
  0x1d   : > { %p1721_p10 = pnand %p1720_p9, %p1714_p4 }
  0x1f   : > { %1724 = shalt.err (!%p1721_p10)
}
  0x20   : > { %1578 = dma.hbm_to_vmem [thread:$0]  (!%p1794_p5), %s1945_s2, 16, %s141_s18, [#allocation5]  }
  0x21   : > { %161 = sbr.rel (%p1785_p2) target bundleno = 381 (0x17d), region = 32 }
  0x26   : > { %1734 = dma.done.wait (%p1579_p3), [#allocation3], 8192  }
  0x27   : > { %1736 = vsyncadd (%p1579_p3), [#allocation3], 4294959104 }
  0x28   : > { %1738 = dma.done.wait (%p1579_p3), [#allocation5], 16  }
  0x29   : > { %1740 = vsyncadd (%p1579_p3), [#allocation5], 4294967280  ;;  %p189_p6 = scmp.lt.s32.totalorder %s1781_s13, 1  ;;  %s1838_s10 = smov 0  }
  0x2b   : > { %s1950_s13 = smov (!%p189_p6, %s1781_s13), 1 }
  0x2c   : > { %s1563_s29 = smul.u32 40, %s1950_s13  ;;  %s1326_s30 = sshll.u32 %s1950_s13, 3 }
  0x2d   : > { %s1831_s6 = scalar_lea.vmem %s1946_s3, %s1326_s30 }
  0x2e   : > { %s1836_s9 = scalar_lea.vmem %s1943_s0, %s1563_s29 }
  0x2f LB: >> { %v1605_v0 = vld [vmem:[#allocation2 + $0x78] sm:$0xff]   ;;  %v1753_v1 = vmov 0.0   ;;  %v1607_v3 = vld [vmem:[#allocation2 + $0x70] sm:$0xff]   ;;  %vm1754_vm0 = vmmov 0   ;;  %v1609_v5 = vld [vmem:[#allocation2 + $0x68] sm:$0xff]   ;;  %s1327_s11 = sshll.u32 %s1747_s10, 3  ;;  %s1747_s10 = sphi %s1838_s10, %s205_s10  }
  0x30   : >> { %1403 = vmatprep.subr.bf16.mxu0 %v1753_v1  ;;  %1423 = vmatprep.subr.bf16.mxu1 %v1753_v1  ;;  %v1606_v2 = vld [vmem:[#allocation2 + $0x38] sm:$0xff]   ;;  %v1608_v4 = vld [vmem:[#allocation2 + $0x30] sm:$0xff]   ;;  %v1610_v6 = vld [vmem:[#allocation2 + $0x28] sm:$0xff]   ;;  %s1857_s13 = scalar_lea.vmem %s1836_s9, %s1327_s11  ;;  %s1323_s14 = sshll.u32 %s1747_s10, 1 }
  0x31   : >> { %1404 = vmatpush3.bf16.msra.mxu0 %v1605_v0  ;;  %1419 = vmatprep.mubr.msk.bf16.mxu0 %vm1754_vm0, %v1753_v1  ;;  %v1611_v7 = vld [vmem:[#allocation2 + $0x60] sm:$0xff]   ;;  %v1613_v9 = vld [vmem:[#allocation2 + $0x58] sm:$0xff]   ;;  %v1615_v12 = vld [vmem:[#allocation2 + $0x50] sm:$0xff]   ;;  %s1128_s15 = scalar_lea.vmem %s1831_s6, %s1323_s14  ;;  %s205_s10 = sadd.s32 1, %s1747_s10  }
  0x32   : >> { %1424 = vmatpush3.bf16.msra.mxu1 %v1606_v2  ;;  %1405 = vmatprep.subr.bf16.mxu0 %v1753_v1  ;;  %v1612_v8 = vld [vmem:[#allocation2 + $0x20] sm:$0xff]   ;;  %v1614_v10 = vld [vmem:[#allocation2 + $0x18] sm:$0xff]   ;;  %v1616_v13 = vld [vmem:[#allocation2 + $0x10] sm:$0xff]   ;;  %p202_p2 = scmp.ge.s32.totalorder %s205_s10, 4  }
  0x33   : >> { %1425 = vmatprep.subr.bf16.mxu1 %v1753_v1  ;;  %1439 = vmatprep.mubr.msk.bf16.mxu1 %vm1754_vm0, %v1753_v1  ;;  %v1621_v11 = vld [vmem:[%s1857_s13] ss:$0 sps:$4 sm:$0x77]   ;;  %v1617_v15 = vld [vmem:[#allocation2 + $0x48] sm:$0xff]   ;;  %v1622_v22 = vld [vmem:[#allocation2 + $0xb8] sm:$0xff]  }
  0x34   : >> { %v250_v14 = vshll.u32 %v1621_v11, 16  ;;  %v1618_v16 = vld [vmem:[#allocation2 + $0x8] sm:$0xff]   ;;  %v248_v17 = vshrl.u32 %v1621_v11, 16  ;;  %v1619_v19 = vld [vmem:[#allocation2 + $0x40] sm:$0xff]   ;;  %v1623_v24 = vld [vmem:[#allocation2 + $0xf8] sm:$0xff]  }
  0x35   : >> { %1406 = vmatpush3.bf16.msra.mxu0 %v1607_v3  ;;  %v1620_v20 = vld [vmem:[#allocation2] sm:$0xff]   ;;  %v1624_v25 = vld [vmem:[#allocation2 + $0xb0] sm:$0xff]   ;;  %v1626_v27 = vld [vmem:[#allocation2 + $0xa8] sm:$0xff]  }
  0x36   : >> { %1426 = vmatpush3.bf16.msra.mxu1 %v1608_v4  ;;  %1407 = vmatprep.subr.bf16.mxu0 %v1753_v1  ;;  %v252_v18 = vrot.slane %v250_v14, 1  ;;  %v209_v23 = vld [vmem:[%s1857_s13] sm:$0x3]  ;;  %v1625_v26 = vld [vmem:[#allocation2 + $0xf0] sm:$0xff]   ;;  %v1627_v28 = vld [vmem:[#allocation2 + $0xe8] sm:$0xff]  }
  0x37   : >> { %1427 = vmatprep.subr.bf16.mxu1 %v1753_v1  ;;  %v1628_v29 = vld [vmem:[#allocation2 + $0xa0] sm:$0xff]   ;;  %v1630_v31 = vld [vmem:[#allocation2 + $0x98] sm:$0xff]   ;;  %v1632_v34 = vld [vmem:[#allocation2 + $0x90] sm:$0xff]  }
  0x38   : >> { %v253_v21 = vor.u32 %v252_v18, %v248_v17  ;;  %v1629_v30 = vld [vmem:[#allocation2 + $0xe0] sm:$0xff]   ;;  %v1631_v32 = vld [vmem:[#allocation2 + $0xd8] sm:$0xff]   ;;  %v1633_v35 = vld [vmem:[#allocation2 + $0xd0] sm:$0xff]  }
  0x39   : >> { %1408 = vmatpush3.bf16.msra.mxu0 %v1609_v5  ;;  %v1638_v33 = vld [vmem:[%s1857_s13 + $0x4] ss:$0 sps:$4 sm:$0x77]   ;;  %v1634_v36 = vld [vmem:[#allocation2 + $0x88] sm:$0xff]   ;;  %v1639_v45 = vld [vmem:[#allocation2 + $0x138] sm:$0xff]  }
  0x3a   : >> { %1428 = vmatpush3.bf16.msra.mxu1 %v1610_v6  ;;  %1409 = vmatprep.subr.bf16.mxu0 %v1753_v1  ;;  %v565_v37 = vshll.u32 %v1638_v33, 16  ;;  %v1635_v38 = vld [vmem:[#allocation2 + $0xc8] sm:$0xff]   ;;  %v1636_v39 = vld [vmem:[#allocation2 + $0x80] sm:$0xff]   ;;  %v563_v40 = vshrl.u32 %v1638_v33, 16  ;;  %v1640_v46 = vld [vmem:[#allocation2 + $0x178] sm:$0xff]  }
  0x3b   : >> { %1429 = vmatprep.subr.bf16.mxu1 %v1753_v1  ;;  %v1637_v42 = vld [vmem:[#allocation2 + $0xc0] sm:$0xff]   ;;  %v1641_v47 = vld [vmem:[#allocation2 + $0x130] sm:$0xff]   ;;  %v1643_v49 = vld [vmem:[#allocation2 + $0x128] sm:$0xff]  }
  0x3c   : >> { %v567_v41 = vrot.slane %v565_v37, 1  ;;  %v1261_v43 = vld [vmem:[%s1857_s13 + $0x4] sm:$0x3]  ;;  %v1642_v48 = vld [vmem:[#allocation2 + $0x170] sm:$0xff]   ;;  %v1644_v50 = vld [vmem:[#allocation2 + $0x168] sm:$0xff]  }
  0x3d   : >> { %1410 = vmatpush3.bf16.msra.mxu0 %v1611_v7  ;;  %v1645_v51 = vld [vmem:[#allocation2 + $0x120] sm:$0xff]   ;;  %v1647_v53 = vld [vmem:[#allocation2 + $0x118] sm:$0xff]   ;;  %v1649_v55 = vld [vmem:[#allocation2 + $0x110] sm:$0xff]  }
  0x3e   : >> { %1430 = vmatpush3.bf16.msra.mxu1 %v1612_v8  ;;  %1411 = vmatprep.subr.bf16.mxu0 %v1753_v1  ;;  %v568_v44 = vor.u32 %v567_v41, %v563_v40  ;;  %v1646_v52 = vld [vmem:[#allocation2 + $0x160] sm:$0xff]   ;;  %v1648_v54 = vld [vmem:[#allocation2 + $0x158] sm:$0xff]   ;;  %v1655_v56 = vld [vmem:[%s1857_s13 + $0x8] ss:$0 sps:$4 sm:$0x77]  }
  0x3f   : >> { %1431 = vmatprep.subr.bf16.mxu1 %v1753_v1  ;;  %v1650_v57 = vld [vmem:[#allocation2 + $0x150] sm:$0xff]   ;;  %v1651_v58 = vld [vmem:[#allocation2 + $0x108] sm:$0xff]   ;;  %v793_v59 = vshll.u32 %v1655_v56, 16  ;;  %v1653_v61 = vld [vmem:[#allocation2 + $0x100] sm:$0xff]   ;;  %v791_v62 = vshrl.u32 %v1655_v56, 16 }
  0x40   : >> { %v1652_v60 = vld [vmem:[#allocation2 + $0x148] sm:$0xff]   ;;  %v1654_v0 = vld [vmem:[#allocation2 + $0x140] sm:$0xff]   ;;  %v1656_v4 = vld [vmem:[#allocation2 + $0x1b8] sm:$0xff]  }
  0x41   : >> { %1412 = vmatpush3.bf16.msra.mxu0 %v1613_v9  ;;  %v795_v63 = vrot.slane %v793_v59, 1  ;;  %v1282_v2 = vld [vmem:[%s1857_s13 + $0x8] sm:$0x3]  ;;  %v1657_v5 = vld [vmem:[#allocation2 + $0x1f8] sm:$0xff]   ;;  %v1658_v6 = vld [vmem:[#allocation2 + $0x1b0] sm:$0xff]  }
  0x42   : >> { %1432 = vmatpush3.bf16.msra.mxu1 %v1614_v10  ;;  %1413 = vmatprep.subr.bf16.mxu0 %v1753_v1  ;;  %v1659_v7 = vld [vmem:[#allocation2 + $0x1f0] sm:$0xff]   ;;  %v1660_v8 = vld [vmem:[#allocation2 + $0x1a8] sm:$0xff]   ;;  %v1662_v10 = vld [vmem:[#allocation2 + $0x1a0] sm:$0xff]  }
  0x43   : >> { %1433 = vmatprep.subr.bf16.mxu1 %v1753_v1  ;;  %v796_v3 = vor.u32 %v795_v63, %v791_v62  ;;  %v1661_v9 = vld [vmem:[#allocation2 + $0x1e8] sm:$0xff]   ;;  %v1663_v11 = vld [vmem:[#allocation2 + $0x1e0] sm:$0xff]   ;;  %v1666_v14 = vld [vmem:[#allocation2 + $0x190] sm:$0xff]  }
  0x44   : >> { %v1668_v17 = vld [vmem:[#allocation2 + $0x188] sm:$0xff]  }
  0x45   : >> { %1414 = vmatpush3.bf16.msra.mxu0 %v1615_v12  ;;  %v1664_v12 = vld [vmem:[#allocation2 + $0x198] sm:$0xff]  }
  0x46   : >> { %1434 = vmatpush3.bf16.msra.mxu1 %v1616_v13  ;;  %1415 = vmatprep.subr.bf16.mxu0 %v1753_v1  ;;  %v1665_v13 = vld [vmem:[#allocation2 + $0x1d8] sm:$0xff]  }
  0x47   : >> { %1435 = vmatprep.subr.bf16.mxu1 %v1753_v1 }
  0x49   : >> { %1416 = vmatpush3.bf16.msra.mxu0 %v1617_v15  ;;  %v1672_v15 = vld [vmem:[%s1857_s13 + $0xc] ss:$0 sps:$4 sm:$0x77]  }
  0x4a   : >> { %1436 = vmatpush3.bf16.msra.mxu1 %v1618_v16  ;;  %1417 = vmatprep.subr.bf16.mxu0 %v1753_v1  ;;  %v1667_v16 = vld [vmem:[#allocation2 + $0x1d0] sm:$0xff]   ;;  %v1021_v18 = vshll.u32 %v1672_v15, 16 }
  0x4b   : >> { %1437 = vmatprep.subr.bf16.mxu1 %v1753_v1 }
  0x4d   : >> { %1418 = vmatpush3.bf16.msra.mxu0 %v1619_v19  ;;  %v1669_v19 = vld [vmem:[#allocation2 + $0x1c8] sm:$0xff]  }
  0x4e   : >> { %1438 = vmatpush3.bf16.msra.mxu1 %v1620_v20  ;;  %1443 = vmatprep.subr.bf16.mxu0 %v1753_v1  ;;  %v1670_v20 = vld [vmem:[#allocation2 + $0x180] sm:$0xff]  }
  0x4f   : >> { %1463 = vmatprep.subr.bf16.mxu1 %v1753_v1 }
  0x50   : >> { %1420 = vmatmul.mubr.bf16.vlgmr.msra.gmra.mxu0 %v253_v21  ;;  %v1019_v21 = vshrl.u32 %v1672_v15, 16 }
  0x51   : >> { %1440 = vmatmul.mubr.bf16.vlgmr.msra.gmra.mxu1 %v209_v23  ;;  %1444 = vmatpush3.bf16.msra.mxu0 %v1622_v22  ;;  %v1023_v22 = vrot.slane %v1021_v18, 1  ;;  %v1671_v23 = vld [vmem:[#allocation2 + $0x1c0] sm:$0xff]  }
  0x52   : >> { %1464 = vmatpush3.bf16.msra.mxu1 %v1623_v24  ;;  %1445 = vmatprep.subr.bf16.mxu0 %v1753_v1  ;;  %v1303_v24 = vld [vmem:[%s1857_s13 + $0xc] sm:$0x3] }
  0x53   : >> { %1465 = vmatprep.subr.bf16.mxu1 %v1753_v1  ;;  %1459 = vmatprep.mubr.msk.bf16.mxu0 %vm1754_vm0, %v1753_v1 }
  0x54   : >> { %1479 = vmatprep.mubr.msk.bf16.mxu1 %vm1754_vm0, %v1753_v1 }
  0x55   : >> { %1446 = vmatpush3.bf16.msra.mxu0 %v1624_v25  ;;  %v1024_v25 = vor.u32 %v1023_v22, %v1019_v21 }
  0x56   : >> { %1466 = vmatpush3.bf16.msra.mxu1 %v1625_v26  ;;  %1447 = vmatprep.subr.bf16.mxu0 %v1753_v1 }
  0x57   : >> { %1467 = vmatprep.subr.bf16.mxu1 %v1753_v1 }
  0x59   : >> { %1448 = vmatpush3.bf16.msra.mxu0 %v1626_v27 }
  0x5a   : >> { %1468 = vmatpush3.bf16.msra.mxu1 %v1627_v28  ;;  %1449 = vmatprep.subr.bf16.mxu0 %v1753_v1 }
  0x5b   : >> { %1469 = vmatprep.subr.bf16.mxu1 %v1753_v1 }
  0x5d   : >> { %1450 = vmatpush3.bf16.msra.mxu0 %v1628_v29 }
  0x5e   : >> { %1470 = vmatpush3.bf16.msra.mxu1 %v1629_v30  ;;  %1451 = vmatprep.subr.bf16.mxu0 %v1753_v1 }
  0x5f   : >> { %1471 = vmatprep.subr.bf16.mxu1 %v1753_v1 }
  0x61   : >> { %1452 = vmatpush3.bf16.msra.mxu0 %v1630_v31 }
  0x62   : >> { %1472 = vmatpush3.bf16.msra.mxu1 %v1631_v32  ;;  %1453 = vmatprep.subr.bf16.mxu0 %v1753_v1 }
  0x63   : >> { %1473 = vmatprep.subr.bf16.mxu1 %v1753_v1 }
  0x65   : >> { %1454 = vmatpush3.bf16.msra.mxu0 %v1632_v34 }
  0x66   : >> { %1474 = vmatpush3.bf16.msra.mxu1 %v1633_v35  ;;  %1455 = vmatprep.subr.bf16.mxu0 %v1753_v1 }
  0x67   : >> { %1475 = vmatprep.subr.bf16.mxu1 %v1753_v1 }
  0x69   : >> { %1456 = vmatpush3.bf16.msra.mxu0 %v1634_v36 }
  0x6a   : >> { %1476 = vmatpush3.bf16.msra.mxu1 %v1635_v38  ;;  %1457 = vmatprep.subr.bf16.mxu0 %v1753_v1 }
  0x6b   : >> { %1477 = vmatprep.subr.bf16.mxu1 %v1753_v1 }
  0x6d   : >> { %1458 = vmatpush3.bf16.msra.mxu0 %v1636_v39 }
  0x6e   : >> { %1478 = vmatpush3.bf16.msra.mxu1 %v1637_v42  ;;  %1483 = vmatprep.subr.bf16.mxu0 %v1753_v1 }
  0x6f   : >> { %1503 = vmatprep.subr.bf16.mxu1 %v1753_v1 }
  0x70   : >> { %1460 = vmatmul.mubr.bf16.vlgmr.msra.gmra.mxu0 %v1261_v43 }
  0x71   : >> { %1480 = vmatmul.mubr.bf16.vlgmr.msra.gmra.mxu1 %v568_v44  ;;  %1484 = vmatpush3.bf16.msra.mxu0 %v1639_v45 }
  0x72   : >> { %1504 = vmatpush3.bf16.msra.mxu1 %v1640_v46  ;;  %1485 = vmatprep.subr.bf16.mxu0 %v1753_v1 }
  0x73   : >> { %1505 = vmatprep.subr.bf16.mxu1 %v1753_v1  ;;  %1499 = vmatprep.mubr.msk.bf16.mxu0 %vm1754_vm0, %v1753_v1 }
  0x74   : >> { %1519 = vmatprep.mubr.msk.bf16.mxu1 %vm1754_vm0, %v1753_v1 }
  0x75   : >> { %1486 = vmatpush3.bf16.msra.mxu0 %v1641_v47 }
  0x76   : >> { %1506 = vmatpush3.bf16.msra.mxu1 %v1642_v48  ;;  %1487 = vmatprep.subr.bf16.mxu0 %v1753_v1 }
  0x77   : >> { %1507 = vmatprep.subr.bf16.mxu1 %v1753_v1 }
  0x79   : >> { %1488 = vmatpush3.bf16.msra.mxu0 %v1643_v49 }
  0x7a   : >> { %1508 = vmatpush3.bf16.msra.mxu1 %v1644_v50  ;;  %1489 = vmatprep.subr.bf16.mxu0 %v1753_v1 }
  0x7b   : >> { %1509 = vmatprep.subr.bf16.mxu1 %v1753_v1 }
  0x7d   : >> { %1490 = vmatpush3.bf16.msra.mxu0 %v1645_v51 }
  0x7e   : >> { %1510 = vmatpush3.bf16.msra.mxu1 %v1646_v52  ;;  %1491 = vmatprep.subr.bf16.mxu0 %v1753_v1 }
  0x7f   : >> { %1511 = vmatprep.subr.bf16.mxu1 %v1753_v1 }
  0x81   : >> { %1492 = vmatpush3.bf16.msra.mxu0 %v1647_v53 }
  0x82   : >> { %1512 = vmatpush3.bf16.msra.mxu1 %v1648_v54  ;;  %1493 = vmatprep.subr.bf16.mxu0 %v1753_v1 }
  0x83   : >> { %1513 = vmatprep.subr.bf16.mxu1 %v1753_v1 }
  0x85   : >> { %1494 = vmatpush3.bf16.msra.mxu0 %v1649_v55 }
  0x86   : >> { %1514 = vmatpush3.bf16.msra.mxu1 %v1650_v57  ;;  %1495 = vmatprep.subr.bf16.mxu0 %v1753_v1  ;;  %v1322_v57 = vld [vmem:[#allocation4] ss:$0 sm:$0xff] }
  0x87   : >> { %1515 = vmatprep.subr.bf16.mxu1 %v1753_v1 }
  0x89   : >> { %1496 = vmatpush3.bf16.msra.mxu0 %v1651_v58 }
  0x8a   : >> { %1516 = vmatpush3.bf16.msra.mxu1 %v1652_v60  ;;  %1497 = vmatprep.subr.bf16.mxu0 %v1753_v1 }
  0x8b   : >> { %1517 = vmatprep.subr.bf16.mxu1 %v1753_v1 }
  0x8d   : >> { %1498 = vmatpush3.bf16.msra.mxu0 %v1653_v61 }
  0x8e   : >> { %1518 = vmatpush3.bf16.msra.mxu1 %v1654_v0  ;;  %1523 = vmatprep.subr.bf16.mxu0 %v1753_v1 }
  0x8f   : >> { %1543 = vmatprep.subr.bf16.mxu1 %v1753_v1 }
  0x90   : >> { %1500 = vmatmul.mubr.bf16.vlgmr.msra.gmra.mxu0 %v1282_v2 }
  0x91   : >> { %1520 = vmatmul.mubr.bf16.vlgmr.msra.gmra.mxu1 %v796_v3  ;;  %1524 = vmatpush3.bf16.msra.mxu0 %v1656_v4 }
  0x92   : >> { %1544 = vmatpush3.bf16.msra.mxu1 %v1657_v5  ;;  %1525 = vmatprep.subr.bf16.mxu0 %v1753_v1 }
  0x93   : >> { %1545 = vmatprep.subr.bf16.mxu1 %v1753_v1  ;;  %1539 = vmatprep.mubr.msk.bf16.mxu0 %vm1754_vm0, %v1753_v1 }
  0x94   : >> { %1559 = vmatprep.mubr.msk.bf16.mxu1 %vm1754_vm0, %v1753_v1 }
  0x95   : >> { %1526 = vmatpush3.bf16.msra.mxu0 %v1658_v6 }
  0x96   : >> { %1546 = vmatpush3.bf16.msra.mxu1 %v1659_v7  ;;  %1527 = vmatprep.subr.bf16.mxu0 %v1753_v1 }
  0x97   : >> { %1547 = vmatprep.subr.bf16.mxu1 %v1753_v1 }
  0x99   : >> { %1528 = vmatpush3.bf16.msra.mxu0 %v1660_v8 }
  0x9a   : >> { %1548 = vmatpush3.bf16.msra.mxu1 %v1661_v9  ;;  %1529 = vmatprep.subr.bf16.mxu0 %v1753_v1 }
  0x9b   : >> { %1549 = vmatprep.subr.bf16.mxu1 %v1753_v1 }
  0x9d   : >> { %1530 = vmatpush3.bf16.msra.mxu0 %v1662_v10 }
  0x9e   : >> { %1550 = vmatpush3.bf16.msra.mxu1 %v1663_v11  ;;  %1531 = vmatprep.subr.bf16.mxu0 %v1753_v1 }
  0x9f   : >> { %1551 = vmatprep.subr.bf16.mxu1 %v1753_v1 }
  0xa1   : >> { %1532 = vmatpush3.bf16.msra.mxu0 %v1664_v12 }
  0xa2   : >> { %1552 = vmatpush3.bf16.msra.mxu1 %v1665_v13  ;;  %1533 = vmatprep.subr.bf16.mxu0 %v1753_v1 }
  0xa3   : >> { %1553 = vmatprep.subr.bf16.mxu1 %v1753_v1 }
  0xa5   : >> { %1534 = vmatpush3.bf16.msra.mxu0 %v1666_v14 }
  0xa6   : >> { %1554 = vmatpush3.bf16.msra.mxu1 %v1667_v16  ;;  %1535 = vmatprep.subr.bf16.mxu0 %v1753_v1 }
  0xa7   : >> { %1555 = vmatprep.subr.bf16.mxu1 %v1753_v1 }
  0xa9   : >> { %1536 = vmatpush3.bf16.msra.mxu0 %v1668_v17 }
  0xaa   : >> { %1556 = vmatpush3.bf16.msra.mxu1 %v1669_v19  ;;  %1537 = vmatprep.subr.bf16.mxu0 %v1753_v1 }
  0xab   : >> { %1557 = vmatprep.subr.bf16.mxu1 %v1753_v1 }
  0xad   : >> { %1538 = vmatpush3.bf16.msra.mxu0 %v1670_v20 }
  0xae   : >> { %1558 = vmatpush3.bf16.msra.mxu1 %v1671_v23 }
  0xb0   : >> { %1540 = vmatmul.mubr.bf16.vlgmr.msra.gmra.mxu0 %v1303_v24 }
  0xb1   : >> { %1560 = vmatmul.mubr.bf16.vlgmr.msra.gmra.mxu1 %v1024_v25 }
 0x110   : >> { %v337_v26 = vpop.f32.mrf.mxu0 }
 0x111   : >> { %v425_v27 = vpop.f32.mrf.mxu1 }
 0x112   : >> { %v426_v28 = vadd.f32 %v425_v27, %v337_v26  ;;  %v1421_v29 = vpop.f32.mrf.mxu0 }
 0x113   : >> { %v1441_v30 = vpop.f32.mrf.mxu1 }
 0x114   : >> { %v340_v31 = vpop.f32.mrf.mxu0 }
 0x115   : >> { %v428_v32 = vpop.f32.mrf.mxu1 }
 0x116   : >> { %v1422_v33 = vpop.f32.mrf.mxu0 }
 0x117   : >> { %v1442_v34 = vpop.f32.mrf.mxu1 }
 0x130   : >> { %v534_v35 = vpop.f32.mrf.mxu0 }
 0x131   : >> { %v652_v36 = vpop.f32.mrf.mxu1  ;;  %v540_v50 = vadd.f32 %v534_v35, %v426_v28 }
 0x132   : >> { %v1461_v37 = vpop.f32.mrf.mxu0 }
 0x133   : >> { %v1481_v38 = vpop.f32.mrf.mxu1  ;;  %v658_v51 = vadd.f32 %v652_v36, %v540_v50 }
 0x134   : >> { %v537_v1 = vpop.f32.mrf.mxu0 }
 0x135   : >> { %v655_v39 = vpop.f32.mrf.mxu1 }
 0x136   : >> { %v1462_v40 = vpop.f32.mrf.mxu0 }
 0x137   : >> { %v1482_v41 = vpop.f32.mrf.mxu1 }
 0x150   : >> { %v762_v42 = vpop.f32.mrf.mxu0 }
 0x151   : >> { %v880_v43 = vpop.f32.mrf.mxu1  ;;  %v768_v52 = vadd.f32 %v762_v42, %v658_v51 }
 0x152   : >> { %v1501_v44 = vpop.f32.mrf.mxu0 }
 0x153   : >> { %v1521_v45 = vpop.f32.mrf.mxu1  ;;  %v886_v53 = vadd.f32 %v880_v43, %v768_v52 }
 0x154   : >> { %v765_v46 = vpop.f32.mrf.mxu0 }
 0x155   : >> { %v883_v47 = vpop.f32.mrf.mxu1 }
 0x156   : >> { %v1502_v48 = vpop.f32.mrf.mxu0 }
 0x157   : >> { %v1522_v49 = vpop.f32.mrf.mxu1 }
 0x170   : >> { %v990_v54 = vpop.f32.mrf.mxu0 }
 0x171   : >> { %v996_v55 = vadd.f32 %v990_v54, %v886_v53  ;;  %v1108_v56 = vpop.f32.mrf.mxu1 }
 0x172   : >> { %v1541_v58 = vpop.f32.mrf.mxu0 }
 0x173   : >> { %v1114_v59 = vadd.f32 %v1108_v56, %v996_v55  ;;  %v1561_v60 = vpop.f32.mrf.mxu1 }
 0x174   : >> { %v993_v61 = vpop.f32.mrf.mxu0 }
 0x175   : >> { %v1122_v62 = vadd.f32 %v1322_v57, %v1114_v59  ;;  %v1111_v63 = vpop.f32.mrf.mxu1 }
 0x176   : >> { %v1542_v0 = vpop.f32.mrf.mxu0 }
 0x177   : >> { %vm1123_vm1 = vcmp.ge.f32.partialorder %v1122_v62, 0.0  ;;  %v1124_v2 = vmul.f32 0.2, %v1122_v62  ;;  %v1562_v3 = vpop.f32.mrf.mxu1 }
 0x178   : > { %204 = sbr.rel (!%p202_p2) target bundleno = 47 (0x2f), region = 90 }
 0x179   : >> { %v1125_v4 = vsel %vm1123_vm1, %v1122_v62, %v1124_v2 }
 0x17a   : >> { %v1126_v5 = vpack.c.bf16 %v1125_v4, %v1125_v4 }
 0x17c   : >> { %1129 = vst [vmem:[%s1128_s15] sm:$0x3] %v1126_v5 }
 0x17d PF: > { %s15_s12 = sadd.s32 1, %s1743_s12  }
 0x17e   : > { %p12_p3 = scmp.ge.s32.totalorder %s15_s12, 4  }
 0x180   :  { %14 = sbr.rel (!%p12_p3) target bundleno = 2 (0x2), region = 101 }
 0x185   :  { %1151 = vsyncpa [#allocation3], 1 }
 0x186   :  { %1153 = vsyncpa [#allocation3 + $0x1], 1 }
 0x187   :  { %1154 = vsyncpa [#allocation5], 1 }

// kernel: _lambda_.7
= control target key start
LH: loop header
LB: loop body
LE: loop exit
PB: predicated region body
PF: predicated region fallthrough
CT: control target
= control target key end

     0   :  { %s825_s14 = smov 0   ;;  %s1002_s0 = inlined_call_operand.vmem [shape: bf16[2,4,4,256], index: 0, kind: input, shape index: {}]   ;;  %s1003_s1 = inlined_call_operand.vmem [shape: f32[4,4,1,256], index: 1, kind: input, shape index: {}]   ;;  %s1004_s2 = inlined_call_operand.<no memory space> [shape: f32[1,1], index: 2, kind: input, shape index: {}]   ;;  %s1005_s3 = inlined_call_operand.vmem [shape: f32[2,1,1,1], index: 3, kind: output, shape index: {}]  }
   0x1   :  { %v8_v0 = vstv %s1004_s2 }
   0x2   :  { %9 = vst [vmem:[#allocation2] sm:$0x1] %v8_v0 }
   0x3 LB: > { %s748_s15 = sadd.s32 4294967295, %s799_s14   ;;  %p752_p0 = scmp.ge.s32.totalorder %s799_s14, 1  ;;  %s799_s14 = sphi %s825_s14, %s15_s14  }
   0x4   : > { %p139_p1 = scmp.lt.s32.totalorder %s799_s14, 3 }
   0x6   : > { %p140_p2 = pnand %p752_p0, %p139_p1 }
   0x7   : > { %p161_p3 = scmp.lt.s32.totalorder (!%p140_p2), %s748_s15, 1 }
   0x8   : > { %143 = sbr.rel (%p140_p2) target bundleno = 236 (0xec), region = 32 }
   0xd   : > { %v176_v1 = vlaneseq  ;;  %v801_v2 = vmov 286326784   ;;  %s1007_s15 = smov (!%p161_p3, %s748_s15), 1  ;;  %v755_v5 = vld [vmem:[%s1003_s1 + $0x2] sm:$0x3]  ;;  %vm223_vm0 = vcmask 1041409   ;;  %vm258_vm1 = vcmask 1042434  }
   0xe   : > { %v174_v3 = vunpack.c.l.s4 %v801_v2  ;;  %v756_v6 = vld [vmem:[%s1003_s1 + $0x4] sm:$0x3]  ;;  %v171_v8 = vld [vmem:[%s1003_s1] sm:$0x3]  ;;  %vm193_vm2 = vcmask 1040384   ;;  %s779_s23 = sshll.u32 %s1007_s15, 4  ;;  %s168_s27 = scalar_lea.vmem %s1005_s3, %s1007_s15 }
   0xf   : > { %v177_v4 = vshrl.u32 %v176_v1, 7  ;;  %v757_v9 = vld [vmem:[%s1003_s1 + $0x6] sm:$0x3]  ;;  %vm291_vm3 = vcmask 1043459   ;;  %v759_v13 = vld [vmem:[%s1003_s1 + $0x8] sm:$0x3]  ;;  %s860_s28 = scalar_lea.vmem %s1002_s0, %s779_s23 }
  0x10   : > { %v175_v7 = vunpack.c.0.s8 %v174_v3  ;;  %v760_v18 = vld [vmem:[%s1003_s1 + $0xa] sm:$0x3]  ;;  %v169_v19 = vld [vmem:[%s860_s28] sm:$0x5]  ;;  %v233_v20 = vld [vmem:[%s860_s28] sm:$0xa] }
  0x11   : > { %v848_v10 = vsub.s32 1, %v177_v4  ;;  %v850_v11 = vsub.s32 5, %v177_v4  ;;  %v852_v12 = vsub.s32 2, %v177_v4  ;;  %v864_v15 = vsub.s32 6, %v177_v4  ;;  %v758_v27 = vld [vmem:[%s860_s28 + $0x4] sm:$0x5] }
  0x12   : > { %v862_v14 = vsub.s32 %v175_v7, %v177_v4  ;;  %v866_v16 = vsub.s32 0, %v177_v4  ;;  %v868_v17 = vsub.s32 4, %v177_v4  ;;  %v875_v21 = vsub.s32 3, %v177_v4  ;;  %v761_v28 = vld [vmem:[%s860_s28 + $0x4] sm:$0xa] }
  0x13   : > { %v877_v22 = vsub.s32 7, %v177_v4  ;;  %v170_v23 = vunpack.c.l.bf16 %v169_v19  ;;  %v234_v25 = vunpack.c.l.bf16 %v233_v20  ;;  %v762_v29 = vld [vmem:[%s1003_s1 + $0xc] sm:$0x3]  ;;  %v303_v32 = vunpack.c.l.bf16 %v758_v27  ;;  %v764_v54 = vld [vmem:[%s860_s28 + $0x8] sm:$0x5] }
  0x14   : > { %v209_v24 = vrot.slane %v755_v5, %v862_v14  ;;  %v244_v26 = vrot.slane %v756_v6, %v862_v14  ;;  %v179_v30 = vrot.slane %v171_v8, %v862_v14  ;;  %v277_v31 = vrot.slane %v757_v9, %v862_v14  ;;  %v763_v59 = vld [vmem:[%s1003_s1 + $0xe] sm:$0x3]  ;;  %v765_v60 = vld [vmem:[%s1003_s1 + $0x10] sm:$0x3]  ;;  %v766_v1 = vld [vmem:[%s1003_s1 + $0x12] sm:$0x3] }
  0x15   : > { %v313_v33 = vrot.slane %v759_v13, %v862_v14  ;;  %v342_v36 = vrot.slane %v760_v18, %v862_v14  ;;  %v366_v37 = vunpack.c.l.bf16 %v761_v28  ;;  %v376_v41 = vrot.slane %v762_v29, %v862_v14 }
  0x16   : > { %v211_v34 = vmul.f32 %v209_v24, %v170_v23  ;;  %v246_v35 = vmul.f32 %v244_v26, %v234_v25  ;;  %v181_v38 = vmul.f32 %v179_v30, %v170_v23  ;;  %v279_v39 = vmul.f32 %v277_v31, %v234_v25  ;;  %v767_v31 = vld [vmem:[%s860_s28 + $0x8] sm:$0xa] }
  0x17   : > { %v315_v40 = vmul.f32 %v313_v33, %v303_v32  ;;  %v344_v4 = vmul.f32 %v342_v36, %v303_v32  ;;  %v433_v5 = vunpack.c.l.bf16 %v764_v54  ;;  %v378_v7 = vmul.f32 %v376_v41, %v366_v37  ;;  %v768_v36 = vld [vmem:[%s1003_s1 + $0x14] sm:$0x3]  ;;  %v769_v41 = vld [vmem:[%s1003_s1 + $0x16] sm:$0x3]  ;;  %v774_v54 = vld [vmem:[%s1003_s1 + $0x1c] sm:$0x3] }
  0x18   : > { %v216_v42 = vrot.slane %v211_v34, %v848_v10  ;;  %v220_v43 = vrot.slane %v211_v34, %v850_v11  ;;  %v251_v44 = vrot.slane %v246_v35, %v852_v12  ;;  %v255_v45 = vrot.slane %v246_v35, %v864_v15 }
  0x19   : > { %v186_v46 = vrot.slane %v181_v38, %v866_v16  ;;  %v190_v47 = vrot.slane %v181_v38, %v868_v17  ;;  %v284_v48 = vrot.slane %v279_v39, %v875_v21  ;;  %v288_v49 = vrot.slane %v279_v39, %v877_v22 }
  0x1a   : > { %v224_v50 = vsel %vm223_vm0, %v216_v42, 0.0  ;;  %v225_v51 = vsel %vm223_vm0, %v220_v43, 0.0  ;;  %v259_v52 = vsel %vm258_vm1, %v251_v44, 0.0  ;;  %v260_v53 = vsel %vm258_vm1, %v255_v45, 0.0  ;;  %v770_v42 = vld [vmem:[%s860_s28 + $0xc] sm:$0x5] }
  0x1b   : > { %v226_v55 = vadd.f32 %v225_v51, %v224_v50  ;;  %v261_v56 = vadd.f32 %v260_v53, %v259_v52  ;;  %v194_v57 = vsel %vm193_vm2, %v186_v46, 0.0  ;;  %v195_v58 = vsel %vm193_vm2, %v190_v47, 0.0  ;;  %v771_v43 = vld [vmem:[%s1003_s1 + $0x18] sm:$0x3] }
  0x1c   : > { %v196_v61 = vadd.f32 %v195_v58, %v194_v57  ;;  %v292_v62 = vsel %vm291_vm3, %v284_v48, 0.0  ;;  %v293_v63 = vsel %vm291_vm3, %v288_v49, 0.0  ;;  %v320_v0 = vrot.slane %v315_v40, %v866_v16  ;;  %v772_v48 = vld [vmem:[%s1003_s1 + $0x1a] sm:$0x3]  ;;  %v773_v49 = vld [vmem:[%s860_s28 + $0xc] sm:$0xa] }
  0x1d   : > { %227 = vadd.xlane.f32.xlu0 %v226_v55  ;;  %262 = vadd.xlane.f32.xlu1 %v261_v56  ;;  %v294_v2 = vadd.f32 %v293_v63, %v292_v62  ;;  %v324_v3 = vrot.slane %v315_v40, %v868_v17  ;;  %v408_v8 = vrot.slane %v763_v59, %v862_v14  ;;  %v496_v47 = vunpack.c.l.bf16 %v767_v31  ;;  %v775_v63 = vld [vmem:[%s1003_s1 + $0x1e] sm:$0x3] }
  0x1e   : > { %v327_v6 = vsel %vm193_vm2, %v320_v0, 0.0  ;;  %v443_v9 = vrot.slane %v765_v60, %v862_v14  ;;  %v349_v18 = vrot.slane %v344_v4, %v848_v10  ;;  %v353_v19 = vrot.slane %v344_v4, %v850_v11 }
  0x1f   : > { %v328_v13 = vsel %vm193_vm2, %v324_v3, 0.0  ;;  %v472_v20 = vrot.slane %v766_v1, %v862_v14  ;;  %v383_v24 = vrot.slane %v378_v7, %v852_v12  ;;  %v387_v25 = vrot.slane %v378_v7, %v864_v15 }
  0x20   : > { %v329_v23 = vadd.f32 %v328_v13, %v327_v6  ;;  %v410_v26 = vmul.f32 %v408_v8, %v366_v37  ;;  %v356_v27 = vsel %vm223_vm0, %v349_v18, 0.0  ;;  %v357_v28 = vsel %vm223_vm0, %v353_v19, 0.0 }
  0x21   : > { %197 = vadd.xlane.f32.xlu0 %v196_v61  ;;  %295 = vadd.xlane.f32.xlu1 %v294_v2  ;;  %v445_v29 = vmul.f32 %v443_v9, %v433_v5  ;;  %v474_v30 = vmul.f32 %v472_v20, %v433_v5  ;;  %v358_v32 = vadd.f32 %v357_v28, %v356_v27  ;;  %v390_v33 = vsel %vm258_vm1, %v383_v24, 0.0 }
  0x22   : > { %v391_v34 = vsel %vm258_vm1, %v387_v25, 0.0  ;;  %v415_v35 = vrot.slane %v410_v26, %v875_v21  ;;  %v419_v38 = vrot.slane %v410_v26, %v877_v22  ;;  %v506_v53 = vrot.slane %v768_v36, %v862_v14 }
  0x23   : > { %v392_v37 = vadd.f32 %v391_v34, %v390_v33  ;;  %v450_v39 = vrot.slane %v445_v29, %v866_v16  ;;  %v454_v40 = vrot.slane %v445_v29, %v868_v17  ;;  %v479_v45 = vrot.slane %v474_v30, %v848_v10 }
  0x24   : > { %v422_v44 = vsel %vm291_vm3, %v415_v35, 0.0  ;;  %v483_v46 = vrot.slane %v474_v30, %v850_v11  ;;  %v423_v50 = vsel %vm291_vm3, %v419_v38, 0.0  ;;  %v508_v60 = vmul.f32 %v506_v53, %v496_v47 }
  0x25   : > { %330 = vadd.xlane.f32.xlu0 %v329_v23  ;;  %359 = vadd.xlane.f32.xlu1 %v358_v32  ;;  %v457_v51 = vsel %vm193_vm2, %v450_v39, 0.0  ;;  %v458_v52 = vsel %vm193_vm2, %v454_v40, 0.0  ;;  %v424_v55 = vadd.f32 %v423_v50, %v422_v44  ;;  %v486_v57 = vsel %vm223_vm0, %v479_v45, 0.0 }
  0x26   : > { %v459_v56 = vadd.f32 %v458_v52, %v457_v51  ;;  %v487_v58 = vsel %vm223_vm0, %v483_v46, 0.0  ;;  %v538_v61 = vrot.slane %v769_v41, %v862_v14  ;;  %v563_v62 = vunpack.c.l.bf16 %v770_v42 }
  0x27   : > { %v488_v59 = vadd.f32 %v487_v58, %v486_v57  ;;  %v573_v0 = vrot.slane %v771_v43, %v862_v14  ;;  %v602_v1 = vrot.slane %v772_v48, %v862_v14  ;;  %v626_v2 = vunpack.c.l.bf16 %v773_v49 }
  0x28   : > { %v636_v3 = vrot.slane %v774_v54, %v862_v14  ;;  %v513_v4 = vrot.slane %v508_v60, %v852_v12  ;;  %v517_v5 = vrot.slane %v508_v60, %v864_v15  ;;  %v540_v6 = vmul.f32 %v538_v61, %v496_v47 }
  0x29   : > { %393 = vadd.xlane.f32.xlu0 %v392_v37  ;;  %425 = vadd.xlane.f32.xlu1 %v424_v55  ;;  %v575_v7 = vmul.f32 %v573_v0, %v563_v62  ;;  %v604_v8 = vmul.f32 %v602_v1, %v563_v62  ;;  %v668_v13 = vrot.slane %v775_v63, %v862_v14  ;;  %vm699_vm4 = vcmask 0  }
  0x2a   : > { %v638_v9 = vmul.f32 %v636_v3, %v626_v2  ;;  %v520_v18 = vsel %vm258_vm1, %v513_v4, 0.0  ;;  %v521_v19 = vsel %vm258_vm1, %v517_v5, 0.0  ;;  %v545_v20 = vrot.slane %v540_v6, %v875_v21 }
  0x2b   : > { %v549_v23 = vrot.slane %v540_v6, %v877_v22  ;;  %v522_v24 = vadd.f32 %v521_v19, %v520_v18  ;;  %v580_v25 = vrot.slane %v575_v7, %v866_v16  ;;  %v584_v26 = vrot.slane %v575_v7, %v868_v17 }
  0x2c   : > { %v609_v27 = vrot.slane %v604_v8, %v848_v10  ;;  %v552_v28 = vsel %vm291_vm3, %v545_v20, 0.0  ;;  %v613_v29 = vrot.slane %v604_v8, %v850_v11  ;;  %v643_v30 = vrot.slane %v638_v9, %v852_v12 }
  0x2d   : > { %460 = vadd.xlane.f32.xlu0 %v459_v56  ;;  %489 = vadd.xlane.f32.xlu1 %v488_v59  ;;  %v553_v14 = vsel %vm291_vm3, %v549_v23, 0.0  ;;  %v587_v32 = vsel %vm193_vm2, %v580_v25, 0.0  ;;  %v588_v33 = vsel %vm193_vm2, %v584_v26, 0.0  ;;  %v647_v10 = vrot.slane %v638_v9, %v864_v15 }
  0x2e   : > { %v554_v31 = vadd.f32 %v553_v14, %v552_v28  ;;  %v616_v16 = vsel %vm223_vm0, %v609_v27, 0.0  ;;  %v617_v17 = vsel %vm223_vm0, %v613_v29, 0.0  ;;  %v670_v34 = vmul.f32 %v668_v13, %v626_v2  ;;  %v691_v27 = vld [vmem:[#allocation2] sm:$0x1] }
  0x2f   : > { %v589_v35 = vadd.f32 %v588_v33, %v587_v32  ;;  %v618_v36 = vadd.f32 %v617_v17, %v616_v16  ;;  %v650_v11 = vsel %vm258_vm1, %v643_v30, 0.0  ;;  %v651_v12 = vsel %vm258_vm1, %v647_v10, 0.0 }
  0x30   : > { %v675_v37 = vrot.slane %v670_v34, %v875_v21  ;;  %v679_v38 = vrot.slane %v670_v34, %v877_v22  ;;  %v652_v15 = vadd.f32 %v651_v12, %v650_v11 }
  0x31   : > { %523 = vadd.xlane.f32.xlu0 %v522_v24  ;;  %555 = vadd.xlane.f32.xlu1 %v554_v31 }
  0x32   : > { %v682_v39 = vsel %vm291_vm3, %v675_v37, 0.0  ;;  %v683_v40 = vsel %vm291_vm3, %v679_v38, 0.0 }
  0x33   : > { %v684_v41 = vadd.f32 %v683_v40, %v682_v39 }
  0x35   : > { %590 = vadd.xlane.f32.xlu0 %v589_v35  ;;  %619 = vadd.xlane.f32.xlu1 %v618_v36 }
  0x39   : > { %653 = vadd.xlane.f32.xlu0 %v652_v15  ;;  %685 = vadd.xlane.f32.xlu1 %v684_v41 }
  0xa6   : > { %v228_v42 = vpop.xlane.xlu0 %227  ;;  %v263_v43 = vpop.xlane.xlu1 %262 }
  0xa7   : > { %v230_v44 = vrot.slane %v228_v42, 1  ;;  %v265_v47 = vrot.slane %v263_v43, 2 }
  0xaa   : > { %v198_v45 = vpop.xlane.xlu0 %197  ;;  %v296_v46 = vpop.xlane.xlu1 %295 }
  0xab   : > { %v232_v48 = vadd.f32 %v230_v44, %v198_v45  ;;  %v298_v21 = vrot.slane %v296_v46, 3 }
  0xad   : > { %v267_v49 = vadd.f32 %v265_v47, %v232_v48 }
  0xae   : > { %v331_v22 = vpop.xlane.xlu0 %330  ;;  %v360_v50 = vpop.xlane.xlu1 %359 }
  0xaf   : > { %v300_v51 = vadd.f32 %v298_v21, %v267_v49  ;;  %v362_v52 = vrot.slane %v360_v50, 1 }
  0xb1   : > { %v332_v53 = vadd.f32 %v331_v22, %v300_v51 }
  0xb2   : > { %v394_v54 = vpop.xlane.xlu0 %393  ;;  %v426_v55 = vpop.xlane.xlu1 %425 }
  0xb3   : > { %v364_v56 = vadd.f32 %v362_v52, %v332_v53  ;;  %v396_v57 = vrot.slane %v394_v54, 2  ;;  %v428_v58 = vrot.slane %v426_v55, 3 }
  0xb5   : > { %v398_v59 = vadd.f32 %v396_v57, %v364_v56 }
  0xb6   : > { %v461_v60 = vpop.xlane.xlu0 %460  ;;  %v490_v61 = vpop.xlane.xlu1 %489 }
  0xb7   : > { %v430_v62 = vadd.f32 %v428_v58, %v398_v59  ;;  %v492_v63 = vrot.slane %v490_v61, 1 }
  0xb9   : > { %v462_v0 = vadd.f32 %v461_v60, %v430_v62 }
  0xba   : > { %v524_v1 = vpop.xlane.xlu0 %523  ;;  %v556_v2 = vpop.xlane.xlu1 %555 }
  0xbb   : > { %v494_v3 = vadd.f32 %v492_v63, %v462_v0  ;;  %v526_v4 = vrot.slane %v524_v1, 2  ;;  %v558_v5 = vrot.slane %v556_v2, 3 }
  0xbd   : > { %v528_v6 = vadd.f32 %v526_v4, %v494_v3 }
  0xbe   : > { %v591_v7 = vpop.xlane.xlu0 %590  ;;  %v620_v8 = vpop.xlane.xlu1 %619 }
  0xbf   : > { %v560_v9 = vadd.f32 %v558_v5, %v528_v6  ;;  %v622_v13 = vrot.slane %v620_v8, 1 }
  0xc1   : > { %v592_v18 = vadd.f32 %v591_v7, %v560_v9 }
  0xc2   : > { %v654_v19 = vpop.xlane.xlu0 %653  ;;  %v686_v20 = vpop.xlane.xlu1 %685 }
  0xc3   : > { %v624_v23 = vadd.f32 %v622_v13, %v592_v18  ;;  %v656_v24 = vrot.slane %v654_v19, 2  ;;  %v688_v25 = vrot.slane %v686_v20, 3 }
  0xc5   : > { %v658_v26 = vadd.f32 %v656_v24, %v624_v23 }
  0xc7   : > { %v690_v28 = vadd.f32 %v688_v25, %v658_v26 }
  0xc9   : > { %v692_v14 = vadd.f32 %v691_v27, %v690_v28 }
  0xcb   : > { %v776_v29 = vmul.f32 -1.442695, %v692_v14 }
  0xcd   : > { %789 = vpow2.f32 %v776_v29 }
  0xda   : > { %v790_v30 = vpop.eup %789 }
  0xdb   : > { %v696_v31 = vadd.f32 1.0, %v790_v30 }
  0xdd   : > { %791 = vrcp.f32 %v696_v31 }
  0xea   : > { %v792_v32 = vpop.eup %791 }
  0xeb   : > { %700 = vst.msk [vmem:[%s168_s27] sm:$0x1] %vm699_vm4, %v792_v32 }
  0xec PF: > { %s15_s14 = sadd.s32 1, %s799_s14  }
  0xed   : > { %p12_p4 = scmp.ge.s32.totalorder %s15_s14, 4  }
  0xef   :  { %14 = sbr.rel (!%p12_p4) target bundleno = 3 (0x3), region = 80 }

// kernel: _lambda_.6
= control target key start
LH: loop header
LB: loop body
LE: loop exit
PB: predicated region body
PF: predicated region fallthrough
CT: control target
= control target key end

     0   :  { %s3300_s12 = smov 0   ;;  %s4147_s0 = inlined_call_operand.vmem [shape: bf16[2,6,3,256], index: 0, kind: input, shape index: {}]   ;;  %s4148_s1 = inlined_call_operand.vmem [shape: bf16[4,2,256,256], index: 1, kind: input, shape index: {}]   ;;  %s4149_s2 = inlined_call_operand.vmem [shape: f32[1,256], index: 2, kind: input, shape index: {}]   ;;  %s4150_s3 = inlined_call_operand.vmem [shape: bf16[2,2,2,256], index: 3, kind: output, shape index: {}]  }
   0x1 LB: > { %s2342_s13 = sadd.s32 4294967295, %s3273_s12   ;;  %p2346_p0 = scmp.ge.s32.totalorder %s3273_s12, 1  ;;  %s3273_s12 = sphi %s3300_s12, %s13_s12  }
   0x2   : > { %p137_p1 = scmp.lt.s32.totalorder %s3273_s12, 3 }
   0x4   : > { %p138_p2 = pnand %p2346_p0, %p137_p1 }
   0x5   : > { %p160_p3 = scmp.lt.s32.totalorder (!%p138_p2), %s2342_s13, 1  ;;  %s3318_s22 = smov (!%p138_p2), 0  }
   0x6   : > { %141 = sbr.rel (%p138_p2) target bundleno = 481 (0x1e1), region = 32 }
   0xb   : > { %s4152_s13 = smov (!%p160_p3, %s2342_s13), 1 }
   0xc   : > { %s2861_s14 = smul.u32 24, %s4152_s13  ;;  %s2348_s15 = sshll.u32 %s4152_s13, 2 }
   0xd   : > { %s3311_s18 = scalar_lea.vmem %s4150_s3, %s2348_s15 }
   0xe   : > { %s3316_s21 = scalar_lea.vmem %s4147_s0, %s2861_s14 }
   0xf LB: >> { %v2879_v0 = vld [vmem:[%s4148_s1 + $0x174] ss:$8 sps:$4 sm:$0xff]   ;;  %v2883_v2 = vld [vmem:[%s4148_s1 + $0x170] ss:$8 sps:$4 sm:$0xff]   ;;  %v2885_v4 = vld [vmem:[%s4148_s1 + $0x164] ss:$8 sps:$4 sm:$0xff]   ;;  %s3277_s22 = sphi %s3318_s22, %s174_s22  }
  0x10   : >> { %v2881_v1 = vld [vmem:[%s4148_s1 + $0x74] ss:$8 sps:$4 sm:$0xff]   ;;  %431 = vmatprep.subr.bf16.mxu0 %v2879_v0  ;;  %v2884_v3 = vld [vmem:[%s4148_s1 + $0x70] ss:$8 sps:$4 sm:$0xff]   ;;  %v2887_v5 = vld [vmem:[%s4148_s1 + $0x64] ss:$8 sps:$4 sm:$0xff]  }
  0x11   : >> { %643 = vmatprep.subr.bf16.mxu1 %v2881_v1  ;;  %432 = vmatpush1.bf16.msra.mxu0 %v2883_v2  ;;  %v2889_v6 = vld [vmem:[%s4148_s1 + $0x160] ss:$8 sps:$4 sm:$0xff]   ;;  %v2891_v8 = vld [vmem:[%s4148_s1 + $0x154] ss:$8 sps:$4 sm:$0xff]   ;;  %v2895_v10 = vld [vmem:[%s4148_s1 + $0x150] ss:$8 sps:$4 sm:$0xff]  }
  0x12   : >> { %644 = vmatpush1.bf16.msra.mxu1 %v2884_v3  ;;  %433 = vmatprep.subr.bf16.mxu0 %v2885_v4  ;;  %v2890_v7 = vld [vmem:[%s4148_s1 + $0x60] ss:$8 sps:$4 sm:$0xff]   ;;  %v2893_v9 = vld [vmem:[%s4148_s1 + $0x54] ss:$8 sps:$4 sm:$0xff]   ;;  %v2896_v11 = vld [vmem:[%s4148_s1 + $0x50] ss:$8 sps:$4 sm:$0xff]  }
  0x13   : >> { %645 = vmatprep.subr.bf16.mxu1 %v2887_v5  ;;  %v2897_v12 = vld [vmem:[%s4148_s1 + $0x144] ss:$8 sps:$4 sm:$0xff]   ;;  %v2901_v14 = vld [vmem:[%s4148_s1 + $0x140] ss:$8 sps:$4 sm:$0xff]   ;;  %v2903_v16 = vld [vmem:[%s4148_s1 + $0x134] ss:$8 sps:$4 sm:$0xff]  }
  0x14   : >> { %v2899_v13 = vld [vmem:[%s4148_s1 + $0x44] ss:$8 sps:$4 sm:$0xff]   ;;  %v2902_v15 = vld [vmem:[%s4148_s1 + $0x40] ss:$8 sps:$4 sm:$0xff]   ;;  %v2905_v17 = vld [vmem:[%s4148_s1 + $0x34] ss:$8 sps:$4 sm:$0xff]  }
  0x15   : >> { %434 = vmatpush1.bf16.msra.mxu0 %v2889_v6  ;;  %v2907_v18 = vld [vmem:[%s4148_s1 + $0x130] ss:$8 sps:$4 sm:$0xff]   ;;  %v2909_v20 = vld [vmem:[%s4148_s1 + $0x124] ss:$8 sps:$4 sm:$0xff]   ;;  %v2913_v22 = vld [vmem:[%s4148_s1 + $0x120] ss:$8 sps:$4 sm:$0xff]  }
  0x16   : >> { %646 = vmatpush1.bf16.msra.mxu1 %v2890_v7  ;;  %435 = vmatprep.subr.bf16.mxu0 %v2891_v8  ;;  %v2908_v19 = vld [vmem:[%s4148_s1 + $0x30] ss:$8 sps:$4 sm:$0xff]   ;;  %v2911_v21 = vld [vmem:[%s4148_s1 + $0x24] ss:$8 sps:$4 sm:$0xff]   ;;  %v2914_v23 = vld [vmem:[%s4148_s1 + $0x20] ss:$8 sps:$4 sm:$0xff]  }
  0x17   : >> { %647 = vmatprep.subr.bf16.mxu1 %v2893_v9  ;;  %v2915_v24 = vld [vmem:[%s4148_s1 + $0x114] ss:$8 sps:$4 sm:$0xff]   ;;  %v2919_v26 = vld [vmem:[%s4148_s1 + $0x110] ss:$8 sps:$4 sm:$0xff]   ;;  %v2921_v28 = vld [vmem:[%s4148_s1 + $0x104] ss:$8 sps:$4 sm:$0xff]  }
  0x18   : >> { %v2917_v25 = vld [vmem:[%s4148_s1 + $0x14] ss:$8 sps:$4 sm:$0xff]   ;;  %v2920_v27 = vld [vmem:[%s4148_s1 + $0x10] ss:$8 sps:$4 sm:$0xff]   ;;  %v2923_v29 = vld [vmem:[%s4148_s1 + $0x4] ss:$8 sps:$4 sm:$0xff]  }
  0x19   : >> { %436 = vmatpush1.bf16.msra.mxu0 %v2895_v10  ;;  %v2925_v30 = vld [vmem:[%s4148_s1 + $0x100] ss:$8 sps:$4 sm:$0xff]   ;;  %v2927_v32 = vld [vmem:[%s4148_s1 + $0x1f4] ss:$8 sps:$4 sm:$0xff]   ;;  %v2931_v34 = vld [vmem:[%s4148_s1 + $0x1f0] ss:$8 sps:$4 sm:$0xff]  }
  0x1a   : >> { %648 = vmatpush1.bf16.msra.mxu1 %v2896_v11  ;;  %437 = vmatprep.subr.bf16.mxu0 %v2897_v12  ;;  %v2926_v31 = vld [vmem:[%s4148_s1] ss:$8 sps:$4 sm:$0xff]   ;;  %v2929_v33 = vld [vmem:[%s4148_s1 + $0xf4] ss:$8 sps:$4 sm:$0xff]   ;;  %v2932_v35 = vld [vmem:[%s4148_s1 + $0xf0] ss:$8 sps:$4 sm:$0xff]  }
  0x1b   : >> { %649 = vmatprep.subr.bf16.mxu1 %v2899_v13  ;;  %v2933_v36 = vld [vmem:[%s4148_s1 + $0x1e4] ss:$8 sps:$4 sm:$0xff]   ;;  %v2937_v38 = vld [vmem:[%s4148_s1 + $0x1e0] ss:$8 sps:$4 sm:$0xff]   ;;  %v2939_v40 = vld [vmem:[%s4148_s1 + $0x1d4] ss:$8 sps:$4 sm:$0xff]  }
  0x1c   : >> { %v2935_v37 = vld [vmem:[%s4148_s1 + $0xe4] ss:$8 sps:$4 sm:$0xff]   ;;  %v2938_v39 = vld [vmem:[%s4148_s1 + $0xe0] ss:$8 sps:$4 sm:$0xff]   ;;  %v2941_v41 = vld [vmem:[%s4148_s1 + $0xd4] ss:$8 sps:$4 sm:$0xff]  }
  0x1d   : >> { %438 = vmatpush1.bf16.msra.mxu0 %v2901_v14  ;;  %s2857_s11 = sshll.u32 %s3277_s22, 3  ;;  %v2943_v42 = vld [vmem:[%s4148_s1 + $0x1d0] ss:$8 sps:$4 sm:$0xff]   ;;  %v2945_v44 = vld [vmem:[%s4148_s1 + $0x1c4] ss:$8 sps:$4 sm:$0xff]   ;;  %s2349_s23 = sshll.u32 %s3277_s22, 1 }
  0x1e   : >> { %650 = vmatpush1.bf16.msra.mxu1 %v2902_v15  ;;  %439 = vmatprep.subr.bf16.mxu0 %v2903_v16  ;;  %v2944_v43 = vld [vmem:[%s4148_s1 + $0xd0] ss:$8 sps:$4 sm:$0xff]   ;;  %s3460_s20 = scalar_lea.vmem %s3316_s21, %s2857_s11  ;;  %v2947_v45 = vld [vmem:[%s4148_s1 + $0xc4] ss:$8 sps:$4 sm:$0xff]   ;;  %v2949_v46 = vld [vmem:[%s4148_s1 + $0x1c0] ss:$8 sps:$4 sm:$0xff]   ;;  %s2266_s24 = scalar_lea.vmem %s3311_s18, %s2349_s23 }
  0x1f   : >> { %651 = vmatprep.subr.bf16.mxu1 %v2905_v17  ;;  %v2384_v47 = vld.sshfl [vmem:[%s3460_s20] sm:$0x33 pattern:$0x76325410]  ;;  %v2951_v51 = vld [vmem:[%s4148_s1 + $0x1b4] ss:$8 sps:$4 sm:$0xff]  }
  0x20   : >> { %v2950_v48 = vld [vmem:[%s4148_s1 + $0xc0] ss:$8 sps:$4 sm:$0xff]   ;;  %v254_v49 = vcombine.high %v2384_v47, %v2384_v47  ;;  %v2953_v52 = vld [vmem:[%s4148_s1 + $0xb4] ss:$8 sps:$4 sm:$0xff]   ;;  %v2955_v56 = vld [vmem:[%s4148_s1 + $0x1b0] ss:$8 sps:$4 sm:$0xff]  }
  0x21   : >> { %440 = vmatpush1.bf16.msra.mxu0 %v2907_v18  ;;  %v2417_v50 = vld.sshfl [vmem:[%s3460_s20] sm:$0x11 pattern:$0x76325410]  ;;  %v2956_v57 = vld [vmem:[%s4148_s1 + $0xb0] ss:$8 sps:$4 sm:$0xff]  }
  0x22   : >> { %652 = vmatpush1.bf16.msra.mxu1 %v2908_v19  ;;  %441 = vmatprep.subr.bf16.mxu0 %v2909_v20  ;;  %v480_v53 = vcombine.high %v2417_v50, %v2417_v50  ;;  %v263_v54 = vshrl.u32 %v254_v49, 16  ;;  %v265_v55 = vshll.u32 %v254_v49, 16  ;;  %v2957_v59 = vld [vmem:[%s4148_s1 + $0x1a4] ss:$8 sps:$4 sm:$0xff]   ;;  %v2961_v62 = vld [vmem:[%s4148_s1 + $0x1a0] ss:$8 sps:$4 sm:$0xff]  }
  0x23   : >> { %653 = vmatprep.subr.bf16.mxu1 %v2911_v21  ;;  %v2959_v60 = vld [vmem:[%s4148_s1 + $0xa4] ss:$8 sps:$4 sm:$0xff]   ;;  %v2962_v63 = vld [vmem:[%s4148_s1 + $0xa0] ss:$8 sps:$4 sm:$0xff]   ;;  %v2963_v0 = vld [vmem:[%s4148_s1 + $0x194] ss:$8 sps:$4 sm:$0xff]  }
  0x24   : >> { %675 = vmatprep.mubr.bf16.mxu1 %v480_v53  ;;  %v267_v58 = vrot.slane %v265_v55, 1  ;;  %v2965_v1 = vld [vmem:[%s4148_s1 + $0x94] ss:$8 sps:$4 sm:$0xff]   ;;  %v2967_v2 = vld [vmem:[%s4148_s1 + $0x190] ss:$8 sps:$4 sm:$0xff]   ;;  %v258_v3 = vshll.u32 %v2384_v47, 16 }
  0x25   : >> { %442 = vmatpush1.bf16.msra.mxu0 %v2913_v22  ;;  %v2968_v4 = vld [vmem:[%s4148_s1 + $0x90] ss:$8 sps:$4 sm:$0xff]   ;;  %v2969_v5 = vld [vmem:[%s4148_s1 + $0x184] ss:$8 sps:$4 sm:$0xff]   ;;  %v2973_v7 = vld [vmem:[%s4148_s1 + $0x180] ss:$8 sps:$4 sm:$0xff]  }
  0x26   : >> { %654 = vmatpush1.bf16.msra.mxu1 %v2914_v23  ;;  %443 = vmatprep.subr.bf16.mxu0 %v2915_v24  ;;  %v268_v61 = vor.u32 %v267_v58, %v263_v54  ;;  %v2971_v6 = vld [vmem:[%s4148_s1 + $0x84] ss:$8 sps:$4 sm:$0xff]   ;;  %v256_v8 = vshrl.u32 %v2384_v47, 16  ;;  %v260_v9 = vrot.slane %v258_v3, 1  ;;  %v2974_v10 = vld [vmem:[%s4148_s1 + $0x80] ss:$8 sps:$4 sm:$0xff]  }
  0x27   : >> { %655 = vmatprep.subr.bf16.mxu1 %v2917_v25  ;;  %v2977_v11 = vld [vmem:[%s4148_s1 + $0x274] ss:$8 sps:$4 sm:$0xff]   ;;  %v2975_v14 = vld [vmem:[%s4148_s1 + $0x270] ss:$8 sps:$4 sm:$0xff]   ;;  %v2983_v16 = vld [vmem:[%s4148_s1 + $0x264] ss:$8 sps:$4 sm:$0xff]  }
  0x28   : >> { %463 = vmatprep.mubr.bf16.mxu0 %v268_v61  ;;  %v2980_v12 = vld [vmem:[%s4148_s1 + $0x374] ss:$8 sps:$4 sm:$0xff]   ;;  %v261_v13 = vor.u32 %v260_v9, %v256_v8  ;;  %v2978_v15 = vld [vmem:[%s4148_s1 + $0x370] ss:$8 sps:$4 sm:$0xff]   ;;  %v2986_v17 = vld [vmem:[%s4148_s1 + $0x364] ss:$8 sps:$4 sm:$0xff]  }
  0x29   : >> { %444 = vmatpush1.bf16.msra.mxu0 %v2919_v26  ;;  %v2981_v18 = vld [vmem:[%s4148_s1 + $0x260] ss:$8 sps:$4 sm:$0xff]   ;;  %v2989_v20 = vld [vmem:[%s4148_s1 + $0x254] ss:$8 sps:$4 sm:$0xff]   ;;  %v2987_v22 = vld [vmem:[%s4148_s1 + $0x250] ss:$8 sps:$4 sm:$0xff]  }
  0x2a   : >> { %656 = vmatpush1.bf16.msra.mxu1 %v2920_v27  ;;  %445 = vmatprep.subr.bf16.mxu0 %v2921_v28  ;;  %v2984_v19 = vld [vmem:[%s4148_s1 + $0x360] ss:$8 sps:$4 sm:$0xff]   ;;  %v2992_v21 = vld [vmem:[%s4148_s1 + $0x354] ss:$8 sps:$4 sm:$0xff]   ;;  %v2990_v23 = vld [vmem:[%s4148_s1 + $0x350] ss:$8 sps:$4 sm:$0xff]  }
  0x2b   : >> { %657 = vmatprep.subr.bf16.mxu1 %v2923_v29  ;;  %v2995_v24 = vld [vmem:[%s4148_s1 + $0x244] ss:$8 sps:$4 sm:$0xff]   ;;  %v2993_v26 = vld [vmem:[%s4148_s1 + $0x240] ss:$8 sps:$4 sm:$0xff]   ;;  %v3001_v28 = vld [vmem:[%s4148_s1 + $0x234] ss:$8 sps:$4 sm:$0xff]  }
  0x2c   : >> { %v2998_v25 = vld [vmem:[%s4148_s1 + $0x344] ss:$8 sps:$4 sm:$0xff]   ;;  %v2996_v27 = vld [vmem:[%s4148_s1 + $0x340] ss:$8 sps:$4 sm:$0xff]   ;;  %v3004_v29 = vld [vmem:[%s4148_s1 + $0x334] ss:$8 sps:$4 sm:$0xff]  }
  0x2d   : >> { %446 = vmatpush1.bf16.msra.mxu0 %v2925_v30  ;;  %v2999_v30 = vld [vmem:[%s4148_s1 + $0x230] ss:$8 sps:$4 sm:$0xff]   ;;  %v3020_v49 = vld [vmem:[%s4148_s1 + $0x300] ss:$8 sps:$4 sm:$0xff]   ;;  %v3040_v61 = vld [vmem:[%s4148_s1 + $0x3d4] ss:$8 sps:$4 sm:$0xff]  }
  0x2e   : >> { %658 = vmatpush1.bf16.msra.mxu1 %v2926_v31  ;;  %447 = vmatprep.subr.bf16.mxu0 %v2927_v32  ;;  %v3002_v31 = vld [vmem:[%s4148_s1 + $0x330] ss:$8 sps:$4 sm:$0xff]   ;;  %v3007_v32 = vld [vmem:[%s4148_s1 + $0x224] ss:$8 sps:$4 sm:$0xff]   ;;  %v3029_v58 = vld [vmem:[%s4148_s1 + $0x2e0] ss:$8 sps:$4 sm:$0xff]  }
  0x2f   : >> { %659 = vmatprep.subr.bf16.mxu1 %v2929_v33  ;;  %v3010_v33 = vld [vmem:[%s4148_s1 + $0x324] ss:$8 sps:$4 sm:$0xff]   ;;  %v3023_v53 = vld [vmem:[%s4148_s1 + $0x2f0] ss:$8 sps:$4 sm:$0xff]   ;;  %v3044_v3 = vld [vmem:[%s4148_s1 + $0x3c0] ss:$8 sps:$4 sm:$0xff]  }
  0x30   : >> { %v3026_v55 = vld [vmem:[%s4148_s1 + $0x3f0] ss:$8 sps:$4 sm:$0xff]   ;;  %v3055_v8 = vld [vmem:[%s4148_s1 + $0x2a4] ss:$8 sps:$4 sm:$0xff]   ;;  %s174_s22 = sadd.s32 1, %s3277_s22  }
  0x31   : >> { %448 = vmatpush2.bf16.msra.mxu0 %v2931_v34  ;;  %v3005_v34 = vld [vmem:[%s4148_s1 + $0x220] ss:$8 sps:$4 sm:$0xff]   ;;  %v3058_v9 = vld [vmem:[%s4148_s1 + $0x3a4] ss:$8 sps:$4 sm:$0xff]   ;;  %p171_p4 = scmp.ge.s32.totalorder %s174_s22, 2  }
  0x32   : >> { %660 = vmatpush2.bf16.msra.mxu1 %v2932_v35  ;;  %449 = vmatprep.subr.bf16.mxu0 %v2933_v36  ;;  %v3008_v35 = vld [vmem:[%s4148_s1 + $0x320] ss:$8 sps:$4 sm:$0xff]   ;;  %v3013_v36 = vld [vmem:[%s4148_s1 + $0x214] ss:$8 sps:$4 sm:$0xff]  }
  0x33   : >> { %661 = vmatprep.subr.bf16.mxu1 %v2935_v37  ;;  %v3016_v37 = vld [vmem:[%s4148_s1 + $0x314] ss:$8 sps:$4 sm:$0xff]  }
  0x35   : >> { %450 = vmatpush2.bf16.msra.mxu0 %v2937_v38  ;;  %v3011_v38 = vld [vmem:[%s4148_s1 + $0x210] ss:$8 sps:$4 sm:$0xff]  }
  0x36   : >> { %662 = vmatpush2.bf16.msra.mxu1 %v2938_v39  ;;  %451 = vmatprep.subr.bf16.mxu0 %v2939_v40  ;;  %v3014_v39 = vld [vmem:[%s4148_s1 + $0x310] ss:$8 sps:$4 sm:$0xff]   ;;  %v3606_v40 = vld.sshfl [vmem:[%s3460_s20 + $0x4] sm:$0x11 pattern:$0x76325410] }
  0x37   : >> { %663 = vmatprep.subr.bf16.mxu1 %v2941_v41  ;;  %v3019_v41 = vld [vmem:[%s4148_s1 + $0x204] ss:$8 sps:$4 sm:$0xff]  }
  0x39   : >> { %452 = vmatpush2.bf16.msra.mxu0 %v2943_v42  ;;  %v730_v42 = vcombine.high %v3606_v40, %v3606_v40 }
  0x3a   : >> { %664 = vmatpush2.bf16.msra.mxu1 %v2944_v43  ;;  %453 = vmatprep.subr.bf16.mxu0 %v2945_v44  ;;  %v3614_v43 = vld.sshfl [vmem:[%s3460_s20 + $0x4] sm:$0x33 pattern:$0x76325410] }
  0x3b   : >> { %665 = vmatprep.subr.bf16.mxu1 %v2947_v45  ;;  %v3022_v44 = vld [vmem:[%s4148_s1 + $0x304] ss:$8 sps:$4 sm:$0xff]   ;;  %v978_v45 = vcombine.high %v3614_v43, %v3614_v43 }
  0x3d   : >> { %454 = vmatpush2.bf16.msra.mxu0 %v2949_v46  ;;  %v3017_v46 = vld [vmem:[%s4148_s1 + $0x200] ss:$8 sps:$4 sm:$0xff]   ;;  %v987_v47 = vshrl.u32 %v978_v45, 16 }
  0x3e   : >> { %666 = vmatpush2.bf16.msra.mxu1 %v2950_v48  ;;  %455 = vmatprep.subr.bf16.mxu0 %v2951_v51  ;;  %v989_v48 = vshll.u32 %v978_v45, 16  ;;  %v3028_v51 = vld [vmem:[%s4148_s1 + $0x3f4] ss:$8 sps:$4 sm:$0xff]   ;;  %v3089_v45 = vld [vmem:[%s4148_s1 + $0x440] ss:$8 sps:$4 sm:$0xff]  }
  0x3f   : >> { %667 = vmatprep.subr.bf16.mxu1 %v2953_v52 }
  0x40   : >> { %v991_v52 = vrot.slane %v989_v48, 1  ;;  %v3097_v48 = vld [vmem:[%s4148_s1 + $0x434] ss:$8 sps:$4 sm:$0xff]  }
  0x41   : >> { %456 = vmatpush2.bf16.msra.mxu0 %v2955_v56  ;;  %v3031_v56 = vld [vmem:[%s4148_s1 + $0x2e4] ss:$8 sps:$4 sm:$0xff]  }
  0x42   : >> { %668 = vmatpush2.bf16.msra.mxu1 %v2956_v57  ;;  %457 = vmatprep.subr.bf16.mxu0 %v2957_v59  ;;  %v992_v54 = vor.u32 %v991_v52, %v987_v47  ;;  %v3034_v57 = vld [vmem:[%s4148_s1 + $0x3e4] ss:$8 sps:$4 sm:$0xff]   ;;  %v3032_v59 = vld [vmem:[%s4148_s1 + $0x3e0] ss:$8 sps:$4 sm:$0xff]  }
  0x43   : >> { %669 = vmatprep.subr.bf16.mxu1 %v2959_v60  ;;  %v3037_v60 = vld [vmem:[%s4148_s1 + $0x2d4] ss:$8 sps:$4 sm:$0xff]   ;;  %v3092_v47 = vld [vmem:[%s4148_s1 + $0x540] ss:$8 sps:$4 sm:$0xff]   ;;  %v3103_v52 = vld [vmem:[%s4148_s1 + $0x424] ss:$8 sps:$4 sm:$0xff]  }
  0x45   : >> { %458 = vmatpush2.bf16.msra.mxu0 %v2961_v62  ;;  %v3035_v62 = vld [vmem:[%s4148_s1 + $0x2d0] ss:$8 sps:$4 sm:$0xff]  }
  0x46   : >> { %670 = vmatpush2.bf16.msra.mxu1 %v2962_v63  ;;  %459 = vmatprep.subr.bf16.mxu0 %v2963_v0  ;;  %v3038_v63 = vld [vmem:[%s4148_s1 + $0x3d0] ss:$8 sps:$4 sm:$0xff]   ;;  %v3043_v0 = vld [vmem:[%s4148_s1 + $0x2c4] ss:$8 sps:$4 sm:$0xff]  }
  0x47   : >> { %671 = vmatprep.subr.bf16.mxu1 %v2965_v1  ;;  %v3046_v1 = vld [vmem:[%s4148_s1 + $0x3c4] ss:$8 sps:$4 sm:$0xff]  }
  0x49   : >> { %460 = vmatpush2.bf16.msra.mxu0 %v2967_v2  ;;  %v3041_v2 = vld [vmem:[%s4148_s1 + $0x2c0] ss:$8 sps:$4 sm:$0xff]  }
  0x4a   : >> { %672 = vmatpush2.bf16.msra.mxu1 %v2968_v4  ;;  %461 = vmatprep.subr.bf16.mxu0 %v2969_v5  ;;  %v3049_v4 = vld [vmem:[%s4148_s1 + $0x2b4] ss:$8 sps:$4 sm:$0xff]  }
  0x4b   : >> { %673 = vmatprep.subr.bf16.mxu1 %v2971_v6  ;;  %v3052_v5 = vld [vmem:[%s4148_s1 + $0x3b4] ss:$8 sps:$4 sm:$0xff]   ;;  %v3047_v6 = vld [vmem:[%s4148_s1 + $0x2b0] ss:$8 sps:$4 sm:$0xff]  }
  0x4d   : >> { %462 = vmatpush2.bf16.msra.mxu0 %v2973_v7  ;;  %v3050_v7 = vld [vmem:[%s4148_s1 + $0x3b0] ss:$8 sps:$4 sm:$0xff]  }
  0x4e   : >> { %674 = vmatpush2.bf16.msra.mxu1 %v2974_v10  ;;  %893 = vmatprep.subr.bf16.mxu0 %v2977_v11  ;;  %v3053_v10 = vld [vmem:[%s4148_s1 + $0x2a0] ss:$8 sps:$4 sm:$0xff]  }
  0x4f   : >> { %1155 = vmatprep.subr.bf16.mxu1 %v2980_v12  ;;  %v3056_v11 = vld [vmem:[%s4148_s1 + $0x3a0] ss:$8 sps:$4 sm:$0xff]   ;;  %v3061_v12 = vld [vmem:[%s4148_s1 + $0x294] ss:$8 sps:$4 sm:$0xff]  }
  0x50   : >> { %464 = vmatmul.mubr.bf16.vlgmr.msra.gmra.mxu0 %v261_v13  ;;  %v3064_v13 = vld [vmem:[%s4148_s1 + $0x394] ss:$8 sps:$4 sm:$0xff]  }
  0x51   : >> { %676 = vmatmul.mubr.bf16.vlgmr.msra.gmra.mxu1 %v2417_v50  ;;  %894 = vmatpush1.bf16.msra.mxu0 %v2975_v14  ;;  %v3025_v50 = vld [vmem:[%s4148_s1 + $0x2f4] ss:$8 sps:$4 sm:$0xff]   ;;  %v3059_v14 = vld [vmem:[%s4148_s1 + $0x290] ss:$8 sps:$4 sm:$0xff]  }
  0x52   : >> { %1156 = vmatpush1.bf16.msra.mxu1 %v2978_v15  ;;  %895 = vmatprep.subr.bf16.mxu0 %v2983_v16  ;;  %v982_v15 = vshll.u32 %v3614_v43, 16  ;;  %v3062_v16 = vld [vmem:[%s4148_s1 + $0x390] ss:$8 sps:$4 sm:$0xff]  }
  0x53   : >> { %1157 = vmatprep.subr.bf16.mxu1 %v2986_v17  ;;  %925 = vmatprep.mubr.bf16.mxu0 %v730_v42  ;;  %v3067_v17 = vld [vmem:[%s4148_s1 + $0x284] ss:$8 sps:$4 sm:$0xff]  }
  0x54   : >> { %1187 = vmatprep.mubr.bf16.mxu1 %v992_v54  ;;  %v3091_v42 = vld [vmem:[%s4148_s1 + $0x444] ss:$8 sps:$4 sm:$0xff]   ;;  %v3101_v54 = vld [vmem:[%s4148_s1 + $0x420] ss:$8 sps:$4 sm:$0xff]  }
  0x55   : >> { %896 = vmatpush1.bf16.msra.mxu0 %v2981_v18  ;;  %v3070_v18 = vld [vmem:[%s4148_s1 + $0x384] ss:$8 sps:$4 sm:$0xff]  }
  0x56   : >> { %1158 = vmatpush1.bf16.msra.mxu1 %v2984_v19  ;;  %897 = vmatprep.subr.bf16.mxu0 %v2989_v20  ;;  %v3065_v19 = vld [vmem:[%s4148_s1 + $0x280] ss:$8 sps:$4 sm:$0xff]   ;;  %v980_v20 = vshrl.u32 %v3614_v43, 16  ;;  %v3094_v43 = vld [vmem:[%s4148_s1 + $0x544] ss:$8 sps:$4 sm:$0xff]  }
  0x57   : >> { %1159 = vmatprep.subr.bf16.mxu1 %v2992_v21  ;;  %v984_v21 = vrot.slane %v982_v15, 1  ;;  %v3140_v15 = vld [vmem:[%s4148_s1 + $0x5c0] ss:$8 sps:$4 sm:$0xff]  }
  0x59   : >> { %898 = vmatpush1.bf16.msra.mxu0 %v2987_v22  ;;  %v3068_v22 = vld [vmem:[%s4148_s1 + $0x380] ss:$8 sps:$4 sm:$0xff]  }
  0x5a   : >> { %1160 = vmatpush1.bf16.msra.mxu1 %v2990_v23  ;;  %899 = vmatprep.subr.bf16.mxu0 %v2995_v24  ;;  %v3073_v23 = vld [vmem:[%s4148_s1 + $0x474] ss:$8 sps:$4 sm:$0xff]  }
  0x5b   : >> { %1161 = vmatprep.subr.bf16.mxu1 %v2998_v25  ;;  %v3076_v24 = vld [vmem:[%s4148_s1 + $0x574] ss:$8 sps:$4 sm:$0xff]   ;;  %v985_v25 = vor.u32 %v984_v21, %v980_v20  ;;  %v3151_v20 = vld [vmem:[%s4148_s1 + $0x4a4] ss:$8 sps:$4 sm:$0xff]  }
  0x5c   : >> { %v3154_v21 = vld [vmem:[%s4148_s1 + $0x5a4] ss:$8 sps:$4 sm:$0xff]  }
  0x5d   : >> { %900 = vmatpush1.bf16.msra.mxu0 %v2993_v26  ;;  %v3071_v26 = vld [vmem:[%s4148_s1 + $0x470] ss:$8 sps:$4 sm:$0xff]  }
  0x5e   : >> { %1162 = vmatpush1.bf16.msra.mxu1 %v2996_v27  ;;  %901 = vmatprep.subr.bf16.mxu0 %v3001_v28  ;;  %v3074_v27 = vld [vmem:[%s4148_s1 + $0x570] ss:$8 sps:$4 sm:$0xff]   ;;  %v3079_v28 = vld [vmem:[%s4148_s1 + $0x464] ss:$8 sps:$4 sm:$0xff]  }
  0x5f   : >> { %1163 = vmatprep.subr.bf16.mxu1 %v3004_v29  ;;  %v3082_v29 = vld [vmem:[%s4148_s1 + $0x564] ss:$8 sps:$4 sm:$0xff]  }
  0x61   : >> { %902 = vmatpush1.bf16.msra.mxu0 %v2999_v30  ;;  %v3077_v30 = vld [vmem:[%s4148_s1 + $0x460] ss:$8 sps:$4 sm:$0xff]  }
  0x62   : >> { %1164 = vmatpush1.bf16.msra.mxu1 %v3002_v31  ;;  %903 = vmatprep.subr.bf16.mxu0 %v3007_v32  ;;  %v3080_v31 = vld [vmem:[%s4148_s1 + $0x560] ss:$8 sps:$4 sm:$0xff]  }
  0x63   : >> { %1165 = vmatprep.subr.bf16.mxu1 %v3010_v33  ;;  %v3751_v32 = vld.sshfl [vmem:[%s3460_s20 + $0x8] sm:$0x11 pattern:$0x76325410]  ;;  %v3085_v33 = vld [vmem:[%s4148_s1 + $0x454] ss:$8 sps:$4 sm:$0xff]  }
  0x65   : >> { %904 = vmatpush1.bf16.msra.mxu0 %v3005_v34  ;;  %v1244_v34 = vcombine.high %v3751_v32, %v3751_v32 }
  0x66   : >> { %1166 = vmatpush1.bf16.msra.mxu1 %v3008_v35  ;;  %905 = vmatprep.subr.bf16.mxu0 %v3013_v36  ;;  %v3759_v35 = vld.sshfl [vmem:[%s3460_s20 + $0x8] sm:$0x33 pattern:$0x76325410]  ;;  %v3088_v36 = vld [vmem:[%s4148_s1 + $0x554] ss:$8 sps:$4 sm:$0xff]  }
  0x67   : >> { %1167 = vmatprep.subr.bf16.mxu1 %v3016_v37  ;;  %v1492_v37 = vcombine.high %v3759_v35, %v3759_v35 }
  0x69   : >> { %906 = vmatpush1.bf16.msra.mxu0 %v3011_v38  ;;  %v3083_v38 = vld [vmem:[%s4148_s1 + $0x450] ss:$8 sps:$4 sm:$0xff]  }
  0x6a   : >> { %1168 = vmatpush1.bf16.msra.mxu1 %v3014_v39  ;;  %907 = vmatprep.subr.bf16.mxu0 %v3019_v41  ;;  %v1501_v39 = vshrl.u32 %v1492_v37, 16  ;;  %v3086_v41 = vld [vmem:[%s4148_s1 + $0x550] ss:$8 sps:$4 sm:$0xff]  }
  0x6b   : >> { %1169 = vmatprep.subr.bf16.mxu1 %v3022_v44 }
  0x6d   : >> { %908 = vmatpush1.bf16.msra.mxu0 %v3017_v46 }
  0x6e   : >> { %1170 = vmatpush1.bf16.msra.mxu1 %v3020_v49  ;;  %909 = vmatprep.subr.bf16.mxu0 %v3025_v50  ;;  %v3100_v49 = vld [vmem:[%s4148_s1 + $0x534] ss:$8 sps:$4 sm:$0xff]   ;;  %v3095_v50 = vld [vmem:[%s4148_s1 + $0x430] ss:$8 sps:$4 sm:$0xff]  }
  0x6f   : >> { %1171 = vmatprep.subr.bf16.mxu1 %v3028_v51  ;;  %v3098_v51 = vld [vmem:[%s4148_s1 + $0x530] ss:$8 sps:$4 sm:$0xff]  }
  0x71   : >> { %910 = vmatpush2.bf16.msra.mxu0 %v3023_v53  ;;  %v3106_v53 = vld [vmem:[%s4148_s1 + $0x524] ss:$8 sps:$4 sm:$0xff]  }
  0x72   : >> { %1172 = vmatpush2.bf16.msra.mxu1 %v3026_v55  ;;  %911 = vmatprep.subr.bf16.mxu0 %v3031_v56  ;;  %v3104_v55 = vld [vmem:[%s4148_s1 + $0x520] ss:$8 sps:$4 sm:$0xff]   ;;  %v3109_v56 = vld [vmem:[%s4148_s1 + $0x414] ss:$8 sps:$4 sm:$0xff]  }
  0x73   : >> { %1173 = vmatprep.subr.bf16.mxu1 %v3034_v57  ;;  %v3112_v57 = vld [vmem:[%s4148_s1 + $0x514] ss:$8 sps:$4 sm:$0xff]  }
  0x75   : >> { %912 = vmatpush2.bf16.msra.mxu0 %v3029_v58  ;;  %v3107_v58 = vld [vmem:[%s4148_s1 + $0x410] ss:$8 sps:$4 sm:$0xff]  }
  0x76   : >> { %1174 = vmatpush2.bf16.msra.mxu1 %v3032_v59  ;;  %913 = vmatprep.subr.bf16.mxu0 %v3037_v60  ;;  %v3110_v59 = vld [vmem:[%s4148_s1 + $0x510] ss:$8 sps:$4 sm:$0xff]   ;;  %v3115_v60 = vld [vmem:[%s4148_s1 + $0x404] ss:$8 sps:$4 sm:$0xff]  }
  0x77   : >> { %1175 = vmatprep.subr.bf16.mxu1 %v3040_v61  ;;  %v3118_v61 = vld [vmem:[%s4148_s1 + $0x504] ss:$8 sps:$4 sm:$0xff]  }
  0x79   : >> { %914 = vmatpush2.bf16.msra.mxu0 %v3035_v62  ;;  %v3113_v62 = vld [vmem:[%s4148_s1 + $0x400] ss:$8 sps:$4 sm:$0xff]  }
  0x7a   : >> { %1176 = vmatpush2.bf16.msra.mxu1 %v3038_v63  ;;  %915 = vmatprep.subr.bf16.mxu0 %v3043_v0  ;;  %v3116_v63 = vld [vmem:[%s4148_s1 + $0x500] ss:$8 sps:$4 sm:$0xff]   ;;  %v3121_v0 = vld [vmem:[%s4148_s1 + $0x4f4] ss:$8 sps:$4 sm:$0xff]  }
  0x7b   : >> { %1177 = vmatprep.subr.bf16.mxu1 %v3046_v1  ;;  %v3124_v1 = vld [vmem:[%s4148_s1 + $0x5f4] ss:$8 sps:$4 sm:$0xff]  }
  0x7d   : >> { %916 = vmatpush2.bf16.msra.mxu0 %v3041_v2  ;;  %v3119_v2 = vld [vmem:[%s4148_s1 + $0x4f0] ss:$8 sps:$4 sm:$0xff]  }
  0x7e   : >> { %1178 = vmatpush2.bf16.msra.mxu1 %v3044_v3  ;;  %917 = vmatprep.subr.bf16.mxu0 %v3049_v4  ;;  %v3122_v3 = vld [vmem:[%s4148_s1 + $0x5f0] ss:$8 sps:$4 sm:$0xff]   ;;  %v3127_v4 = vld [vmem:[%s4148_s1 + $0x4e4] ss:$8 sps:$4 sm:$0xff]  }
  0x7f   : >> { %1179 = vmatprep.subr.bf16.mxu1 %v3052_v5  ;;  %v3130_v5 = vld [vmem:[%s4148_s1 + $0x5e4] ss:$8 sps:$4 sm:$0xff]  }
  0x81   : >> { %918 = vmatpush2.bf16.msra.mxu0 %v3047_v6  ;;  %v3125_v6 = vld [vmem:[%s4148_s1 + $0x4e0] ss:$8 sps:$4 sm:$0xff]  }
  0x82   : >> { %1180 = vmatpush2.bf16.msra.mxu1 %v3050_v7  ;;  %919 = vmatprep.subr.bf16.mxu0 %v3055_v8  ;;  %v3128_v7 = vld [vmem:[%s4148_s1 + $0x5e0] ss:$8 sps:$4 sm:$0xff]   ;;  %v3133_v8 = vld [vmem:[%s4148_s1 + $0x4d4] ss:$8 sps:$4 sm:$0xff]  }
  0x83   : >> { %1181 = vmatprep.subr.bf16.mxu1 %v3058_v9  ;;  %v3136_v9 = vld [vmem:[%s4148_s1 + $0x5d4] ss:$8 sps:$4 sm:$0xff]  }
  0x85   : >> { %920 = vmatpush2.bf16.msra.mxu0 %v3053_v10  ;;  %v3131_v10 = vld [vmem:[%s4148_s1 + $0x4d0] ss:$8 sps:$4 sm:$0xff]  }
  0x86   : >> { %1182 = vmatpush2.bf16.msra.mxu1 %v3056_v11  ;;  %921 = vmatprep.subr.bf16.mxu0 %v3061_v12  ;;  %v3134_v11 = vld [vmem:[%s4148_s1 + $0x5d0] ss:$8 sps:$4 sm:$0xff]   ;;  %v3139_v12 = vld [vmem:[%s4148_s1 + $0x4c4] ss:$8 sps:$4 sm:$0xff]  }
  0x87   : >> { %1183 = vmatprep.subr.bf16.mxu1 %v3064_v13  ;;  %v3142_v13 = vld [vmem:[%s4148_s1 + $0x5c4] ss:$8 sps:$4 sm:$0xff]  }
  0x89   : >> { %922 = vmatpush2.bf16.msra.mxu0 %v3059_v14  ;;  %v3137_v14 = vld [vmem:[%s4148_s1 + $0x4c0] ss:$8 sps:$4 sm:$0xff]  }
  0x8a   : >> { %1184 = vmatpush2.bf16.msra.mxu1 %v3062_v16  ;;  %923 = vmatprep.subr.bf16.mxu0 %v3067_v17  ;;  %v3145_v16 = vld [vmem:[%s4148_s1 + $0x4b4] ss:$8 sps:$4 sm:$0xff]  }
  0x8b   : >> { %1185 = vmatprep.subr.bf16.mxu1 %v3070_v18  ;;  %v3148_v17 = vld [vmem:[%s4148_s1 + $0x5b4] ss:$8 sps:$4 sm:$0xff]   ;;  %v3143_v18 = vld [vmem:[%s4148_s1 + $0x4b0] ss:$8 sps:$4 sm:$0xff]  }
  0x8d   : >> { %924 = vmatpush2.bf16.msra.mxu0 %v3065_v19  ;;  %v3146_v19 = vld [vmem:[%s4148_s1 + $0x5b0] ss:$8 sps:$4 sm:$0xff]  }
  0x8e   : >> { %1186 = vmatpush2.bf16.msra.mxu1 %v3068_v22  ;;  %1407 = vmatprep.subr.bf16.mxu0 %v3073_v23  ;;  %v3899_v22 = vld.sshfl [vmem:[%s3460_s20 + $0xc] sm:$0x33 pattern:$0x76325410]  ;;  %v3149_v23 = vld [vmem:[%s4148_s1 + $0x4a0] ss:$8 sps:$4 sm:$0xff]  }
  0x8f   : >> { %1669 = vmatprep.subr.bf16.mxu1 %v3076_v24  ;;  %v3152_v24 = vld [vmem:[%s4148_s1 + $0x5a0] ss:$8 sps:$4 sm:$0xff]  }
  0x90   : >> { %926 = vmatmul.mubr.bf16.vlgmr.msra.gmra.mxu0 %v3606_v40  ;;  %v1503_v40 = vshll.u32 %v1492_v37, 16 }
  0x91   : >> { %1188 = vmatmul.mubr.bf16.vlgmr.msra.gmra.mxu1 %v985_v25  ;;  %1408 = vmatpush1.bf16.msra.mxu0 %v3071_v26  ;;  %v3157_v25 = vld [vmem:[%s4148_s1 + $0x494] ss:$8 sps:$4 sm:$0xff]  }
  0x92   : >> { %1670 = vmatpush1.bf16.msra.mxu1 %v3074_v27  ;;  %1409 = vmatprep.subr.bf16.mxu0 %v3079_v28  ;;  %v1505_v44 = vrot.slane %v1503_v40, 1  ;;  %v3160_v26 = vld [vmem:[%s4148_s1 + $0x594] ss:$8 sps:$4 sm:$0xff]   ;;  %v2006_v27 = vcombine.high %v3899_v22, %v3899_v22  ;;  %v1496_v28 = vshll.u32 %v3759_v35, 16 }
  0x93   : >> { %1671 = vmatprep.subr.bf16.mxu1 %v3082_v29  ;;  %1439 = vmatprep.mubr.bf16.mxu0 %v1244_v34  ;;  %v3155_v29 = vld [vmem:[%s4148_s1 + $0x490] ss:$8 sps:$4 sm:$0xff]   ;;  %v3169_v40 = vld [vmem:[%s4148_s1 + $0x674] ss:$8 sps:$4 sm:$0xff]  }
  0x94   : >> { %v1506_v46 = vor.u32 %v1505_v44, %v1501_v39  ;;  %v2017_v34 = vshll.u32 %v2006_v27, 16  ;;  %v1498_v37 = vrot.slane %v1496_v28, 1  ;;  %v3164_v39 = vld [vmem:[%s4148_s1 + $0x580] ss:$8 sps:$4 sm:$0xff]  }
  0x95   : >> { %1410 = vmatpush1.bf16.msra.mxu0 %v3077_v30  ;;  %v3158_v30 = vld [vmem:[%s4148_s1 + $0x590] ss:$8 sps:$4 sm:$0xff]   ;;  %v3942_v44 = vld.sshfl [vmem:[%s3460_s20 + $0xc] sm:$0x11 pattern:$0x76325410] }
  0x96   : >> { %1672 = vmatpush1.bf16.msra.mxu1 %v3080_v31  ;;  %1411 = vmatprep.subr.bf16.mxu0 %v3085_v33  ;;  %v3163_v31 = vld [vmem:[%s4148_s1 + $0x484] ss:$8 sps:$4 sm:$0xff]   ;;  %v3236_v28 = vld [vmem:[%s4148_s1 + $0x7c0] ss:$8 sps:$4 sm:$0xff]  }
  0x97   : >> { %1673 = vmatprep.subr.bf16.mxu1 %v3088_v36  ;;  %1701 = vmatprep.mubr.bf16.mxu1 %v1506_v46  ;;  %v3166_v33 = vld [vmem:[%s4148_s1 + $0x584] ss:$8 sps:$4 sm:$0xff]   ;;  %v1494_v36 = vshrl.u32 %v3759_v35, 16  ;;  %v3172_v35 = vld [vmem:[%s4148_s1 + $0x774] ss:$8 sps:$4 sm:$0xff]  }
  0x98   : >> { %v3170_v46 = vld [vmem:[%s4148_s1 + $0x770] ss:$8 sps:$4 sm:$0xff]  }
  0x99   : >> { %1412 = vmatpush1.bf16.msra.mxu0 %v3083_v38  ;;  %v3161_v38 = vld [vmem:[%s4148_s1 + $0x480] ss:$8 sps:$4 sm:$0xff]  }
  0x9a   : >> { %1674 = vmatpush1.bf16.msra.mxu1 %v3086_v41  ;;  %1413 = vmatprep.subr.bf16.mxu0 %v3091_v42  ;;  %v2015_v41 = vshrl.u32 %v2006_v27, 16  ;;  %v2019_v42 = vrot.slane %v2017_v34, 1  ;;  %v3233_v27 = vld [vmem:[%s4148_s1 + $0x6c0] ss:$8 sps:$4 sm:$0xff]   ;;  %v3247_v34 = vld [vmem:[%s4148_s1 + $0x6a4] ss:$8 sps:$4 sm:$0xff]  }
  0x9b   : >> { %1675 = vmatprep.subr.bf16.mxu1 %v3094_v43  ;;  %v1499_v43 = vor.u32 %v1498_v37, %v1494_v36  ;;  %v3250_v36 = vld [vmem:[%s4148_s1 + $0x7a4] ss:$8 sps:$4 sm:$0xff]   ;;  %v3245_v37 = vld [vmem:[%s4148_s1 + $0x6a0] ss:$8 sps:$4 sm:$0xff]  }
  0x9d   : >> { %1414 = vmatpush1.bf16.msra.mxu0 %v3089_v45  ;;  %v3167_v45 = vld [vmem:[%s4148_s1 + $0x670] ss:$8 sps:$4 sm:$0xff]  }
  0x9e   : >> { %1676 = vmatpush1.bf16.msra.mxu1 %v3092_v47  ;;  %1415 = vmatprep.subr.bf16.mxu0 %v3097_v48  ;;  %v3175_v47 = vld [vmem:[%s4148_s1 + $0x664] ss:$8 sps:$4 sm:$0xff]  }
  0x9f   : >> { %1677 = vmatprep.subr.bf16.mxu1 %v3100_v49  ;;  %v3178_v48 = vld [vmem:[%s4148_s1 + $0x764] ss:$8 sps:$4 sm:$0xff]   ;;  %v1758_v49 = vcombine.high %v3942_v44, %v3942_v44 }
  0xa1   : >> { %1416 = vmatpush1.bf16.msra.mxu0 %v3095_v50  ;;  %v2020_v50 = vor.u32 %v2019_v42, %v2015_v41  ;;  %v3251_v41 = vld [vmem:[%s4148_s1 + $0x690] ss:$8 sps:$4 sm:$0xff]  }
  0xa2   : >> { %1678 = vmatpush1.bf16.msra.mxu1 %v3098_v51  ;;  %1417 = vmatprep.subr.bf16.mxu0 %v3103_v52  ;;  %v3173_v51 = vld [vmem:[%s4148_s1 + $0x660] ss:$8 sps:$4 sm:$0xff]   ;;  %v3254_v42 = vld [vmem:[%s4148_s1 + $0x790] ss:$8 sps:$4 sm:$0xff]  }
  0xa3   : >> { %1679 = vmatprep.subr.bf16.mxu1 %v3106_v53  ;;  %v3176_v52 = vld [vmem:[%s4148_s1 + $0x760] ss:$8 sps:$4 sm:$0xff]   ;;  %v3181_v53 = vld [vmem:[%s4148_s1 + $0x654] ss:$8 sps:$4 sm:$0xff]  }
  0xa5   : >> { %1418 = vmatpush1.bf16.msra.mxu0 %v3101_v54  ;;  %v3179_v54 = vld [vmem:[%s4148_s1 + $0x650] ss:$8 sps:$4 sm:$0xff]  }
  0xa6   : >> { %1680 = vmatpush1.bf16.msra.mxu1 %v3104_v55  ;;  %1419 = vmatprep.subr.bf16.mxu0 %v3109_v56  ;;  %v3182_v55 = vld [vmem:[%s4148_s1 + $0x750] ss:$8 sps:$4 sm:$0xff]   ;;  %v3187_v56 = vld [vmem:[%s4148_s1 + $0x644] ss:$8 sps:$4 sm:$0xff]  }
  0xa7   : >> { %1681 = vmatprep.subr.bf16.mxu1 %v3112_v57  ;;  %v3190_v57 = vld [vmem:[%s4148_s1 + $0x744] ss:$8 sps:$4 sm:$0xff]  }
  0xa9   : >> { %1420 = vmatpush1.bf16.msra.mxu0 %v3107_v58  ;;  %v3185_v58 = vld [vmem:[%s4148_s1 + $0x640] ss:$8 sps:$4 sm:$0xff]  }
  0xaa   : >> { %1682 = vmatpush1.bf16.msra.mxu1 %v3110_v59  ;;  %1421 = vmatprep.subr.bf16.mxu0 %v3115_v60  ;;  %v3188_v59 = vld [vmem:[%s4148_s1 + $0x740] ss:$8 sps:$4 sm:$0xff]   ;;  %v3193_v60 = vld [vmem:[%s4148_s1 + $0x634] ss:$8 sps:$4 sm:$0xff]  }
  0xab   : >> { %1683 = vmatprep.subr.bf16.mxu1 %v3118_v61  ;;  %v3196_v61 = vld [vmem:[%s4148_s1 + $0x734] ss:$8 sps:$4 sm:$0xff]  }
  0xad   : >> { %1422 = vmatpush1.bf16.msra.mxu0 %v3113_v62  ;;  %v3191_v62 = vld [vmem:[%s4148_s1 + $0x630] ss:$8 sps:$4 sm:$0xff]  }
  0xae   : >> { %1684 = vmatpush1.bf16.msra.mxu1 %v3116_v63  ;;  %1423 = vmatprep.subr.bf16.mxu0 %v3121_v0  ;;  %v3194_v63 = vld [vmem:[%s4148_s1 + $0x730] ss:$8 sps:$4 sm:$0xff]   ;;  %v3199_v0 = vld [vmem:[%s4148_s1 + $0x624] ss:$8 sps:$4 sm:$0xff]  }
  0xaf   : >> { %1685 = vmatprep.subr.bf16.mxu1 %v3124_v1  ;;  %v3202_v1 = vld [vmem:[%s4148_s1 + $0x724] ss:$8 sps:$4 sm:$0xff]  }
  0xb1   : >> { %1424 = vmatpush2.bf16.msra.mxu0 %v3119_v2  ;;  %v3197_v2 = vld [vmem:[%s4148_s1 + $0x620] ss:$8 sps:$4 sm:$0xff]  }
  0xb2   : >> { %1686 = vmatpush2.bf16.msra.mxu1 %v3122_v3  ;;  %1425 = vmatprep.subr.bf16.mxu0 %v3127_v4  ;;  %v3200_v3 = vld [vmem:[%s4148_s1 + $0x720] ss:$8 sps:$4 sm:$0xff]   ;;  %v3205_v4 = vld [vmem:[%s4148_s1 + $0x614] ss:$8 sps:$4 sm:$0xff]  }
  0xb3   : >> { %1687 = vmatprep.subr.bf16.mxu1 %v3130_v5  ;;  %v3208_v5 = vld [vmem:[%s4148_s1 + $0x714] ss:$8 sps:$4 sm:$0xff]  }
  0xb5   : >> { %1426 = vmatpush2.bf16.msra.mxu0 %v3125_v6  ;;  %v3203_v6 = vld [vmem:[%s4148_s1 + $0x610] ss:$8 sps:$4 sm:$0xff]  }
  0xb6   : >> { %1688 = vmatpush2.bf16.msra.mxu1 %v3128_v7  ;;  %1427 = vmatprep.subr.bf16.mxu0 %v3133_v8  ;;  %v3206_v7 = vld [vmem:[%s4148_s1 + $0x710] ss:$8 sps:$4 sm:$0xff]   ;;  %v3211_v8 = vld [vmem:[%s4148_s1 + $0x604] ss:$8 sps:$4 sm:$0xff]  }
  0xb7   : >> { %1689 = vmatprep.subr.bf16.mxu1 %v3136_v9  ;;  %v3214_v9 = vld [vmem:[%s4148_s1 + $0x704] ss:$8 sps:$4 sm:$0xff]  }
  0xb9   : >> { %1428 = vmatpush2.bf16.msra.mxu0 %v3131_v10  ;;  %v3209_v10 = vld [vmem:[%s4148_s1 + $0x600] ss:$8 sps:$4 sm:$0xff]  }
  0xba   : >> { %1690 = vmatpush2.bf16.msra.mxu1 %v3134_v11  ;;  %1429 = vmatprep.subr.bf16.mxu0 %v3139_v12  ;;  %v3212_v11 = vld [vmem:[%s4148_s1 + $0x700] ss:$8 sps:$4 sm:$0xff]   ;;  %v3217_v12 = vld [vmem:[%s4148_s1 + $0x6f4] ss:$8 sps:$4 sm:$0xff]  }
  0xbb   : >> { %1691 = vmatprep.subr.bf16.mxu1 %v3142_v13  ;;  %v3220_v13 = vld [vmem:[%s4148_s1 + $0x7f4] ss:$8 sps:$4 sm:$0xff]  }
  0xbd   : >> { %1430 = vmatpush2.bf16.msra.mxu0 %v3137_v14  ;;  %v3215_v14 = vld [vmem:[%s4148_s1 + $0x6f0] ss:$8 sps:$4 sm:$0xff]  }
  0xbe   : >> { %1692 = vmatpush2.bf16.msra.mxu1 %v3140_v15  ;;  %1431 = vmatprep.subr.bf16.mxu0 %v3145_v16  ;;  %v3218_v15 = vld [vmem:[%s4148_s1 + $0x7f0] ss:$8 sps:$4 sm:$0xff]   ;;  %v3223_v16 = vld [vmem:[%s4148_s1 + $0x6e4] ss:$8 sps:$4 sm:$0xff]  }
  0xbf   : >> { %1693 = vmatprep.subr.bf16.mxu1 %v3148_v17  ;;  %v3226_v17 = vld [vmem:[%s4148_s1 + $0x7e4] ss:$8 sps:$4 sm:$0xff]  }
  0xc1   : >> { %1432 = vmatpush2.bf16.msra.mxu0 %v3143_v18  ;;  %v3221_v18 = vld [vmem:[%s4148_s1 + $0x6e0] ss:$8 sps:$4 sm:$0xff]  }
  0xc2   : >> { %1694 = vmatpush2.bf16.msra.mxu1 %v3146_v19  ;;  %1433 = vmatprep.subr.bf16.mxu0 %v3151_v20  ;;  %v3224_v19 = vld [vmem:[%s4148_s1 + $0x7e0] ss:$8 sps:$4 sm:$0xff]   ;;  %v3229_v20 = vld [vmem:[%s4148_s1 + $0x6d4] ss:$8 sps:$4 sm:$0xff]  }
  0xc3   : >> { %1695 = vmatprep.subr.bf16.mxu1 %v3154_v21  ;;  %v3232_v21 = vld [vmem:[%s4148_s1 + $0x7d4] ss:$8 sps:$4 sm:$0xff]  }
  0xc5   : >> { %1434 = vmatpush2.bf16.msra.mxu0 %v3149_v23  ;;  %v3227_v23 = vld [vmem:[%s4148_s1 + $0x6d0] ss:$8 sps:$4 sm:$0xff]  }
  0xc6   : >> { %1696 = vmatpush2.bf16.msra.mxu1 %v3152_v24  ;;  %1435 = vmatprep.subr.bf16.mxu0 %v3157_v25  ;;  %v3230_v24 = vld [vmem:[%s4148_s1 + $0x7d0] ss:$8 sps:$4 sm:$0xff]   ;;  %v3235_v25 = vld [vmem:[%s4148_s1 + $0x6c4] ss:$8 sps:$4 sm:$0xff]  }
  0xc7   : >> { %1697 = vmatprep.subr.bf16.mxu1 %v3160_v26  ;;  %v3238_v26 = vld [vmem:[%s4148_s1 + $0x7c4] ss:$8 sps:$4 sm:$0xff]  }
  0xc9   : >> { %1436 = vmatpush2.bf16.msra.mxu0 %v3155_v29  ;;  %v3241_v29 = vld [vmem:[%s4148_s1 + $0x6b4] ss:$8 sps:$4 sm:$0xff]  }
  0xca   : >> { %1698 = vmatpush2.bf16.msra.mxu1 %v3158_v30  ;;  %1437 = vmatprep.subr.bf16.mxu0 %v3163_v31  ;;  %v3244_v30 = vld [vmem:[%s4148_s1 + $0x7b4] ss:$8 sps:$4 sm:$0xff]   ;;  %v3239_v31 = vld [vmem:[%s4148_s1 + $0x6b0] ss:$8 sps:$4 sm:$0xff]  }
  0xcb   : >> { %1699 = vmatprep.subr.bf16.mxu1 %v3166_v33  ;;  %v3242_v33 = vld [vmem:[%s4148_s1 + $0x7b0] ss:$8 sps:$4 sm:$0xff]  }
  0xcd   : >> { %1438 = vmatpush2.bf16.msra.mxu0 %v3161_v38  ;;  %v3248_v38 = vld [vmem:[%s4148_s1 + $0x7a0] ss:$8 sps:$4 sm:$0xff]  }
  0xce   : >> { %1700 = vmatpush2.bf16.msra.mxu1 %v3164_v39  ;;  %1921 = vmatprep.subr.bf16.mxu0 %v3169_v40  ;;  %v3253_v39 = vld [vmem:[%s4148_s1 + $0x694] ss:$8 sps:$4 sm:$0xff]  }
  0xcf   : >> { %2183 = vmatprep.subr.bf16.mxu1 %v3172_v35  ;;  %v3256_v40 = vld [vmem:[%s4148_s1 + $0x794] ss:$8 sps:$4 sm:$0xff]   ;;  %v2010_v35 = vshll.u32 %v3899_v22, 16 }
  0xd0   : >> { %1440 = vmatmul.mubr.bf16.vlgmr.msra.gmra.mxu0 %v3751_v32  ;;  %v3184_v32 = vld [vmem:[%s4148_s1 + $0x754] ss:$8 sps:$4 sm:$0xff]  }
  0xd1   : >> { %1702 = vmatmul.mubr.bf16.vlgmr.msra.gmra.mxu1 %v1499_v43  ;;  %1922 = vmatpush1.bf16.msra.mxu0 %v3167_v45  ;;  %v3259_v43 = vld [vmem:[%s4148_s1 + $0x684] ss:$8 sps:$4 sm:$0xff]  }
  0xd2   : >> { %2184 = vmatpush1.bf16.msra.mxu1 %v3170_v46  ;;  %1923 = vmatprep.subr.bf16.mxu0 %v3175_v47  ;;  %v3262_v45 = vld [vmem:[%s4148_s1 + $0x784] ss:$8 sps:$4 sm:$0xff]   ;;  %v2008_v46 = vshrl.u32 %v3899_v22, 16  ;;  %v2012_v47 = vrot.slane %v2010_v35, 1 }
  0xd3   : >> { %2185 = vmatprep.subr.bf16.mxu1 %v3178_v48  ;;  %1953 = vmatprep.mubr.bf16.mxu0 %v1758_v49  ;;  %v3257_v48 = vld [vmem:[%s4148_s1 + $0x680] ss:$8 sps:$4 sm:$0xff]  }
  0xd4   : >> { %2215 = vmatprep.mubr.bf16.mxu1 %v2020_v50  ;;  %v3260_v49 = vld [vmem:[%s4148_s1 + $0x780] ss:$8 sps:$4 sm:$0xff]   ;;  %v2013_v50 = vor.u32 %v2012_v47, %v2008_v46 }
  0xd5   : >> { %1924 = vmatpush1.bf16.msra.mxu0 %v3173_v51 }
  0xd6   : >> { %2186 = vmatpush1.bf16.msra.mxu1 %v3176_v52  ;;  %1925 = vmatprep.subr.bf16.mxu0 %v3181_v53 }
  0xd7   : >> { %2187 = vmatprep.subr.bf16.mxu1 %v3184_v32 }
  0xd9   : >> { %1926 = vmatpush1.bf16.msra.mxu0 %v3179_v54 }
  0xda   : >> { %2188 = vmatpush1.bf16.msra.mxu1 %v3182_v55  ;;  %1927 = vmatprep.subr.bf16.mxu0 %v3187_v56 }
  0xdb   : >> { %2189 = vmatprep.subr.bf16.mxu1 %v3190_v57 }
  0xdd   : >> { %1928 = vmatpush1.bf16.msra.mxu0 %v3185_v58 }
  0xde   : >> { %2190 = vmatpush1.bf16.msra.mxu1 %v3188_v59  ;;  %1929 = vmatprep.subr.bf16.mxu0 %v3193_v60 }
  0xdf   : >> { %2191 = vmatprep.subr.bf16.mxu1 %v3196_v61 }
  0xe1   : >> { %1930 = vmatpush1.bf16.msra.mxu0 %v3191_v62 }
  0xe2   : >> { %2192 = vmatpush1.bf16.msra.mxu1 %v3194_v63  ;;  %1931 = vmatprep.subr.bf16.mxu0 %v3199_v0 }
  0xe3   : >> { %2193 = vmatprep.subr.bf16.mxu1 %v3202_v1 }
  0xe5   : >> { %1932 = vmatpush1.bf16.msra.mxu0 %v3197_v2 }
  0xe6   : >> { %2194 = vmatpush1.bf16.msra.mxu1 %v3200_v3  ;;  %1933 = vmatprep.subr.bf16.mxu0 %v3205_v4 }
  0xe7   : >> { %2195 = vmatprep.subr.bf16.mxu1 %v3208_v5 }
  0xe9   : >> { %1934 = vmatpush1.bf16.msra.mxu0 %v3203_v6 }
  0xea   : >> { %2196 = vmatpush1.bf16.msra.mxu1 %v3206_v7  ;;  %1935 = vmatprep.subr.bf16.mxu0 %v3211_v8 }
  0xeb   : >> { %2197 = vmatprep.subr.bf16.mxu1 %v3214_v9 }
  0xed   : >> { %1936 = vmatpush1.bf16.msra.mxu0 %v3209_v10 }
  0xee   : >> { %2198 = vmatpush1.bf16.msra.mxu1 %v3212_v11  ;;  %1937 = vmatprep.subr.bf16.mxu0 %v3217_v12 }
  0xef   : >> { %2199 = vmatprep.subr.bf16.mxu1 %v3220_v13 }
  0xf1   : >> { %1938 = vmatpush2.bf16.msra.mxu0 %v3215_v14 }
  0xf2   : >> { %2200 = vmatpush2.bf16.msra.mxu1 %v3218_v15  ;;  %1939 = vmatprep.subr.bf16.mxu0 %v3223_v16  ;;  %v2228_v16 = vlaneseq }
  0xf3   : >> { %2201 = vmatprep.subr.bf16.mxu1 %v3226_v17 }
  0xf4   : >> { %v2229_v17 = vshrl.u32 %v2228_v16, 7 }
  0xf5   : >> { %1940 = vmatpush2.bf16.msra.mxu0 %v3221_v18 }
  0xf6   : >> { %2202 = vmatpush2.bf16.msra.mxu1 %v3224_v19  ;;  %1941 = vmatprep.subr.bf16.mxu0 %v3229_v20  ;;  %v2230_v19 = vsub.s32 0, %v2229_v17  ;;  %v2226_v20 = vld [vmem:[%s4149_s2] sm:$0x3] }
  0xf7   : >> { %2203 = vmatprep.subr.bf16.mxu1 %v3232_v21  ;;  %v2234_v21 = vsub.s32 1, %v2229_v17 }
  0xf9   : >> { %1942 = vmatpush2.bf16.msra.mxu0 %v3227_v23 }
  0xfa   : >> { %2204 = vmatpush2.bf16.msra.mxu1 %v3230_v24  ;;  %1943 = vmatprep.subr.bf16.mxu0 %v3235_v25 }
  0xfb   : >> { %2205 = vmatprep.subr.bf16.mxu1 %v3238_v26 }
  0xfd   : >> { %1944 = vmatpush2.bf16.msra.mxu0 %v3233_v27  ;;  %v2231_v27 = vrot.slane %v2226_v20, %v2230_v19 }
  0xfe   : >> { %2206 = vmatpush2.bf16.msra.mxu1 %v3236_v28  ;;  %1945 = vmatprep.subr.bf16.mxu0 %v3241_v29 }
  0xff   : >> { %2207 = vmatprep.subr.bf16.mxu1 %v3244_v30  ;;  %v3279_v30 = vmov 1966171168  }
 0x101   : >> { %1946 = vmatpush2.bf16.msra.mxu0 %v3239_v31  ;;  %v2252_v31 = vunpack.c.l.s4 %v3279_v30 }
 0x102   : >> { %2208 = vmatpush2.bf16.msra.mxu1 %v3242_v33  ;;  %1947 = vmatprep.subr.bf16.mxu0 %v3247_v34 }
 0x103   : >> { %2209 = vmatprep.subr.bf16.mxu1 %v3250_v36  ;;  %v2235_v36 = vrot.slane %v2226_v20, %v2234_v21  ;;  %v2253_v35 = vunpack.c.0.s8 %v2252_v31 }
 0x105   : >> { %1948 = vmatpush2.bf16.msra.mxu0 %v3245_v37  ;;  %v2256_v47 = vsub.s32 %v2253_v35, %v2229_v17 }
 0x106   : >> { %2210 = vmatpush2.bf16.msra.mxu1 %v3248_v38  ;;  %1949 = vmatprep.subr.bf16.mxu0 %v3253_v39 }
 0x107   : >> { %2211 = vmatprep.subr.bf16.mxu1 %v3256_v40 }
 0x109   : >> { %1950 = vmatpush2.bf16.msra.mxu0 %v3251_v41 }
 0x10a   : >> { %2212 = vmatpush2.bf16.msra.mxu1 %v3254_v42  ;;  %1951 = vmatprep.subr.bf16.mxu0 %v3259_v43 }
 0x10b   : >> { %2213 = vmatprep.subr.bf16.mxu1 %v3262_v45 }
 0x10d   : >> { %1952 = vmatpush2.bf16.msra.mxu0 %v3257_v48 }
 0x10e   : >> { %2214 = vmatpush2.bf16.msra.mxu1 %v3260_v49 }
 0x110   : >> { %v465_v51 = vpop.f32.mrf.mxu0  ;;  %1954 = vmatmul.mubr.bf16.vlgmr.msra.gmra.mxu0 %v3942_v44 }
 0x111   : >> { %v677_v52 = vpop.f32.mrf.mxu1  ;;  %2216 = vmatmul.mubr.bf16.vlgmr.msra.gmra.mxu1 %v2013_v50 }
 0x112   : >> { %v678_v22 = vadd.f32 %v677_v52, %v465_v51  ;;  %v467_v53 = vpop.f32.mrf.mxu0 }
 0x113   : >> { %v679_v32 = vpop.f32.mrf.mxu1 }
 0x114   : >> { %v680_v54 = vadd.f32 %v679_v32, %v467_v53  ;;  %v469_v55 = vpop.f32.mrf.mxu0 }
 0x115   : >> { %v681_v56 = vpop.f32.mrf.mxu1 }
 0x116   : >> { %v470_v57 = vpop.f32.mrf.mxu0 }
 0x117   : >> { %v682_v58 = vpop.f32.mrf.mxu1 }
 0x150   : >> { %v927_v59 = vpop.f32.mrf.mxu0 }
 0x151   : >> { %v1189_v60 = vpop.f32.mrf.mxu1  ;;  %v934_v61 = vadd.f32 %v927_v59, %v678_v22 }
 0x152   : >> { %v929_v62 = vpop.f32.mrf.mxu0 }
 0x153   : >> { %v1191_v63 = vpop.f32.mrf.mxu1  ;;  %v1196_v0 = vadd.f32 %v1189_v60, %v934_v61  ;;  %v935_v1 = vadd.f32 %v929_v62, %v680_v54 }
 0x154   : >> { %v931_v2 = vpop.f32.mrf.mxu0 }
 0x155   : >> { %v1193_v3 = vpop.f32.mrf.mxu1  ;;  %v1197_v4 = vadd.f32 %v1191_v63, %v935_v1 }
 0x156   : >> { %v932_v44 = vpop.f32.mrf.mxu0 }
 0x157   : >> { %v1194_v5 = vpop.f32.mrf.mxu1 }
 0x190   : >> { %v1441_v6 = vpop.f32.mrf.mxu0 }
 0x191   : >> { %v1703_v7 = vpop.f32.mrf.mxu1  ;;  %v1448_v8 = vadd.f32 %v1441_v6, %v1196_v0 }
 0x192   : >> { %v1443_v9 = vpop.f32.mrf.mxu0 }
 0x193   : >> { %v1705_v10 = vpop.f32.mrf.mxu1  ;;  %v1710_v11 = vadd.f32 %v1703_v7, %v1448_v8  ;;  %v1449_v18 = vadd.f32 %v1443_v9, %v1197_v4 }
 0x194   : >> { %v1445_v12 = vpop.f32.mrf.mxu0 }
 0x195   : >> { %v1707_v13 = vpop.f32.mrf.mxu1  ;;  %v1711_v25 = vadd.f32 %v1705_v10, %v1449_v18 }
 0x196   : >> { %v1446_v14 = vpop.f32.mrf.mxu0 }
 0x197   : >> { %v1708_v15 = vpop.f32.mrf.mxu1 }
 0x1d0   : >> { %v1955_v23 = vpop.f32.mrf.mxu0 }
 0x1d1   : >> { %v2217_v24 = vpop.f32.mrf.mxu1  ;;  %v1962_v26 = vadd.f32 %v1955_v23, %v1710_v11 }
 0x1d2   : >> { %v1957_v28 = vpop.f32.mrf.mxu0 }
 0x1d3   : >> { %v2219_v29 = vpop.f32.mrf.mxu1  ;;  %v2224_v33 = vadd.f32 %v2217_v24, %v1962_v26  ;;  %v1963_v34 = vadd.f32 %v1957_v28, %v1711_v25 }
 0x1d4   : >> { %v1959_v37 = vpop.f32.mrf.mxu0 }
 0x1d5   : >> { %v2221_v38 = vpop.f32.mrf.mxu1  ;;  %v2238_v39 = vadd.f32 %v2231_v27, %v2224_v33  ;;  %v2225_v40 = vadd.f32 %v2219_v29, %v1963_v34 }
 0x1d6   : >> { %v1960_v41 = vpop.f32.mrf.mxu0 }
 0x1d7   : >> { %v2222_v42 = vpop.f32.mrf.mxu1  ;;  %v2242_v43 = vmul.f32 0.2, %v2238_v39  ;;  %v2239_v45 = vadd.f32 %v2235_v36, %v2225_v40  ;;  %vm2240_vm0 = vcmp.ge.f32.partialorder %v2238_v39, 0.0 }
 0x1d9   : >> { %vm2241_vm1 = vcmp.ge.f32.partialorder %v2239_v45, 0.0  ;;  %v2243_v46 = vmul.f32 0.2, %v2239_v45  ;;  %v2244_v48 = vsel %vm2240_vm0, %v2238_v39, %v2242_v43 }
 0x1db   : >> { %v2245_v49 = vsel %vm2241_vm1, %v2239_v45, %v2243_v46 }
 0x1dc   : >> { %v2852_v50 = vpack.c.bf16 %v2245_v49, %v2244_v48  ;;  %173 = sbr.rel (!%p171_p4) target bundleno = 15 (0xf), region = 81 }
 0x1de   : >> { %v2257_v51 = vrot.slane %v2852_v50, %v2256_v47 }
 0x1e0   : >> { %2853 = vst.sshfl [vmem:[%s2266_s24] sm:$0x5 pattern:$0x73625140] %v2257_v51 }
 0x1e1 PF: > { %s13_s12 = sadd.s32 1, %s3273_s12  }
 0x1e2   : > { %p10_p5 = scmp.ge.s32.totalorder %s13_s12, 4  }
 0x1e4   :  { %12 = sbr.rel (!%p10_p5) target bundleno = 1 (0x1), region = 92 }

</bundles_post_ra>
